<compile_context>
chip_gen: v7x
topology: tpu7x:2x2x1
jax: 0.10.0
libtpu: 0.0.40
codegen_flags: <defaults>
</compile_context>

<pallas_src>
import functools
import math

import jax
import jax.numpy as jnp
from jax.experimental import pallas as pl
from jax.experimental.pallas import tpu as pltpu


# ----------------------------------------------------------------------------
# shared math helpers (usable both inside the Pallas kernel and in the reference)
# ----------------------------------------------------------------------------
def _layer_norm(x, g, b, eps=1e-5):
    mu = jnp.mean(x, axis=-1, keepdims=True)
    xc = x - mu
    var = jnp.mean(xc * xc, axis=-1, keepdims=True)
    return xc * jax.lax.rsqrt(var + eps) * g + b


def _gelu_tanh(x):
    # TODO(synk): PyTorch F.gelu is erf-based; tanh approximation used in kernel AND reference.
    c = math.sqrt(2.0 / math.pi)
    return 0.5 * x * (1.0 + jnp.tanh(c * (x + 0.044715 * x * x * x)))


def _positional_encoding(length, d_model):
    assert d_model % 2 == 0
    pos = jnp.arange(length, dtype=jnp.float32)[:, None]
    div = jnp.exp(jnp.arange(0, d_model, 2, dtype=jnp.float32)
                  * (-math.log(10000.0) / d_model))
    pe = jnp.zeros((length, d_model), jnp.float32)
    pe = pe.at[:, 0::2].set(jnp.sin(pos * div))
    pe = pe.at[:, 1::2].set(jnp.cos(pos * div))
    return pe


# ----------------------------------------------------------------------------
# in-kernel multi-head attention: fused qkv matmul on (BB*L, C) rows, per-head loop
# batched over the BB batch elements, bf16 operands / f32 accumulation, deferred
# softmax normalization via approx reciprocal (EUP slot). Scale 1/sqrt(d_head)
# is pre-folded into the Q columns of w_qkv.
# ----------------------------------------------------------------------------
def _mha_fused(x, w_qkv, w_o, b_o, *, bb, seq, n_heads, d_head):
    inner = n_heads * d_head
    m = bb * seq
    qkv = jnp.dot(x.astype(jnp.bfloat16), w_qkv,
                  preferred_element_type=jnp.float32)            # (M, 3*inner) f32
    qkv3 = qkv.reshape(bb, seq, 3 * inner)                       # leading split (cheap)
    heads = []
    for h in range(n_heads):                                     # small static unroll (H)
        q = qkv3[:, :, h * d_head:(h + 1) * d_head].astype(jnp.bfloat16)
        k = qkv3[:, :, inner + h * d_head:inner + (h + 1) * d_head].astype(jnp.bfloat16)
        v = qkv3[:, :, 2 * inner + h * d_head:2 * inner + (h + 1) * d_head].astype(jnp.bfloat16)
        # batched over BB batch elements in one dot_general per head
        s = jnp.einsum('bqd,bkd->bqk', q, k,
                       preferred_element_type=jnp.float32)       # (BB, L, L), scale pre-folded
        mmax = jnp.max(s, axis=-1, keepdims=True)
        e = jnp.exp(s - mmax)
        denom = jnp.sum(e, axis=-1, keepdims=True)
        pv = jnp.einsum('bqk,bkd->bqd', e.astype(jnp.bfloat16), v,
                        preferred_element_type=jnp.float32)      # (BB, L, d_head)
        heads.append(pv * pl.reciprocal(denom, approx=True))     # deferred normalization
    a = jnp.concatenate(heads, axis=-1).reshape(m, inner).astype(jnp.bfloat16)
    return jnp.dot(a, w_o, preferred_element_type=jnp.float32) + b_o


# ----------------------------------------------------------------------------
# fused kernel: one-hot glyph embed + pos-enc + transformer block + proj_out + residual
# (BB batch elements per grid step, all dense matmuls at M = BB*L rows)
# ----------------------------------------------------------------------------
def _encoder_kernel(idx_ref, emb_ref, vec_ref,
                    w_qkv1_ref, w_o1_ref, w_qkv2_ref, w_o2_ref,
                    w_ff1_ref, b_ff1_ref, w_ff2_ref, w_proj_ref,
                    out_ref, *, bb, seq, n_heads, d_head):
    m = bb * seq
    ns = emb_ref.shape[0]

    # UnifontModule: gather + Linear folded into emb_ref (table already includes emb bias);
    # gather realized as a one-hot matmul (M, ns) @ (ns, C) on the MXU.
    idx = idx_ref[...]                                           # (M, 1) int32
    onehot = (jax.lax.broadcasted_iota(jnp.int32, (m, ns), 1) == idx).astype(jnp.float32)
    h0 = jnp.dot(onehot, emb_ref[...], preferred_element_type=jnp.float32)   # (M, C)
    h0 = h0 + vec_ref[0:m]                                       # + positional encoding (tiled)

    x = h0
    # --- attn1: self-attention ---
    gamma, beta, b_o = vec_ref[m + 0:m + 1], vec_ref[m + 1:m + 2], vec_ref[m + 2:m + 3]
    xn = _layer_norm(x, gamma, beta)
    x = x + _mha_fused(xn, w_qkv1_ref[...], w_o1_ref[...], b_o,
                       bb=bb, seq=seq, n_heads=n_heads, d_head=d_head)
    # --- attn2: context=None -> self-attention ---
    gamma, beta, b_o = vec_ref[m + 3:m + 4], vec_ref[m + 4:m + 5], vec_ref[m + 5:m + 6]
    xn = _layer_norm(x, gamma, beta)
    x = x + _mha_fused(xn, w_qkv2_ref[...], w_o2_ref[...], b_o,
                       bb=bb, seq=seq, n_heads=n_heads, d_head=d_head)
    # --- GEGLU feed-forward ---
    gamma, beta = vec_ref[m + 6:m + 7], vec_ref[m + 7:m + 8]
    xn = _layer_norm(x, gamma, beta)
    hidden = (jnp.dot(xn.astype(jnp.bfloat16), w_ff1_ref[...],
                      preferred_element_type=jnp.float32) + b_ff1_ref[...])  # (M, 8C)
    dff = hidden.shape[-1] // 2
    ff = hidden[:, :dff] * _gelu_tanh(hidden[:, dff:])
    x = x + (jnp.dot(ff.astype(jnp.bfloat16), w_ff2_ref[...],
                     preferred_element_type=jnp.float32) + vec_ref[m + 8:m + 9])
    # --- proj_out + outer residual ---
    y = (jnp.dot(x.astype(jnp.bfloat16), w_proj_ref[...],
                 preferred_element_type=jnp.float32) + vec_ref[m + 9:m + 10])
    out_ref[...] = y + h0                                        # lane-dense (C = 128)


# ----------------------------------------------------------------------------
# batch-block selection: target <=256 rows per step (fills v6e/v7x 256-row MXU,
# >=128 helps v5e), keep >=2 parallel grid steps when possible (v7x: 2 TCs).
# ----------------------------------------------------------------------------
def _pick_block_b(batch, seq, target_rows=256):
    bb = 1
    for c in range(1, batch + 1):
        if batch % c == 0 and c * seq <= target_rows:
            bb = c
    while bb > 1 and batch // bb < 2:
        bb -= 1
        while bb > 1 and batch % bb != 0:
            bb -= 1
    return bb


# ----------------------------------------------------------------------------
# one-time parameter packing (transposes, QKV fuse, bf16 casts, scale folding,
# per-symbol embedding table, consolidated row-parameter block)
# ----------------------------------------------------------------------------
def pack_params(params, *, seq, bb, n_heads, d_head):
    C = params["emb_w"].shape[0]
    inner = n_heads * d_head
    bf = lambda w: w.astype(jnp.bfloat16)

    # UnifontModule Linear folded into a per-symbol table: table[s] = symbols[s] @ W^T + b
    table = params["symbols"] @ params["emb_w"].T + params["emb_b"]        # (num_sym, C)
    ns = table.shape[0]
    ns_pad = ((ns + 7) // 8) * 8
    table = jnp.pad(table, ((0, ns_pad - ns), (0, 0))).astype(jnp.float32)

    # positional encoding tiled to the row block + the eleven (1,C) row params, stacked once
    pe_tiled = jnp.tile(_positional_encoding(seq, C), (bb, 1))             # (M, C)
    rows = [pe_tiled]
    for name in ("ln1_g", "ln1_b", "attn1_o_b", "ln2_g", "ln2_b", "attn2_o_b",
                 "ln3_g", "ln3_b", "ff2_b", "proj_b"):
        rows.append(params[name].reshape(1, C))
    vec = jnp.concatenate(rows, axis=0).astype(jnp.float32)                # (M+10, C)

    scale = 1.0 / math.sqrt(d_head)

    def qkv(i):
        return bf(jnp.concatenate([params[f"attn{i}_q_w"].T * scale,       # scale folded into Q
                                   params[f"attn{i}_k_w"].T,
                                   params[f"attn{i}_v_w"].T], axis=1))     # (C, 3*inner)

    return dict(
        emb_table=table, vec=vec,
        w_qkv1=qkv(1), w_o1=bf(params["attn1_o_w"].T),
        w_qkv2=qkv(2), w_o2=bf(params["attn2_o_w"].T),
        w_ff1=bf(params["ff1_w"].T),
        b_ff1=params["ff1_b"].reshape(1, -1).astype(jnp.float32),
        w_ff2=bf(params["ff2_w"].T),
        w_proj=bf(params["proj_w"].T),
    )


# ----------------------------------------------------------------------------
# wrapper: QR indices (B, L) int -> (B, L, C) f32, matches module forward
# ----------------------------------------------------------------------------
def content_encoder_forward(qr, packed, *, bb, n_heads, d_head):
    B, L = qr.shape
    C = packed["emb_table"].shape[1]
    inner = n_heads * d_head
    if inner != C:
        raise ValueError("in_channels must equal n_heads * d_head for the module's residuals")
    if B % bb != 0 or packed["vec"].shape[0] != bb * L + 10:
        raise ValueError("packed params inconsistent with (B, L, bb)")
    M = bb * L
    ns = packed["emb_table"].shape[0]

    idx = qr.reshape(B * L, 1).astype(jnp.int32)                 # only per-call glue

    resident = [packed["emb_table"], packed["vec"],
                packed["w_qkv1"], packed["w_o1"], packed["w_qkv2"], packed["w_o2"],
                packed["w_ff1"], packed["b_ff1"], packed["w_ff2"], packed["w_proj"]]

    def _resident(a):          # whole array, constant index map -> fetched once, stays in VMEM
        nd = a.ndim
        return pl.BlockSpec(a.shape, lambda b: (0,) * nd)

    in_specs = ([pl.BlockSpec((M, 1), lambda b: (b, 0))]
                + [_resident(a) for a in resident])

    # VMEM budget: double-buffered per-step blocks + resident weights + live temps,
    # clamped well below v7x's 64 MiB physical VMEM.
    nbytes = lambda a: int(a.size) * a.dtype.itemsize
    resident_bytes = sum(nbytes(a) for a in resident)
    block_bytes = M * 4 + M * C * 4
    live_temps = (M * 8 * C * 4 + 8 * M * C * 4
                  + 3 * n_heads * bb * L * L * 4 + M * ns * 4)
    vmem_limit = int(min(48 * 2 ** 20,
                         max(32 * 2 ** 20,
                             2 * (2 * block_bytes + resident_bytes) + 2 * live_temps)))

    dff = 4 * C
    flops_per_row = 2 * (ns * C
                         + 2 * (C * 3 * inner + 2 * L * inner + inner * C)
                         + C * 2 * dff + dff * C + C * C)
    cost = pl.CostEstimate(
        flops=int(B * L * flops_per_row),
        transcendentals=int(B * L * (2 * n_heads * L + dff)),
        bytes_accessed=int(B * L * (4 + C * 4) + resident_bytes))

    out2d = pl.pallas_call(
        functools.partial(_encoder_kernel, bb=bb, seq=L, n_heads=n_heads, d_head=d_head),
        out_shape=jax.ShapeDtypeStruct((B * L, C), jnp.float32),
        grid=(B // bb,),
        in_specs=in_specs,
        out_specs=pl.BlockSpec((M, C), lambda b: (b, 0)),
        compiler_params=pltpu.CompilerParams(
            dimension_semantics=("parallel",),
            vmem_limit_bytes=vmem_limit),
        cost_estimate=cost,
    )(idx, *resident)
    return out2d.reshape(B, L, C)


# ----------------------------------------------------------------------------
# pure-JAX fp32 reference (mirrors the PyTorch forward), used for self-check
# ----------------------------------------------------------------------------
def content_encoder_ref(qr, params, *, n_heads, d_head):
    sym = jnp.take(params["symbols"], qr, axis=0)                        # (B, L, 256)
    h = jnp.einsum("bls,cs->blc", sym, params["emb_w"]) + params["emb_b"]
    B, L, C = h.shape
    h = h + _positional_encoding(L, C)[None]
    residual = h
    x = h
    for i in (1, 2):
        xn = _layer_norm(x, params[f"ln{i}_g"], params[f"ln{i}_b"])
        q = jnp.einsum("blc,dc->bld", xn, params[f"attn{i}_q_w"]).reshape(B, L, n_heads, d_head)
        k = jnp.einsum("blc,dc->bld", xn, params[f"attn{i}_k_w"]).reshape(B, L, n_heads, d_head)
        v = jnp.einsum("blc,dc->bld", xn, params[f"attn{i}_v_w"]).reshape(B, L, n_heads, d_head)
        s = jnp.einsum("blhd,bmhd->bhlm", q, k) / math.sqrt(d_head)
        p = jax.nn.softmax(s, axis=-1)
        o = jnp.einsum("bhlm,bmhd->blhd", p, v).reshape(B, L, n_heads * d_head)
        x = x + jnp.einsum("bld,cd->blc", o, params[f"attn{i}_o_w"]) + params[f"attn{i}_o_b"]
    xn = _layer_norm(x, params["ln3_g"], params["ln3_b"])
    hidden = jnp.einsum("blc,dc->bld", xn, params["ff1_w"]) + params["ff1_b"]
    dff = hidden.shape[-1] // 2
    ff = hidden[..., :dff] * _gelu_tanh(hidden[..., dff:])
    x = x + jnp.einsum("bld,cd->blc", ff, params["ff2_w"]) + params["ff2_b"]
    y = jnp.einsum("blc,dc->bld", x, params["proj_w"]) + params["proj_b"]
    return y + residual


# ----------------------------------------------------------------------------
# deterministic parameter init (shapes mirror the PyTorch module)
# ----------------------------------------------------------------------------
def init_params(key, alphabet, in_channels, n_heads, d_head):
    inner = n_heads * d_head
    assert inner == in_channels
    S = 256                                   # 16x16 unifont glyph flattened
    num_sym = len(alphabet) + 1
    keys = iter(jax.random.split(key, 24))

    def lin(k, out_d, in_d):
        b = 1.0 / math.sqrt(in_d)
        return jax.random.uniform(k, (out_d, in_d), jnp.float32, -b, b)

    def bias(k, out_d, in_d):
        b = 1.0 / math.sqrt(in_d)
        return jax.random.uniform(k, (out_d,), jnp.float32, -b, b)

    symbols = jax.random.bernoulli(next(keys), 0.5, (num_sym, S)).astype(jnp.float32)
    symbols = symbols.at[0].set(0.0)          # index 0 = blank symbol, as in UnifontModule

    p = dict(symbols=symbols,
             emb_w=lin(next(keys), in_channels, S),
             emb_b=bias(next(keys), in_channels, S))
    for i in (1, 2):
        p[f"ln{i}_g"] = jnp.ones((in_channels,), jnp.float32)
        p[f"ln{i}_b"] = jnp.zeros((in_channels,), jnp.float32)
        p[f"attn{i}_q_w"] = lin(next(keys), inner, in_channels)
        p[f"attn{i}_k_w"] = lin(next(keys), inner, in_channels)
        p[f"attn{i}_v_w"] = lin(next(keys), inner, in_channels)
        p[f"attn{i}_o_w"] = lin(next(keys), in_channels, inner)
        p[f"attn{i}_o_b"] = bias(next(keys), in_channels, inner)
    dff = 4 * in_channels
    p["ln3_g"] = jnp.ones((in_channels,), jnp.float32)
    p["ln3_b"] = jnp.zeros((in_channels,), jnp.float32)
    p["ff1_w"] = lin(next(keys), 2 * dff, in_channels)      # GEGLU proj
    p["ff1_b"] = bias(next(keys), 2 * dff, in_channels)
    p["ff2_w"] = lin(next(keys), in_channels, dff)
    p["ff2_b"] = bias(next(keys), in_channels, dff)
    p["proj_w"] = lin(next(keys), in_channels, inner)       # proj_out
    p["proj_b"] = bias(next(keys), in_channels, inner)
    return p


if __name__ == "__main__":
    key = jax.random.PRNGKey(0)
    k_p, k_q = jax.random.split(key)

    alphabet = "abcdefghijklmnopqrstuvwxyz '"
    B, L = 2, 16
    in_channels, n_heads, d_head = 128, 4, 32       # inner_dim = n_heads*d_head = in_channels

    params = init_params(k_p, alphabet, in_channels, n_heads, d_head)
    qr = jax.random.randint(k_q, (B, L), 0, len(alphabet) + 1)

    bb = _pick_block_b(B, L)                        # batch-block factor (rows per step = bb*L)
    packed = pack_params(params, seq=L, bb=bb, n_heads=n_heads, d_head=d_head)

    out = jax.block_until_ready(
        content_encoder_forward(qr, packed, bb=bb, n_heads=n_heads, d_head=d_head))
    assert out.shape == (B, L, in_channels)

    want = content_encoder_ref(qr, params, n_heads=n_heads, d_head=d_head)
    max_err = float(jnp.max(jnp.abs(out - want)))
    # kernel uses bf16 matmul operands + approx reciprocal -> loose (but safe) tolerance
    assert jnp.allclose(out, want, atol=5e-2, rtol=5e-2), max_err

    print("KERNEL_OK")
</pallas_src>

<mosaic_0001>
module attributes {stable_mosaic.version = 11 : i64} {
  func.func @_encoder_kernel(%arg0: i32, %arg1: memref<16x1xi32, #tpu.memory_space<vmem>>, %arg2: memref<32x128xf32, #tpu.memory_space<vmem>>, %arg3: memref<26x128xf32, #tpu.memory_space<vmem>>, %arg4: memref<128x384xbf16, #tpu.memory_space<vmem>>, %arg5: memref<128x128xbf16, #tpu.memory_space<vmem>>, %arg6: memref<128x384xbf16, #tpu.memory_space<vmem>>, %arg7: memref<128x128xbf16, #tpu.memory_space<vmem>>, %arg8: memref<128x1024xbf16, #tpu.memory_space<vmem>>, %arg9: memref<1x1024xf32, #tpu.memory_space<vmem>>, %arg10: memref<512x128xbf16, #tpu.memory_space<vmem>>, %arg11: memref<128x128xbf16, #tpu.memory_space<vmem>>, %arg12: memref<16x128xf32, #tpu.memory_space<vmem>>) attributes {dimension_semantics = [#tpu.dimension_semantics<parallel>], iteration_bounds = array<i64: 2>, scalar_prefetch = 0 : i64, scratch_operands = 0 : i64, tpu.core_type = #tpu.core_type<tc>, window_params = [{transform_indices = @transform_0, window_bounds = array<i64: 16, 1>}, {pipeline_mode = #tpu.pipeline_mode<synchronous>, transform_indices = @transform_1, window_bounds = array<i64: 32, 128>}, {pipeline_mode = #tpu.pipeline_mode<synchronous>, transform_indices = @transform_2, window_bounds = array<i64: 26, 128>}, {pipeline_mode = #tpu.pipeline_mode<synchronous>, transform_indices = @transform_3, window_bounds = array<i64: 128, 384>}, {pipeline_mode = #tpu.pipeline_mode<synchronous>, transform_indices = @transform_4, window_bounds = array<i64: 128, 128>}, {pipeline_mode = #tpu.pipeline_mode<synchronous>, transform_indices = @transform_5, window_bounds = array<i64: 128, 384>}, {pipeline_mode = #tpu.pipeline_mode<synchronous>, transform_indices = @transform_6, window_bounds = array<i64: 128, 128>}, {pipeline_mode = #tpu.pipeline_mode<synchronous>, transform_indices = @transform_7, window_bounds = array<i64: 128, 1024>}, {pipeline_mode = #tpu.pipeline_mode<synchronous>, transform_indices = @transform_8, window_bounds = array<i64: 1, 1024>}, {pipeline_mode = #tpu.pipeline_mode<synchronous>, transform_indices = @transform_9, window_bounds = array<i64: 512, 128>}, {pipeline_mode = #tpu.pipeline_mode<synchronous>, transform_indices = @transform_10, window_bounds = array<i64: 128, 128>}, {transform_indices = @transform_11, window_bounds = array<i64: 16, 128>}]} {
    %c0 = arith.constant 0 : index
    %c0_0 = arith.constant 0 : index
    %0 = vector.load %arg1[%c0, %c0_0] : memref<16x1xi32, #tpu.memory_space<vmem>>, vector<16x1xi32>
    %1 = tpu.iota {dimensions = array<i32: 1>} : vector<16x32xi32>
    %2 = vector.broadcast %0 : vector<16x1xi32> to vector<16x32xi32>
    %3 = arith.cmpi eq, %1, %2 : vector<16x32xi32>
    %4 = arith.extui %3 : vector<16x32xi1> to vector<16x32xi32>
    %5 = arith.sitofp %4 : vector<16x32xi32> to vector<16x32xf32>
    %c0_1 = arith.constant 0 : index
    %c0_2 = arith.constant 0 : index
    %6 = vector.load %arg2[%c0_1, %c0_2] : memref<32x128xf32, #tpu.memory_space<vmem>>, vector<32x128xf32>
    %cst = arith.constant dense<0.000000e+00> : vector<16x128xf32>
    %7 = tpu.matmul %5, %6, %cst {dimension_numbers = #tpu.dot_dimension_numbers<[1], [0], [0], [1], [0, 0, 1, 1], [], []>} : vector<16x32xf32>, vector<32x128xf32>, vector<16x128xf32> -> vector<16x128xf32>
    %c0_3 = arith.constant 0 : index
    %c0_4 = arith.constant 0 : index
    %8 = vector.load %arg3[%c0_3, %c0_4] : memref<26x128xf32, #tpu.memory_space<vmem>>, vector<16x128xf32>
    %9 = arith.addf %7, %8 : vector<16x128xf32>
    %c16 = arith.constant 16 : index
    %c0_5 = arith.constant 0 : index
    %10 = vector.load %arg3[%c16, %c0_5] : memref<26x128xf32, #tpu.memory_space<vmem>>, vector<1x128xf32>
    %c17 = arith.constant 17 : index
    %c0_6 = arith.constant 0 : index
    %11 = vector.load %arg3[%c17, %c0_6] : memref<26x128xf32, #tpu.memory_space<vmem>>, vector<1x128xf32>
    %c18 = arith.constant 18 : index
    %c0_7 = arith.constant 0 : index
    %12 = vector.load %arg3[%c18, %c0_7] : memref<26x128xf32, #tpu.memory_space<vmem>>, vector<1x128xf32>
    %cst_8 = arith.constant dense<0.000000e+00> : vector<16xf32>
    %13 = vector.multi_reduction <add>, %9, %cst_8 [1] : vector<16x128xf32> to vector<16xf32>
    %14 = vector.shape_cast %13 : vector<16xf32> to vector<16x1xf32>
    %cst_9 = arith.constant 1.280000e+02 : f32
    %15 = vector.broadcast %cst_9 : f32 to vector<16x1xf32>
    %16 = arith.divf %14, %15 : vector<16x1xf32>
    %17 = vector.broadcast %16 : vector<16x1xf32> to vector<16x128xf32>
    %18 = arith.subf %9, %17 : vector<16x128xf32>
    %19 = arith.mulf %18, %18 : vector<16x128xf32>
    %cst_10 = arith.constant dense<0.000000e+00> : vector<16xf32>
    %20 = vector.multi_reduction <add>, %19, %cst_10 [1] : vector<16x128xf32> to vector<16xf32>
    %21 = vector.shape_cast %20 : vector<16xf32> to vector<16x1xf32>
    %cst_11 = arith.constant 1.280000e+02 : f32
    %22 = vector.broadcast %cst_11 : f32 to vector<16x1xf32>
    %23 = arith.divf %21, %22 : vector<16x1xf32>
    %cst_12 = arith.constant 9.99999974E-6 : f32
    %24 = vector.broadcast %cst_12 : f32 to vector<16x1xf32>
    %25 = arith.addf %23, %24 : vector<16x1xf32>
    %26 = math.rsqrt %25 : vector<16x1xf32>
    %27 = vector.broadcast %26 : vector<16x1xf32> to vector<16x128xf32>
    %28 = arith.mulf %18, %27 : vector<16x128xf32>
    %29 = vector.broadcast %10 : vector<1x128xf32> to vector<16x128xf32>
    %30 = arith.mulf %28, %29 : vector<16x128xf32>
    %31 = vector.broadcast %11 : vector<1x128xf32> to vector<16x128xf32>
    %32 = arith.addf %30, %31 : vector<16x128xf32>
    %c0_13 = arith.constant 0 : index
    %c0_14 = arith.constant 0 : index
    %33 = vector.load %arg4[%c0_13, %c0_14] : memref<128x384xbf16, #tpu.memory_space<vmem>>, vector<128x384xbf16>
    %c0_15 = arith.constant 0 : index
    %c0_16 = arith.constant 0 : index
    %34 = vector.load %arg5[%c0_15, %c0_16] : memref<128x128xbf16, #tpu.memory_space<vmem>>, vector<128x128xbf16>
    %35 = arith.truncf %32 : vector<16x128xf32> to vector<16x128xbf16>
    %cst_17 = arith.constant dense<0.000000e+00> : vector<16x384xf32>
    %36 = tpu.matmul %35, %33, %cst_17 {dimension_numbers = #tpu.dot_dimension_numbers<[1], [0], [0], [1], [0, 0, 1, 1], [], []>} : vector<16x128xbf16>, vector<128x384xbf16>, vector<16x384xf32> -> vector<16x384xf32>
    %37 = vector.shape_cast %36 : vector<16x384xf32> to vector<1x16x384xf32>
    %38 = vector.extract_strided_slice %37 {offsets = [0, 0, 0], sizes = [1, 16, 32], strides = [1, 1, 1]} : vector<1x16x384xf32> to vector<1x16x32xf32>
    %39 = arith.truncf %38 : vector<1x16x32xf32> to vector<1x16x32xbf16>
    %40 = vector.extract_strided_slice %37 {offsets = [0, 0, 128], sizes = [1, 16, 32], strides = [1, 1, 1]} : vector<1x16x384xf32> to vector<1x16x32xf32>
    %41 = arith.truncf %40 : vector<1x16x32xf32> to vector<1x16x32xbf16>
    %42 = vector.extract_strided_slice %37 {offsets = [0, 0, 256], sizes = [1, 16, 32], strides = [1, 1, 1]} : vector<1x16x384xf32> to vector<1x16x32xf32>
    %43 = arith.truncf %42 : vector<1x16x32xf32> to vector<1x16x32xbf16>
    "tpu.trace_start"() <{level = 10 : i32, message = "bqd,bkd->bqk"}> : () -> ()
    %cst_18 = arith.constant dense<0.000000e+00> : vector<1x16x16xf32>
    %44 = tpu.matmul %39, %41, %cst_18 {dimension_numbers = #tpu.dot_dimension_numbers<[2], [2], [1], [1], [0, 0, 0, 1, 1, 1], [0], [0]>} : vector<1x16x32xbf16>, vector<1x16x32xbf16>, vector<1x16x16xf32> -> vector<1x16x16xf32>
    "tpu.trace_stop"() : () -> ()
    %cst_19 = arith.constant dense<0xFF800000> : vector<1x16xf32>
    %45 = vector.multi_reduction <maximumf>, %44, %cst_19 [2] : vector<1x16x16xf32> to vector<1x16xf32>
    %46 = vector.shape_cast %45 : vector<1x16xf32> to vector<1x16x1xf32>
    %47 = vector.broadcast %46 : vector<1x16x1xf32> to vector<1x16x16xf32>
    %48 = arith.subf %44, %47 : vector<1x16x16xf32>
    %49 = math.exp %48 : vector<1x16x16xf32>
    %cst_20 = arith.constant dense<0.000000e+00> : vector<1x16xf32>
    %50 = vector.multi_reduction <add>, %49, %cst_20 [2] : vector<1x16x16xf32> to vector<1x16xf32>
    %51 = vector.shape_cast %50 : vector<1x16xf32> to vector<1x16x1xf32>
    %52 = arith.truncf %49 : vector<1x16x16xf32> to vector<1x16x16xbf16>
    "tpu.trace_start"() <{level = 10 : i32, message = "bqk,bkd->bqd"}> : () -> ()
    %cst_21 = arith.constant dense<0.000000e+00> : vector<1x16x32xf32>
    %53 = tpu.matmul %52, %43, %cst_21 {dimension_numbers = #tpu.dot_dimension_numbers<[2], [1], [1], [2], [0, 0, 0, 1, 1, 2], [0], [0]>} : vector<1x16x16xbf16>, vector<1x16x32xbf16>, vector<1x16x32xf32> -> vector<1x16x32xf32>
    "tpu.trace_stop"() : () -> ()
    %54 = tpu.reciprocal %51 {approx = true} : vector<1x16x1xf32> -> vector<1x16x1xf32>
    %55 = vector.broadcast %54 : vector<1x16x1xf32> to vector<1x16x32xf32>
    %56 = arith.mulf %53, %55 : vector<1x16x32xf32>
    %57 = vector.extract_strided_slice %37 {offsets = [0, 0, 32], sizes = [1, 16, 32], strides = [1, 1, 1]} : vector<1x16x384xf32> to vector<1x16x32xf32>
    %58 = arith.truncf %57 : vector<1x16x32xf32> to vector<1x16x32xbf16>
    %59 = vector.extract_strided_slice %37 {offsets = [0, 0, 160], sizes = [1, 16, 32], strides = [1, 1, 1]} : vector<1x16x384xf32> to vector<1x16x32xf32>
    %60 = arith.truncf %59 : vector<1x16x32xf32> to vector<1x16x32xbf16>
    %61 = vector.extract_strided_slice %37 {offsets = [0, 0, 288], sizes = [1, 16, 32], strides = [1, 1, 1]} : vector<1x16x384xf32> to vector<1x16x32xf32>
    %62 = arith.truncf %61 : vector<1x16x32xf32> to vector<1x16x32xbf16>
    "tpu.trace_start"() <{level = 10 : i32, message = "bqd,bkd->bqk"}> : () -> ()
    %cst_22 = arith.constant dense<0.000000e+00> : vector<1x16x16xf32>
    %63 = tpu.matmul %58, %60, %cst_22 {dimension_numbers = #tpu.dot_dimension_numbers<[2], [2], [1], [1], [0, 0, 0, 1, 1, 1], [0], [0]>} : vector<1x16x32xbf16>, vector<1x16x32xbf16>, vector<1x16x16xf32> -> vector<1x16x16xf32>
    "tpu.trace_stop"() : () -> ()
    %cst_23 = arith.constant dense<0xFF800000> : vector<1x16xf32>
    %64 = vector.multi_reduction <maximumf>, %63, %cst_23 [2] : vector<1x16x16xf32> to vector<1x16xf32>
    %65 = vector.shape_cast %64 : vector<1x16xf32> to vector<1x16x1xf32>
    %66 = vector.broadcast %65 : vector<1x16x1xf32> to vector<1x16x16xf32>
    %67 = arith.subf %63, %66 : vector<1x16x16xf32>
    %68 = math.exp %67 : vector<1x16x16xf32>
    %cst_24 = arith.constant dense<0.000000e+00> : vector<1x16xf32>
    %69 = vector.multi_reduction <add>, %68, %cst_24 [2] : vector<1x16x16xf32> to vector<1x16xf32>
    %70 = vector.shape_cast %69 : vector<1x16xf32> to vector<1x16x1xf32>
    %71 = arith.truncf %68 : vector<1x16x16xf32> to vector<1x16x16xbf16>
    "tpu.trace_start"() <{level = 10 : i32, message = "bqk,bkd->bqd"}> : () -> ()
    %cst_25 = arith.constant dense<0.000000e+00> : vector<1x16x32xf32>
    %72 = tpu.matmul %71, %62, %cst_25 {dimension_numbers = #tpu.dot_dimension_numbers<[2], [1], [1], [2], [0, 0, 0, 1, 1, 2], [0], [0]>} : vector<1x16x16xbf16>, vector<1x16x32xbf16>, vector<1x16x32xf32> -> vector<1x16x32xf32>
    "tpu.trace_stop"() : () -> ()
    %73 = tpu.reciprocal %70 {approx = true} : vector<1x16x1xf32> -> vector<1x16x1xf32>
    %74 = vector.broadcast %73 : vector<1x16x1xf32> to vector<1x16x32xf32>
    %75 = arith.mulf %72, %74 : vector<1x16x32xf32>
    %76 = vector.extract_strided_slice %37 {offsets = [0, 0, 64], sizes = [1, 16, 32], strides = [1, 1, 1]} : vector<1x16x384xf32> to vector<1x16x32xf32>
    %77 = arith.truncf %76 : vector<1x16x32xf32> to vector<1x16x32xbf16>
    %78 = vector.extract_strided_slice %37 {offsets = [0, 0, 192], sizes = [1, 16, 32], strides = [1, 1, 1]} : vector<1x16x384xf32> to vector<1x16x32xf32>
    %79 = arith.truncf %78 : vector<1x16x32xf32> to vector<1x16x32xbf16>
    %80 = vector.extract_strided_slice %37 {offsets = [0, 0, 320], sizes = [1, 16, 32], strides = [1, 1, 1]} : vector<1x16x384xf32> to vector<1x16x32xf32>
    %81 = arith.truncf %80 : vector<1x16x32xf32> to vector<1x16x32xbf16>
    "tpu.trace_start"() <{level = 10 : i32, message = "bqd,bkd->bqk"}> : () -> ()
    %cst_26 = arith.constant dense<0.000000e+00> : vector<1x16x16xf32>
    %82 = tpu.matmul %77, %79, %cst_26 {dimension_numbers = #tpu.dot_dimension_numbers<[2], [2], [1], [1], [0, 0, 0, 1, 1, 1], [0], [0]>} : vector<1x16x32xbf16>, vector<1x16x32xbf16>, vector<1x16x16xf32> -> vector<1x16x16xf32>
    "tpu.trace_stop"() : () -> ()
    %cst_27 = arith.constant dense<0xFF800000> : vector<1x16xf32>
    %83 = vector.multi_reduction <maximumf>, %82, %cst_27 [2] : vector<1x16x16xf32> to vector<1x16xf32>
    %84 = vector.shape_cast %83 : vector<1x16xf32> to vector<1x16x1xf32>
    %85 = vector.broadcast %84 : vector<1x16x1xf32> to vector<1x16x16xf32>
    %86 = arith.subf %82, %85 : vector<1x16x16xf32>
    %87 = math.exp %86 : vector<1x16x16xf32>
    %cst_28 = arith.constant dense<0.000000e+00> : vector<1x16xf32>
    %88 = vector.multi_reduction <add>, %87, %cst_28 [2] : vector<1x16x16xf32> to vector<1x16xf32>
    %89 = vector.shape_cast %88 : vector<1x16xf32> to vector<1x16x1xf32>
    %90 = arith.truncf %87 : vector<1x16x16xf32> to vector<1x16x16xbf16>
    "tpu.trace_start"() <{level = 10 : i32, message = "bqk,bkd->bqd"}> : () -> ()
    %cst_29 = arith.constant dense<0.000000e+00> : vector<1x16x32xf32>
    %91 = tpu.matmul %90, %81, %cst_29 {dimension_numbers = #tpu.dot_dimension_numbers<[2], [1], [1], [2], [0, 0, 0, 1, 1, 2], [0], [0]>} : vector<1x16x16xbf16>, vector<1x16x32xbf16>, vector<1x16x32xf32> -> vector<1x16x32xf32>
    "tpu.trace_stop"() : () -> ()
    %92 = tpu.reciprocal %89 {approx = true} : vector<1x16x1xf32> -> vector<1x16x1xf32>
    %93 = vector.broadcast %92 : vector<1x16x1xf32> to vector<1x16x32xf32>
    %94 = arith.mulf %91, %93 : vector<1x16x32xf32>
    %95 = vector.extract_strided_slice %37 {offsets = [0, 0, 96], sizes = [1, 16, 32], strides = [1, 1, 1]} : vector<1x16x384xf32> to vector<1x16x32xf32>
    %96 = arith.truncf %95 : vector<1x16x32xf32> to vector<1x16x32xbf16>
    %97 = vector.extract_strided_slice %37 {offsets = [0, 0, 224], sizes = [1, 16, 32], strides = [1, 1, 1]} : vector<1x16x384xf32> to vector<1x16x32xf32>
    %98 = arith.truncf %97 : vector<1x16x32xf32> to vector<1x16x32xbf16>
    %99 = vector.extract_strided_slice %37 {offsets = [0, 0, 352], sizes = [1, 16, 32], strides = [1, 1, 1]} : vector<1x16x384xf32> to vector<1x16x32xf32>
    %100 = arith.truncf %99 : vector<1x16x32xf32> to vector<1x16x32xbf16>
    "tpu.trace_start"() <{level = 10 : i32, message = "bqd,bkd->bqk"}> : () -> ()
    %cst_30 = arith.constant dense<0.000000e+00> : vector<1x16x16xf32>
    %101 = tpu.matmul %96, %98, %cst_30 {dimension_numbers = #tpu.dot_dimension_numbers<[2], [2], [1], [1], [0, 0, 0, 1, 1, 1], [0], [0]>} : vector<1x16x32xbf16>, vector<1x16x32xbf16>, vector<1x16x16xf32> -> vector<1x16x16xf32>
    "tpu.trace_stop"() : () -> ()
    %cst_31 = arith.constant dense<0xFF800000> : vector<1x16xf32>
    %102 = vector.multi_reduction <maximumf>, %101, %cst_31 [2] : vector<1x16x16xf32> to vector<1x16xf32>
    %103 = vector.shape_cast %102 : vector<1x16xf32> to vector<1x16x1xf32>
    %104 = vector.broadcast %103 : vector<1x16x1xf32> to vector<1x16x16xf32>
    %105 = arith.subf %101, %104 : vector<1x16x16xf32>
    %106 = math.exp %105 : vector<1x16x16xf32>
    %cst_32 = arith.constant dense<0.000000e+00> : vector<1x16xf32>
    %107 = vector.multi_reduction <add>, %106, %cst_32 [2] : vector<1x16x16xf32> to vector<1x16xf32>
    %108 = vector.shape_cast %107 : vector<1x16xf32> to vector<1x16x1xf32>
    %109 = arith.truncf %106 : vector<1x16x16xf32> to vector<1x16x16xbf16>
    "tpu.trace_start"() <{level = 10 : i32, message = "bqk,bkd->bqd"}> : () -> ()
    %cst_33 = arith.constant dense<0.000000e+00> : vector<1x16x32xf32>
    %110 = tpu.matmul %109, %100, %cst_33 {dimension_numbers = #tpu.dot_dimension_numbers<[2], [1], [1], [2], [0, 0, 0, 1, 1, 2], [0], [0]>} : vector<1x16x16xbf16>, vector<1x16x32xbf16>, vector<1x16x32xf32> -> vector<1x16x32xf32>
    "tpu.trace_stop"() : () -> ()
    %111 = tpu.reciprocal %108 {approx = true} : vector<1x16x1xf32> -> vector<1x16x1xf32>
    %112 = vector.broadcast %111 : vector<1x16x1xf32> to vector<1x16x32xf32>
    %113 = arith.mulf %110, %112 : vector<1x16x32xf32>
    %114 = tpu.concatenate %56, %75, %94, %113 in 2 : vector<1x16x32xf32>, vector<1x16x32xf32>, vector<1x16x32xf32>, vector<1x16x32xf32> -> vector<1x16x128xf32>
    %115 = vector.shape_cast %114 : vector<1x16x128xf32> to vector<16x128xf32>
    %116 = arith.truncf %115 : vector<16x128xf32> to vector<16x128xbf16>
    %cst_34 = arith.constant dense<0.000000e+00> : vector<16x128xf32>
    %117 = tpu.matmul %116, %34, %cst_34 {dimension_numbers = #tpu.dot_dimension_numbers<[1], [0], [0], [1], [0, 0, 1, 1], [], []>} : vector<16x128xbf16>, vector<128x128xbf16>, vector<16x128xf32> -> vector<16x128xf32>
    %118 = vector.broadcast %12 : vector<1x128xf32> to vector<16x128xf32>
    %119 = arith.addf %117, %118 : vector<16x128xf32>
    %120 = arith.addf %9, %119 : vector<16x128xf32>
    %c19 = arith.constant 19 : index
    %c0_35 = arith.constant 0 : index
    %121 = vector.load %arg3[%c19, %c0_35] : memref<26x128xf32, #tpu.memory_space<vmem>>, vector<1x128xf32>
    %c20 = arith.constant 20 : index
    %c0_36 = arith.constant 0 : index
    %122 = vector.load %arg3[%c20, %c0_36] : memref<26x128xf32, #tpu.memory_space<vmem>>, vector<1x128xf32>
    %c21 = arith.constant 21 : index
    %c0_37 = arith.constant 0 : index
    %123 = vector.load %arg3[%c21, %c0_37] : memref<26x128xf32, #tpu.memory_space<vmem>>, vector<1x128xf32>
    %cst_38 = arith.constant dense<0.000000e+00> : vector<16xf32>
    %124 = vector.multi_reduction <add>, %120, %cst_38 [1] : vector<16x128xf32> to vector<16xf32>
    %125 = vector.shape_cast %124 : vector<16xf32> to vector<16x1xf32>
    %cst_39 = arith.constant 1.280000e+02 : f32
    %126 = vector.broadcast %cst_39 : f32 to vector<16x1xf32>
    %127 = arith.divf %125, %126 : vector<16x1xf32>
    %128 = vector.broadcast %127 : vector<16x1xf32> to vector<16x128xf32>
    %129 = arith.subf %120, %128 : vector<16x128xf32>
    %130 = arith.mulf %129, %129 : vector<16x128xf32>
    %cst_40 = arith.constant dense<0.000000e+00> : vector<16xf32>
    %131 = vector.multi_reduction <add>, %130, %cst_40 [1] : vector<16x128xf32> to vector<16xf32>
    %132 = vector.shape_cast %131 : vector<16xf32> to vector<16x1xf32>
    %cst_41 = arith.constant 1.280000e+02 : f32
    %133 = vector.broadcast %cst_41 : f32 to vector<16x1xf32>
    %134 = arith.divf %132, %133 : vector<16x1xf32>
    %cst_42 = arith.constant 9.99999974E-6 : f32
    %135 = vector.broadcast %cst_42 : f32 to vector<16x1xf32>
    %136 = arith.addf %134, %135 : vector<16x1xf32>
    %137 = math.rsqrt %136 : vector<16x1xf32>
    %138 = vector.broadcast %137 : vector<16x1xf32> to vector<16x128xf32>
    %139 = arith.mulf %129, %138 : vector<16x128xf32>
    %140 = vector.broadcast %121 : vector<1x128xf32> to vector<16x128xf32>
    %141 = arith.mulf %139, %140 : vector<16x128xf32>
    %142 = vector.broadcast %122 : vector<1x128xf32> to vector<16x128xf32>
    %143 = arith.addf %141, %142 : vector<16x128xf32>
    %c0_43 = arith.constant 0 : index
    %c0_44 = arith.constant 0 : index
    %144 = vector.load %arg6[%c0_43, %c0_44] : memref<128x384xbf16, #tpu.memory_space<vmem>>, vector<128x384xbf16>
    %c0_45 = arith.constant 0 : index
    %c0_46 = arith.constant 0 : index
    %145 = vector.load %arg7[%c0_45, %c0_46] : memref<128x128xbf16, #tpu.memory_space<vmem>>, vector<128x128xbf16>
    %146 = arith.truncf %143 : vector<16x128xf32> to vector<16x128xbf16>
    %cst_47 = arith.constant dense<0.000000e+00> : vector<16x384xf32>
    %147 = tpu.matmul %146, %144, %cst_47 {dimension_numbers = #tpu.dot_dimension_numbers<[1], [0], [0], [1], [0, 0, 1, 1], [], []>} : vector<16x128xbf16>, vector<128x384xbf16>, vector<16x384xf32> -> vector<16x384xf32>
    %148 = vector.shape_cast %147 : vector<16x384xf32> to vector<1x16x384xf32>
    %149 = vector.extract_strided_slice %148 {offsets = [0, 0, 0], sizes = [1, 16, 32], strides = [1, 1, 1]} : vector<1x16x384xf32> to vector<1x16x32xf32>
    %150 = arith.truncf %149 : vector<1x16x32xf32> to vector<1x16x32xbf16>
    %151 = vector.extract_strided_slice %148 {offsets = [0, 0, 128], sizes = [1, 16, 32], strides = [1, 1, 1]} : vector<1x16x384xf32> to vector<1x16x32xf32>
    %152 = arith.truncf %151 : vector<1x16x32xf32> to vector<1x16x32xbf16>
    %153 = vector.extract_strided_slice %148 {offsets = [0, 0, 256], sizes = [1, 16, 32], strides = [1, 1, 1]} : vector<1x16x384xf32> to vector<1x16x32xf32>
    %154 = arith.truncf %153 : vector<1x16x32xf32> to vector<1x16x32xbf16>
    "tpu.trace_start"() <{level = 10 : i32, message = "bqd,bkd->bqk"}> : () -> ()
    %cst_48 = arith.constant dense<0.000000e+00> : vector<1x16x16xf32>
    %155 = tpu.matmul %150, %152, %cst_48 {dimension_numbers = #tpu.dot_dimension_numbers<[2], [2], [1], [1], [0, 0, 0, 1, 1, 1], [0], [0]>} : vector<1x16x32xbf16>, vector<1x16x32xbf16>, vector<1x16x16xf32> -> vector<1x16x16xf32>
    "tpu.trace_stop"() : () -> ()
    %cst_49 = arith.constant dense<0xFF800000> : vector<1x16xf32>
    %156 = vector.multi_reduction <maximumf>, %155, %cst_49 [2] : vector<1x16x16xf32> to vector<1x16xf32>
    %157 = vector.shape_cast %156 : vector<1x16xf32> to vector<1x16x1xf32>
    %158 = vector.broadcast %157 : vector<1x16x1xf32> to vector<1x16x16xf32>
    %159 = arith.subf %155, %158 : vector<1x16x16xf32>
    %160 = math.exp %159 : vector<1x16x16xf32>
    %cst_50 = arith.constant dense<0.000000e+00> : vector<1x16xf32>
    %161 = vector.multi_reduction <add>, %160, %cst_50 [2] : vector<1x16x16xf32> to vector<1x16xf32>
    %162 = vector.shape_cast %161 : vector<1x16xf32> to vector<1x16x1xf32>
    %163 = arith.truncf %160 : vector<1x16x16xf32> to vector<1x16x16xbf16>
    "tpu.trace_start"() <{level = 10 : i32, message = "bqk,bkd->bqd"}> : () -> ()
    %cst_51 = arith.constant dense<0.000000e+00> : vector<1x16x32xf32>
    %164 = tpu.matmul %163, %154, %cst_51 {dimension_numbers = #tpu.dot_dimension_numbers<[2], [1], [1], [2], [0, 0, 0, 1, 1, 2], [0], [0]>} : vector<1x16x16xbf16>, vector<1x16x32xbf16>, vector<1x16x32xf32> -> vector<1x16x32xf32>
    "tpu.trace_stop"() : () -> ()
    %165 = tpu.reciprocal %162 {approx = true} : vector<1x16x1xf32> -> vector<1x16x1xf32>
    %166 = vector.broadcast %165 : vector<1x16x1xf32> to vector<1x16x32xf32>
    %167 = arith.mulf %164, %166 : vector<1x16x32xf32>
    %168 = vector.extract_strided_slice %148 {offsets = [0, 0, 32], sizes = [1, 16, 32], strides = [1, 1, 1]} : vector<1x16x384xf32> to vector<1x16x32xf32>
    %169 = arith.truncf %168 : vector<1x16x32xf32> to vector<1x16x32xbf16>
    %170 = vector.extract_strided_slice %148 {offsets = [0, 0, 160], sizes = [1, 16, 32], strides = [1, 1, 1]} : vector<1x16x384xf32> to vector<1x16x32xf32>
    %171 = arith.truncf %170 : vector<1x16x32xf32> to vector<1x16x32xbf16>
    %172 = vector.extract_strided_slice %148 {offsets = [0, 0, 288], sizes = [1, 16, 32], strides = [1, 1, 1]} : vector<1x16x384xf32> to vector<1x16x32xf32>
    %173 = arith.truncf %172 : vector<1x16x32xf32> to vector<1x16x32xbf16>
    "tpu.trace_start"() <{level = 10 : i32, message = "bqd,bkd->bqk"}> : () -> ()
    %cst_52 = arith.constant dense<0.000000e+00> : vector<1x16x16xf32>
    %174 = tpu.matmul %169, %171, %cst_52 {dimension_numbers = #tpu.dot_dimension_numbers<[2], [2], [1], [1], [0, 0, 0, 1, 1, 1], [0], [0]>} : vector<1x16x32xbf16>, vector<1x16x32xbf16>, vector<1x16x16xf32> -> vector<1x16x16xf32>
    "tpu.trace_stop"() : () -> ()
    %cst_53 = arith.constant dense<0xFF800000> : vector<1x16xf32>
    %175 = vector.multi_reduction <maximumf>, %174, %cst_53 [2] : vector<1x16x16xf32> to vector<1x16xf32>
    %176 = vector.shape_cast %175 : vector<1x16xf32> to vector<1x16x1xf32>
    %177 = vector.broadcast %176 : vector<1x16x1xf32> to vector<1x16x16xf32>
    %178 = arith.subf %174, %177 : vector<1x16x16xf32>
    %179 = math.exp %178 : vector<1x16x16xf32>
    %cst_54 = arith.constant dense<0.000000e+00> : vector<1x16xf32>
    %180 = vector.multi_reduction <add>, %179, %cst_54 [2] : vector<1x16x16xf32> to vector<1x16xf32>
    %181 = vector.shape_cast %180 : vector<1x16xf32> to vector<1x16x1xf32>
    %182 = arith.truncf %179 : vector<1x16x16xf32> to vector<1x16x16xbf16>
    "tpu.trace_start"() <{level = 10 : i32, message = "bqk,bkd->bqd"}> : () -> ()
    %cst_55 = arith.constant dense<0.000000e+00> : vector<1x16x32xf32>
    %183 = tpu.matmul %182, %173, %cst_55 {dimension_numbers = #tpu.dot_dimension_numbers<[2], [1], [1], [2], [0, 0, 0, 1, 1, 2], [0], [0]>} : vector<1x16x16xbf16>, vector<1x16x32xbf16>, vector<1x16x32xf32> -> vector<1x16x32xf32>
    "tpu.trace_stop"() : () -> ()
    %184 = tpu.reciprocal %181 {approx = true} : vector<1x16x1xf32> -> vector<1x16x1xf32>
    %185 = vector.broadcast %184 : vector<1x16x1xf32> to vector<1x16x32xf32>
    %186 = arith.mulf %183, %185 : vector<1x16x32xf32>
    %187 = vector.extract_strided_slice %148 {offsets = [0, 0, 64], sizes = [1, 16, 32], strides = [1, 1, 1]} : vector<1x16x384xf32> to vector<1x16x32xf32>
    %188 = arith.truncf %187 : vector<1x16x32xf32> to vector<1x16x32xbf16>
    %189 = vector.extract_strided_slice %148 {offsets = [0, 0, 192], sizes = [1, 16, 32], strides = [1, 1, 1]} : vector<1x16x384xf32> to vector<1x16x32xf32>
    %190 = arith.truncf %189 : vector<1x16x32xf32> to vector<1x16x32xbf16>
    %191 = vector.extract_strided_slice %148 {offsets = [0, 0, 320], sizes = [1, 16, 32], strides = [1, 1, 1]} : vector<1x16x384xf32> to vector<1x16x32xf32>
    %192 = arith.truncf %191 : vector<1x16x32xf32> to vector<1x16x32xbf16>
    "tpu.trace_start"() <{level = 10 : i32, message = "bqd,bkd->bqk"}> : () -> ()
    %cst_56 = arith.constant dense<0.000000e+00> : vector<1x16x16xf32>
    %193 = tpu.matmul %188, %190, %cst_56 {dimension_numbers = #tpu.dot_dimension_numbers<[2], [2], [1], [1], [0, 0, 0, 1, 1, 1], [0], [0]>} : vector<1x16x32xbf16>, vector<1x16x32xbf16>, vector<1x16x16xf32> -> vector<1x16x16xf32>
    "tpu.trace_stop"() : () -> ()
    %cst_57 = arith.constant dense<0xFF800000> : vector<1x16xf32>
    %194 = vector.multi_reduction <maximumf>, %193, %cst_57 [2] : vector<1x16x16xf32> to vector<1x16xf32>
    %195 = vector.shape_cast %194 : vector<1x16xf32> to vector<1x16x1xf32>
    %196 = vector.broadcast %195 : vector<1x16x1xf32> to vector<1x16x16xf32>
    %197 = arith.subf %193, %196 : vector<1x16x16xf32>
    %198 = math.exp %197 : vector<1x16x16xf32>
    %cst_58 = arith.constant dense<0.000000e+00> : vector<1x16xf32>
    %199 = vector.multi_reduction <add>, %198, %cst_58 [2] : vector<1x16x16xf32> to vector<1x16xf32>
    %200 = vector.shape_cast %199 : vector<1x16xf32> to vector<1x16x1xf32>
    %201 = arith.truncf %198 : vector<1x16x16xf32> to vector<1x16x16xbf16>
    "tpu.trace_start"() <{level = 10 : i32, message = "bqk,bkd->bqd"}> : () -> ()
    %cst_59 = arith.constant dense<0.000000e+00> : vector<1x16x32xf32>
    %202 = tpu.matmul %201, %192, %cst_59 {dimension_numbers = #tpu.dot_dimension_numbers<[2], [1], [1], [2], [0, 0, 0, 1, 1, 2], [0], [0]>} : vector<1x16x16xbf16>, vector<1x16x32xbf16>, vector<1x16x32xf32> -> vector<1x16x32xf32>
    "tpu.trace_stop"() : () -> ()
    %203 = tpu.reciprocal %200 {approx = true} : vector<1x16x1xf32> -> vector<1x16x1xf32>
    %204 = vector.broadcast %203 : vector<1x16x1xf32> to vector<1x16x32xf32>
    %205 = arith.mulf %202, %204 : vector<1x16x32xf32>
    %206 = vector.extract_strided_slice %148 {offsets = [0, 0, 96], sizes = [1, 16, 32], strides = [1, 1, 1]} : vector<1x16x384xf32> to vector<1x16x32xf32>
    %207 = arith.truncf %206 : vector<1x16x32xf32> to vector<1x16x32xbf16>
    %208 = vector.extract_strided_slice %148 {offsets = [0, 0, 224], sizes = [1, 16, 32], strides = [1, 1, 1]} : vector<1x16x384xf32> to vector<1x16x32xf32>
    %209 = arith.truncf %208 : vector<1x16x32xf32> to vector<1x16x32xbf16>
    %210 = vector.extract_strided_slice %148 {offsets = [0, 0, 352], sizes = [1, 16, 32], strides = [1, 1, 1]} : vector<1x16x384xf32> to vector<1x16x32xf32>
    %211 = arith.truncf %210 : vector<1x16x32xf32> to vector<1x16x32xbf16>
    "tpu.trace_start"() <{level = 10 : i32, message = "bqd,bkd->bqk"}> : () -> ()
    %cst_60 = arith.constant dense<0.000000e+00> : vector<1x16x16xf32>
    %212 = tpu.matmul %207, %209, %cst_60 {dimension_numbers = #tpu.dot_dimension_numbers<[2], [2], [1], [1], [0, 0, 0, 1, 1, 1], [0], [0]>} : vector<1x16x32xbf16>, vector<1x16x32xbf16>, vector<1x16x16xf32> -> vector<1x16x16xf32>
    "tpu.trace_stop"() : () -> ()
    %cst_61 = arith.constant dense<0xFF800000> : vector<1x16xf32>
    %213 = vector.multi_reduction <maximumf>, %212, %cst_61 [2] : vector<1x16x16xf32> to vector<1x16xf32>
    %214 = vector.shape_cast %213 : vector<1x16xf32> to vector<1x16x1xf32>
    %215 = vector.broadcast %214 : vector<1x16x1xf32> to vector<1x16x16xf32>
    %216 = arith.subf %212, %215 : vector<1x16x16xf32>
    %217 = math.exp %216 : vector<1x16x16xf32>
    %cst_62 = arith.constant dense<0.000000e+00> : vector<1x16xf32>
    %218 = vector.multi_reduction <add>, %217, %cst_62 [2] : vector<1x16x16xf32> to vector<1x16xf32>
    %219 = vector.shape_cast %218 : vector<1x16xf32> to vector<1x16x1xf32>
    %220 = arith.truncf %217 : vector<1x16x16xf32> to vector<1x16x16xbf16>
    "tpu.trace_start"() <{level = 10 : i32, message = "bqk,bkd->bqd"}> : () -> ()
    %cst_63 = arith.constant dense<0.000000e+00> : vector<1x16x32xf32>
    %221 = tpu.matmul %220, %211, %cst_63 {dimension_numbers = #tpu.dot_dimension_numbers<[2], [1], [1], [2], [0, 0, 0, 1, 1, 2], [0], [0]>} : vector<1x16x16xbf16>, vector<1x16x32xbf16>, vector<1x16x32xf32> -> vector<1x16x32xf32>
    "tpu.trace_stop"() : () -> ()
    %222 = tpu.reciprocal %219 {approx = true} : vector<1x16x1xf32> -> vector<1x16x1xf32>
    %223 = vector.broadcast %222 : vector<1x16x1xf32> to vector<1x16x32xf32>
    %224 = arith.mulf %221, %223 : vector<1x16x32xf32>
    %225 = tpu.concatenate %167, %186, %205, %224 in 2 : vector<1x16x32xf32>, vector<1x16x32xf32>, vector<1x16x32xf32>, vector<1x16x32xf32> -> vector<1x16x128xf32>
    %226 = vector.shape_cast %225 : vector<1x16x128xf32> to vector<16x128xf32>
    %227 = arith.truncf %226 : vector<16x128xf32> to vector<16x128xbf16>
    %cst_64 = arith.constant dense<0.000000e+00> : vector<16x128xf32>
    %228 = tpu.matmul %227, %145, %cst_64 {dimension_numbers = #tpu.dot_dimension_numbers<[1], [0], [0], [1], [0, 0, 1, 1], [], []>} : vector<16x128xbf16>, vector<128x128xbf16>, vector<16x128xf32> -> vector<16x128xf32>
    %229 = vector.broadcast %123 : vector<1x128xf32> to vector<16x128xf32>
    %230 = arith.addf %228, %229 : vector<16x128xf32>
    %231 = arith.addf %120, %230 : vector<16x128xf32>
    %c22 = arith.constant 22 : index
    %c0_65 = arith.constant 0 : index
    %232 = vector.load %arg3[%c22, %c0_65] : memref<26x128xf32, #tpu.memory_space<vmem>>, vector<1x128xf32>
    %c23 = arith.constant 23 : index
    %c0_66 = arith.constant 0 : index
    %233 = vector.load %arg3[%c23, %c0_66] : memref<26x128xf32, #tpu.memory_space<vmem>>, vector<1x128xf32>
    %cst_67 = arith.constant dense<0.000000e+00> : vector<16xf32>
    %234 = vector.multi_reduction <add>, %231, %cst_67 [1] : vector<16x128xf32> to vector<16xf32>
    %235 = vector.shape_cast %234 : vector<16xf32> to vector<16x1xf32>
    %cst_68 = arith.constant 1.280000e+02 : f32
    %236 = vector.broadcast %cst_68 : f32 to vector<16x1xf32>
    %237 = arith.divf %235, %236 : vector<16x1xf32>
    %238 = vector.broadcast %237 : vector<16x1xf32> to vector<16x128xf32>
    %239 = arith.subf %231, %238 : vector<16x128xf32>
    %240 = arith.mulf %239, %239 : vector<16x128xf32>
    %cst_69 = arith.constant dense<0.000000e+00> : vector<16xf32>
    %241 = vector.multi_reduction <add>, %240, %cst_69 [1] : vector<16x128xf32> to vector<16xf32>
    %242 = vector.shape_cast %241 : vector<16xf32> to vector<16x1xf32>
    %cst_70 = arith.constant 1.280000e+02 : f32
    %243 = vector.broadcast %cst_70 : f32 to vector<16x1xf32>
    %244 = arith.divf %242, %243 : vector<16x1xf32>
    %cst_71 = arith.constant 9.99999974E-6 : f32
    %245 = vector.broadcast %cst_71 : f32 to vector<16x1xf32>
    %246 = arith.addf %244, %245 : vector<16x1xf32>
    %247 = math.rsqrt %246 : vector<16x1xf32>
    %248 = vector.broadcast %247 : vector<16x1xf32> to vector<16x128xf32>
    %249 = arith.mulf %239, %248 : vector<16x128xf32>
    %250 = vector.broadcast %232 : vector<1x128xf32> to vector<16x128xf32>
    %251 = arith.mulf %249, %250 : vector<16x128xf32>
    %252 = vector.broadcast %233 : vector<1x128xf32> to vector<16x128xf32>
    %253 = arith.addf %251, %252 : vector<16x128xf32>
    %254 = arith.truncf %253 : vector<16x128xf32> to vector<16x128xbf16>
    %c0_72 = arith.constant 0 : index
    %c0_73 = arith.constant 0 : index
    %255 = vector.load %arg8[%c0_72, %c0_73] : memref<128x1024xbf16, #tpu.memory_space<vmem>>, vector<128x1024xbf16>
    %cst_74 = arith.constant dense<0.000000e+00> : vector<16x1024xf32>
    %256 = tpu.matmul %254, %255, %cst_74 {dimension_numbers = #tpu.dot_dimension_numbers<[1], [0], [0], [1], [0, 0, 1, 1], [], []>} : vector<16x128xbf16>, vector<128x1024xbf16>, vector<16x1024xf32> -> vector<16x1024xf32>
    %c0_75 = arith.constant 0 : index
    %c0_76 = arith.constant 0 : index
    %257 = vector.load %arg9[%c0_75, %c0_76] : memref<1x1024xf32, #tpu.memory_space<vmem>>, vector<1x1024xf32>
    %258 = vector.broadcast %257 : vector<1x1024xf32> to vector<16x1024xf32>
    %259 = arith.addf %256, %258 : vector<16x1024xf32>
    %260 = vector.extract_strided_slice %259 {offsets = [0, 0], sizes = [16, 512], strides = [1, 1]} : vector<16x1024xf32> to vector<16x512xf32>
    %261 = vector.extract_strided_slice %259 {offsets = [0, 512], sizes = [16, 512], strides = [1, 1]} : vector<16x1024xf32> to vector<16x512xf32>
    %cst_77 = arith.constant 5.000000e-01 : f32
    %262 = vector.broadcast %cst_77 : f32 to vector<16x512xf32>
    %263 = arith.mulf %262, %261 : vector<16x512xf32>
    %cst_78 = arith.constant 4.471500e-02 : f32
    %264 = vector.broadcast %cst_78 : f32 to vector<16x512xf32>
    %265 = arith.mulf %264, %261 : vector<16x512xf32>
    %266 = arith.mulf %265, %261 : vector<16x512xf32>
    %267 = arith.mulf %266, %261 : vector<16x512xf32>
    %268 = arith.addf %261, %267 : vector<16x512xf32>
    %cst_79 = arith.constant 0.797884583 : f32
    %269 = vector.broadcast %cst_79 : f32 to vector<16x512xf32>
    %270 = arith.mulf %269, %268 : vector<16x512xf32>
    %271 = math.tanh %270 : vector<16x512xf32>
    %cst_80 = arith.constant 1.000000e+00 : f32
    %272 = vector.broadcast %cst_80 : f32 to vector<16x512xf32>
    %273 = arith.addf %272, %271 : vector<16x512xf32>
    %274 = arith.mulf %263, %273 : vector<16x512xf32>
    %275 = arith.mulf %260, %274 : vector<16x512xf32>
    %276 = arith.truncf %275 : vector<16x512xf32> to vector<16x512xbf16>
    %c0_81 = arith.constant 0 : index
    %c0_82 = arith.constant 0 : index
    %277 = vector.load %arg10[%c0_81, %c0_82] : memref<512x128xbf16, #tpu.memory_space<vmem>>, vector<512x128xbf16>
    %cst_83 = arith.constant dense<0.000000e+00> : vector<16x128xf32>
    %278 = tpu.matmul %276, %277, %cst_83 {dimension_numbers = #tpu.dot_dimension_numbers<[1], [0], [0], [1], [0, 0, 1, 1], [], []>} : vector<16x512xbf16>, vector<512x128xbf16>, vector<16x128xf32> -> vector<16x128xf32>
    %c24 = arith.constant 24 : index
    %c0_84 = arith.constant 0 : index
    %279 = vector.load %arg3[%c24, %c0_84] : memref<26x128xf32, #tpu.memory_space<vmem>>, vector<1x128xf32>
    %280 = vector.broadcast %279 : vector<1x128xf32> to vector<16x128xf32>
    %281 = arith.addf %278, %280 : vector<16x128xf32>
    %282 = arith.addf %231, %281 : vector<16x128xf32>
    %283 = arith.truncf %282 : vector<16x128xf32> to vector<16x128xbf16>
    %c0_85 = arith.constant 0 : index
    %c0_86 = arith.constant 0 : index
    %284 = vector.load %arg11[%c0_85, %c0_86] : memref<128x128xbf16, #tpu.memory_space<vmem>>, vector<128x128xbf16>
    %cst_87 = arith.constant dense<0.000000e+00> : vector<16x128xf32>
    %285 = tpu.matmul %283, %284, %cst_87 {dimension_numbers = #tpu.dot_dimension_numbers<[1], [0], [0], [1], [0, 0, 1, 1], [], []>} : vector<16x128xbf16>, vector<128x128xbf16>, vector<16x128xf32> -> vector<16x128xf32>
    %c25 = arith.constant 25 : index
    %c0_88 = arith.constant 0 : index
    %286 = vector.load %arg3[%c25, %c0_88] : memref<26x128xf32, #tpu.memory_space<vmem>>, vector<1x128xf32>
    %287 = vector.broadcast %286 : vector<1x128xf32> to vector<16x128xf32>
    %288 = arith.addf %285, %287 : vector<16x128xf32>
    %289 = arith.addf %288, %9 : vector<16x128xf32>
    %c0_89 = arith.constant 0 : index
    %c0_90 = arith.constant 0 : index
    %290 = vector.load %arg12[%c0_89, %c0_90] : memref<16x128xf32, #tpu.memory_space<vmem>>, vector<16x128xf32>
    tpu.vector_store %arg12[%c0_89, %c0_90], %289 {strides = array<i32>} : memref<16x128xf32, #tpu.memory_space<vmem>>, vector<16x128xf32>,
    return
  }
  func.func @transform_0(%arg0: i32) -> (i32, i32) {
    %c0_i32 = arith.constant 0 : i32
    %c0_i32_0 = arith.constant 0 : i32
    return %arg0, %c0_i32 : i32, i32
  }
  func.func @transform_1(%arg0: i32) -> (i32, i32) {
    %c0_i32 = arith.constant 0 : i32
    %c0_i32_0 = arith.constant 0 : i32
    %c0_i32_1 = arith.constant 0 : i32
    return %c0_i32, %c0_i32_0 : i32, i32
  }
  func.func @transform_2(%arg0: i32) -> (i32, i32) {
    %c0_i32 = arith.constant 0 : i32
    %c0_i32_0 = arith.constant 0 : i32
    %c0_i32_1 = arith.constant 0 : i32
    return %c0_i32, %c0_i32_0 : i32, i32
  }
  func.func @transform_3(%arg0: i32) -> (i32, i32) {
    %c0_i32 = arith.constant 0 : i32
    %c0_i32_0 = arith.constant 0 : i32
    %c0_i32_1 = arith.constant 0 : i32
    return %c0_i32, %c0_i32_0 : i32, i32
  }
  func.func @transform_4(%arg0: i32) -> (i32, i32) {
    %c0_i32 = arith.constant 0 : i32
    %c0_i32_0 = arith.constant 0 : i32
    %c0_i32_1 = arith.constant 0 : i32
    return %c0_i32, %c0_i32_0 : i32, i32
  }
  func.func @transform_5(%arg0: i32) -> (i32, i32) {
    %c0_i32 = arith.constant 0 : i32
    %c0_i32_0 = arith.constant 0 : i32
    %c0_i32_1 = arith.constant 0 : i32
    return %c0_i32, %c0_i32_0 : i32, i32
  }
  func.func @transform_6(%arg0: i32) -> (i32, i32) {
    %c0_i32 = arith.constant 0 : i32
    %c0_i32_0 = arith.constant 0 : i32
    %c0_i32_1 = arith.constant 0 : i32
    return %c0_i32, %c0_i32_0 : i32, i32
  }
  func.func @transform_7(%arg0: i32) -> (i32, i32) {
    %c0_i32 = arith.constant 0 : i32
    %c0_i32_0 = arith.constant 0 : i32
    %c0_i32_1 = arith.constant 0 : i32
    return %c0_i32, %c0_i32_0 : i32, i32
  }
  func.func @transform_8(%arg0: i32) -> (i32, i32) {
    %c0_i32 = arith.constant 0 : i32
    %c0_i32_0 = arith.constant 0 : i32
    %c0_i32_1 = arith.constant 0 : i32
    return %c0_i32, %c0_i32_0 : i32, i32
  }
  func.func @transform_9(%arg0: i32) -> (i32, i32) {
    %c0_i32 = arith.constant 0 : i32
    %c0_i32_0 = arith.constant 0 : i32
    %c0_i32_1 = arith.constant 0 : i32
    return %c0_i32, %c0_i32_0 : i32, i32
  }
  func.func @transform_10(%arg0: i32) -> (i32, i32) {
    %c0_i32 = arith.constant 0 : i32
    %c0_i32_0 = arith.constant 0 : i32
    %c0_i32_1 = arith.constant 0 : i32
    return %c0_i32, %c0_i32_0 : i32, i32
  }
  func.func @transform_11(%arg0: i32) -> (i32, i32) {
    %c0_i32 = arith.constant 0 : i32
    %c0_i32_0 = arith.constant 0 : i32
    return %arg0, %c0_i32 : i32, i32
  }
}

</mosaic_0001>

<bundles_post_ra>
// kernel: tpu_custom_call.1
= control target key start
LH: loop header
LB: loop body
LE: loop exit
PB: predicated region body
PF: predicated region fallthrough
CT: control target
= control target key end

     0   :  { %s5912_s0 = inlined_call_operand.vmem [shape: s32[32,1], index: 0, kind: input, shape index: {}]   ;;  %s5913_s1 = inlined_call_operand.hbm [shape: f32[32,128], index: 1, kind: input, shape index: {}]   ;;  %s5914_s2 = inlined_call_operand.hbm [shape: f32[26,128], index: 2, kind: input, shape index: {}]   ;;  %s5915_s3 = inlined_call_operand.hbm [shape: bf16[128,384], index: 3, kind: input, shape index: {}]   ;;  %s5916_s4 = inlined_call_operand.hbm [shape: bf16[128,128], index: 4, kind: input, shape index: {}]   ;;  %s5917_s5 = inlined_call_operand.hbm [shape: bf16[128,384], index: 5, kind: input, shape index: {}]   ;;  %s5918_s6 = inlined_call_operand.hbm [shape: bf16[128,128], index: 6, kind: input, shape index: {}]   ;;  %s5919_s7 = inlined_call_operand.hbm [shape: bf16[128,1024], index: 7, kind: input, shape index: {}]   ;;  %s5920_s8 = inlined_call_operand.hbm [shape: f32[1,1024], index: 8, kind: input, shape index: {}]   ;;  %s5921_s9 = inlined_call_operand.hbm [shape: bf16[512,128], index: 9, kind: input, shape index: {}]   ;;  %s5922_s10 = inlined_call_operand.vmem [shape: bf16[128,128], index: 10, kind: input, shape index: {}]   ;;  %s5923_s11 = inlined_call_operand.hbm [shape: f32[32,128], index: 11, kind: output, shape index: {}]  }
   0x1   :  { %5937 = sst [smem:[#allocation30_spill]] %s5914_s2 }
   0x2   :  { %16 = vsyncpa [#allocation3], 0 }
   0x3   :  { %17 = vsyncpa [#allocation6], 0 }
   0x4   :  { %18 = vsyncpa [#allocation9], 0 }
   0x5   :  { %19 = vsyncpa [#allocation12], 0 }
   0x6   :  { %20 = vsyncpa [#allocation15], 0 }
   0x7   :  { %21 = vsyncpa [#allocation4], 0 }
   0x8   :  { %23 = vsyncpa [#allocation4 + $0x1], 0  ;;  %s5165_s17 = smov 0   ;;  %s5167_s18 = smov 0  }
   0x9   :  { %s5169_s19 = smov 0   ;;  %s5171_s20 = smov 0  }
   0xa LB: > { %5938 = sst [smem:[#allocation24_spill]] %s5065_s17  ;;  %s5186_s21 = sadd.s32 4294967295, %s5077_s20   ;;  %s5077_s20 = sphi %s5171_s20, %s5970_s20   ;;  %s5073_s19 = sphi %s5169_s19, %s5972_s19   ;;  %s5069_s18 = sphi %s5167_s18, %s5974_s18   ;;  %s5065_s17 = sphi %s5165_s17, %s5973_s17  }
   0xb   : > { %5939 = sst [smem:[#allocation25_spill]] %s5073_s19  ;;  %s3783_s22 = sadd.s32 4294967294, %s5077_s20  }
   0xc   : > { %5940 = sst [smem:[#allocation26_spill]] %s5077_s20  ;;  %s5190_s23 = sadd.s32 1, %s5077_s20  }
   0xd   : > { %5941 = sst [smem:[#allocation27_spill]] %s5190_s23  ;;  %s272_s24 = sadd.s32 1, %s5073_s19 }
   0xe   : > { %s269_s25 = ssub.s32 %s5077_s20, %s5190_s23  ;;  %p282_p0 = scmp.ne.s32.totalorder %s5073_s19, %s5069_s18 }
   0xf   : > { %p270_p1 = scmp.eq.s32.totalorder %s269_s25, 0  ;;  %p283_p2 = scmp.eq.s32.totalorder %s5186_s21, 1 }
  0x10   : > { %p288_p3 = scmp.ne.s32.totalorder %s5069_s18, %s5065_s17  ;;  %p289_p4 = scmp.eq.s32.totalorder %s3783_s22, 1 }
  0x11   : > { %s5201_s26 = scalar_select %p270_p1, %s5073_s19, %s272_s24  }
  0x12   : > { %p5203_p5 = por %p283_p2, %p282_p0  ;;  %p5207_p6 = por %p289_p4, %p288_p3 }
  0x13   : > { %5942 = sst [smem:[#allocation28_spill]] %s5201_s26  ;;  %p3784_p7 = scmp.ge.s32.totalorder %s5077_s20, 1 }
  0x14   : > { %s5943_s27 = scalar_select %p5203_p5, 1, 0 }
  0x15   : > { %s5944_s28 = scalar_select %p5207_p6, 1, 0 }
  0x16   : > { %p296_p8 = scmp.lt.s32.totalorder %s5077_s20, 3  ;;  %p5925_p9 = scmp.eq.s32.totalorder %s5186_s21, 0 }
  0x17   : > { %5945 = sst [smem:[#allocation29_spill]] %s5944_s28  ;;  %s5079_s30 = smov [#allocation5]  }
  0x18   : > { %p5214_p10 = pnand %p3784_p7, %p296_p8  ;;  %s321_s12 = sshll.u32 %s5079_s30, 4  ;;  %s322_s12 = int_to_ptr.vmem [resolvable:$true] %s321_s12 }
  0x19   : > { %s5080_s14 = smov [#allocation8]   ;;  %s5948_s2 = sld [smem:[#allocation30_spill]] }
  0x1a   : > { %s5946_s29 = scalar_select %p5214_p10, 1, 0 }
  0x1b   : > { %p4392_p11 = pneg %p5214_p10  ;;  %s347_s15 = sshll.u32 %s5080_s14, 4  ;;  %s5226_s15 = int_to_ptr.vmem [resolvable:$true] %s347_s15 }
  0x1d   : > { %p5222_p12 = pnand %p5925_p9, %p4392_p11 }
  0x1f   : > { %s4743_s24 = scalar_lea.hbm %s5948_s2, 512  ;;  %p5236_p0 = pneg %p5222_p12 }
  0x20   : > { %p4744_p13 = scmp.ne.s32.totalorder %s5948_s2, %s4743_s24  ;;  %p4750_p3 = scmp.lt.u32.totalorder %s4743_s24, %s5948_s2 }
  0x22   : > { %p4746_p1 = pnand %p5236_p0, %p4744_p13 }
  0x24   : > { %p4747_p2 = pneg %p4746_p1 }
  0x26   : > { %p4752_p4 = pnand %p4750_p3, %p4747_p2 }
  0x28   : > { %4755 = shalt.err (!%p4752_p4)
}
  0x29   : > { %s4756_s16 = scalar_lea.vmem %s322_s12, 512  ;;  %p4764_p9 = scmp.lt.s32.totalorder %s322_s12, %s322_s12 }
  0x2a   : > { %p4757_p7 = scmp.ne.s32.totalorder %s322_s12, %s4756_s16  ;;  %p4765_p6 = scmp.lt.s32.totalorder %s4756_s16, %s4756_s16 }
  0x2c   : > { %p4759_p8 = pnand %p4757_p7, %p5236_p0  ;;  %p4766_p5 = por %p4765_p6, %p4764_p9 }
  0x2e   : > { %p4760_p11 = pneg %p4759_p8 }
  0x30   : > { %p4767_p10 = pnand %p4766_p5, %p4760_p11 }
  0x32   : > { %4770 = shalt.err (!%p4767_p10)
}
  0x33   : > { %s5933_s26 = smov 128   ;;  %s5934_s22 = smov 8  }
  0x34   : > { %4398 = dma.hbm_to_vmem [thread:$0]  (!%p5222_p12), %s5948_s2, 512, %s322_s12, [#allocation6], %s5933_s26, %s5933_s26, %s5934_s22  }
  0x35   : > { %s4771_s23 = scalar_lea.hbm %s5916_s4, 1024 }
  0x36   : > { %p4772_p5 = scmp.ne.s32.totalorder %s5916_s4, %s4771_s23  ;;  %p4778_p10 = scmp.lt.u32.totalorder %s4771_s23, %s5916_s4 }
  0x38   : > { %p4774_p6 = pnand %p4772_p5, %p5236_p0 }
  0x3a   : > { %p4775_p9 = pneg %p4774_p6 }
  0x3c   : > { %p4780_p13 = pnand %p4778_p10, %p4775_p9 }
  0x3e   : > { %4783 = shalt.err (!%p4780_p13)
}
  0x3f   : > { %s4784_s12 = scalar_lea.vmem %s5226_s15, 1024  ;;  %p4792_p4 = scmp.lt.s32.totalorder %s5226_s15, %s5226_s15 }
  0x40   : > { %p4785_p1 = scmp.ne.s32.totalorder %s5226_s15, %s4784_s12  ;;  %p4793_p7 = scmp.lt.s32.totalorder %s4784_s12, %s4784_s12 }
  0x42   : > { %p4787_p2 = pnand %p4785_p1, %p5236_p0  ;;  %p4794_p8 = por %p4793_p7, %p4792_p4 }
  0x44   : > { %p4788_p3 = pneg %p4787_p2 }
  0x46   : > { %p4795_p11 = pnand %p4794_p8, %p4788_p3 }
  0x48   : > { %4798 = shalt.err (!%p4795_p11)
}
  0x49   : > { %s5935_s28 = smov 64   ;;  %s5936_s17 = smov 4  }
  0x4a   : > { %4404 = dma.hbm_to_vmem [thread:$0]  (!%p5222_p12), %s5916_s4, 1024, %s5226_s15, [#allocation9], %s5935_s28, %s5935_s28, %s5936_s17  }
  0x4b   : > { %s5085_s19 = smov [#allocation11]   ;;  %s5086_s25 = smov [#allocation14]  }
  0x4c   : > { %s373_s24 = sshll.u32 %s5085_s19, 4  ;;  %s400_s14 = sshll.u32 %s5086_s25, 4  ;;  %s374_s24 = int_to_ptr.vmem [resolvable:$true] %s373_s24  ;;  %s5281_s14 = int_to_ptr.vmem [resolvable:$true] %s400_s14 }
  0x4d   : > { %s4799_s26 = scalar_lea.hbm %s5918_s6, 1024 }
  0x4e   : > { %p4800_p5 = scmp.ne.s32.totalorder %s5918_s6, %s4799_s26  ;;  %p4806_p10 = scmp.lt.u32.totalorder %s4799_s26, %s5918_s6 }
  0x50   : > { %p4802_p6 = pnand %p4800_p5, %p5236_p0 }
  0x52   : > { %p4803_p9 = pneg %p4802_p6 }
  0x54   : > { %p4808_p13 = pnand %p4806_p10, %p4803_p9 }
  0x56   : > { %4811 = shalt.err (!%p4808_p13)
}
  0x57   : > { %s4812_s23 = scalar_lea.vmem %s374_s24, 1024  ;;  %p4820_p4 = scmp.lt.s32.totalorder %s374_s24, %s374_s24 }
  0x58   : > { %p4813_p1 = scmp.ne.s32.totalorder %s374_s24, %s4812_s23  ;;  %p4821_p7 = scmp.lt.s32.totalorder %s4812_s23, %s4812_s23 }
  0x5a   : > { %p4815_p2 = pnand %p4813_p1, %p5236_p0  ;;  %p4822_p8 = por %p4821_p7, %p4820_p4 }
  0x5c   : > { %p4816_p3 = pneg %p4815_p2 }
  0x5e   : > { %p4823_p11 = pnand %p4822_p8, %p4816_p3 }
  0x60   : > { %4826 = shalt.err (!%p4823_p11)
}
  0x61   : > { %4410 = dma.hbm_to_vmem [thread:$0]  (!%p5222_p12), %s5918_s6, 1024, %s374_s24, [#allocation12], %s5935_s28, %s5935_s28, %s5936_s17  }
  0x62   : > { %s4827_s25 = scalar_lea.hbm %s5920_s8, 128 }
  0x63   : > { %p4828_p5 = scmp.ne.s32.totalorder %s5920_s8, %s4827_s25  ;;  %p4834_p10 = scmp.lt.u32.totalorder %s4827_s25, %s5920_s8 }
  0x65   : > { %p4830_p6 = pnand %p4828_p5, %p5236_p0 }
  0x67   : > { %p4831_p9 = pneg %p4830_p6 }
  0x69   : > { %p4836_p13 = pnand %p4834_p10, %p4831_p9 }
  0x6b   : > { %4839 = shalt.err (!%p4836_p13)
}
  0x6c   : > { %s4840_s24 = scalar_lea.vmem %s5281_s14, 128  ;;  %p4848_p4 = scmp.lt.s32.totalorder %s5281_s14, %s5281_s14 }
  0x6d   : > { %p4841_p1 = scmp.ne.s32.totalorder %s5281_s14, %s4840_s24  ;;  %p4849_p7 = scmp.lt.s32.totalorder %s4840_s24, %s4840_s24 }
  0x6f   : > { %p4843_p2 = pnand %p4841_p1, %p5236_p0  ;;  %p4850_p8 = por %p4849_p7, %p4848_p4 }
  0x71   : > { %p4844_p3 = pneg %p4843_p2 }
  0x73   : > { %p4851_p11 = pnand %p4850_p8, %p4844_p3 }
  0x75   : > { %4854 = shalt.err (!%p4851_p11)
}
  0x76   : > { %4416 = dma.hbm_to_vmem [thread:$0]  (!%p5222_p12), %s5920_s8, 128, %s5281_s14, [#allocation15]  }
  0x77   : > { %s5087_s26 = smov [#allocation2]   ;;  %s5088_s19 = smov [#allocation7]  }
  0x78   : > { %s308_s22 = sshll.u32 %s5087_s26, 4  ;;  %s334_s25 = sshll.u32 %s5088_s19, 4  ;;  %s309_s22 = int_to_ptr.vmem [resolvable:$true] %s308_s22  ;;  %s5327_s25 = int_to_ptr.vmem [resolvable:$true] %s334_s25 }
  0x79   : > { %s4855_s20 = scalar_lea.hbm %s5913_s1, 512 }
  0x7a   : > { %p4856_p5 = scmp.ne.s32.totalorder %s5913_s1, %s4855_s20  ;;  %p4862_p10 = scmp.lt.u32.totalorder %s4855_s20, %s5913_s1 }
  0x7c   : > { %p4858_p6 = pnand %p4856_p5, %p5236_p0 }
  0x7e   : > { %p4859_p9 = pneg %p4858_p6 }
  0x80   : > { %p4864_p13 = pnand %p4862_p10, %p4859_p9 }
  0x82   : > { %4867 = shalt.err (!%p4864_p13)
}
  0x83   : > { %s4868_s2 = scalar_lea.vmem %s309_s22, 512  ;;  %p4876_p4 = scmp.lt.s32.totalorder %s309_s22, %s309_s22 }
  0x84   : > { %p4869_p1 = scmp.ne.s32.totalorder %s309_s22, %s4868_s2  ;;  %p4877_p7 = scmp.lt.s32.totalorder %s4868_s2, %s4868_s2 }
  0x86   : > { %p4871_p2 = pnand %p4869_p1, %p5236_p0  ;;  %p4878_p8 = por %p4877_p7, %p4876_p4 }
  0x88   : > { %p4872_p3 = pneg %p4871_p2 }
  0x8a   : > { %p4879_p11 = pnand %p4878_p8, %p4872_p3 }
  0x8c   : > { %4882 = shalt.err (!%p4879_p11)
}
  0x8d   : > { %s5950_s26 = smov 8   ;;  %s5951_s19 = smov 128  }
  0x8e   : > { %4395 = dma.hbm_to_vmem [thread:$0]  (!%p5222_p12), %s5913_s1, 512, %s309_s22, [#allocation3], %s5951_s19, %s5951_s19, %s5950_s26  }
  0x8f   : > { %s4883_s24 = scalar_lea.hbm %s5915_s3, 3072 }
  0x90   : > { %p4884_p5 = scmp.ne.s32.totalorder %s5915_s3, %s4883_s24  ;;  %p4890_p10 = scmp.lt.u32.totalorder %s4883_s24, %s5915_s3 }
  0x92   : > { %p4886_p6 = pnand %p4884_p5, %p5236_p0 }
  0x94   : > { %p4887_p9 = pneg %p4886_p6 }
  0x96   : > { %p4892_p13 = pnand %p4890_p10, %p4887_p9 }
  0x98   : > { %4895 = shalt.err (!%p4892_p13)
}
  0x99   : > { %s4896_s22 = scalar_lea.vmem %s5327_s25, 3072  ;;  %p4904_p4 = scmp.lt.s32.totalorder %s5327_s25, %s5327_s25 }
  0x9a   : > { %p4897_p1 = scmp.ne.s32.totalorder %s5327_s25, %s4896_s22  ;;  %p4905_p7 = scmp.lt.s32.totalorder %s4896_s22, %s4896_s22 }
  0x9c   : > { %p4899_p2 = pnand %p4897_p1, %p5236_p0  ;;  %p4906_p8 = por %p4905_p7, %p4904_p4 }
  0x9e   : > { %p4900_p3 = pneg %p4899_p2 }
  0xa0   : > { %p4907_p11 = pnand %p4906_p8, %p4900_p3 }
  0xa2   : > { %4910 = shalt.err (!%p4907_p11)
}
  0xa3   : > { %s5089_s26 = smov 192   ;;  %s5090_s28 = smov 12  }
  0xa4   : > { %4401 = dma.hbm_to_vmem [thread:$0]  (!%p5222_p12), %s5915_s3, 3072, %s5327_s25, [#allocation6], %s5089_s26, %s5089_s26, %s5090_s28  }
  0xa5   : > { %s5091_s12 = smov [#allocation10]   ;;  %s5092_s15 = smov [#allocation13]  }
  0xa6   : > { %s360_s20 = sshll.u32 %s5091_s12, 4  ;;  %s386_s24 = sshll.u32 %s5092_s15, 4  ;;  %s361_s20 = int_to_ptr.vmem [resolvable:$true] %s360_s20  ;;  %s5373_s24 = int_to_ptr.vmem [resolvable:$true] %s386_s24 }
  0xa7   : > { %s4911_s2 = scalar_lea.hbm %s5917_s5, 3072 }
  0xa8   : > { %p4912_p5 = scmp.ne.s32.totalorder %s5917_s5, %s4911_s2  ;;  %p4918_p10 = scmp.lt.u32.totalorder %s4911_s2, %s5917_s5 }
  0xaa   : > { %p4914_p6 = pnand %p4912_p5, %p5236_p0 }
  0xac   : > { %p4915_p9 = pneg %p4914_p6 }
  0xae   : > { %p4920_p13 = pnand %p4918_p10, %p4915_p9 }
  0xb0   : > { %4923 = shalt.err (!%p4920_p13)
}
  0xb1   : > { %s4924_s16 = scalar_lea.vmem %s361_s20, 3072  ;;  %p4932_p4 = scmp.lt.s32.totalorder %s361_s20, %s361_s20 }
  0xb2   : > { %p4925_p1 = scmp.ne.s32.totalorder %s361_s20, %s4924_s16  ;;  %p4933_p7 = scmp.lt.s32.totalorder %s4924_s16, %s4924_s16 }
  0xb4   : > { %p4927_p2 = pnand %p4925_p1, %p5236_p0  ;;  %p4934_p8 = por %p4933_p7, %p4932_p4 }
  0xb6   : > { %p4928_p3 = pneg %p4927_p2 }
  0xb8   : > { %p4935_p11 = pnand %p4934_p8, %p4928_p3 }
  0xba   : > { %4938 = shalt.err (!%p4935_p11)
}
  0xbb   : > { %4407 = dma.hbm_to_vmem [thread:$0]  (!%p5222_p12), %s5917_s5, 3072, %s361_s20, [#allocation9], %s5089_s26, %s5089_s26, %s5090_s28  }
  0xbc   : > { %s4939_s14 = scalar_lea.hbm %s5919_s7, 8192 }
  0xbd   : > { %p4940_p5 = scmp.ne.s32.totalorder %s5919_s7, %s4939_s14  ;;  %p4946_p10 = scmp.lt.u32.totalorder %s4939_s14, %s5919_s7 }
  0xbf   : > { %p4942_p6 = pnand %p4940_p5, %p5236_p0 }
  0xc1   : > { %p4943_p9 = pneg %p4942_p6 }
  0xc3   : > { %p4948_p13 = pnand %p4946_p10, %p4943_p9 }
  0xc5   : > { %4951 = shalt.err (!%p4948_p13)
}
  0xc6   : > { %s4952_s26 = scalar_lea.vmem %s5373_s24, 8192  ;;  %p4960_p4 = scmp.lt.s32.totalorder %s5373_s24, %s5373_s24 }
  0xc7   : > { %p4953_p1 = scmp.ne.s32.totalorder %s5373_s24, %s4952_s26  ;;  %p4961_p7 = scmp.lt.s32.totalorder %s4952_s26, %s4952_s26 }
  0xc9   : > { %p4955_p2 = pnand %p4953_p1, %p5236_p0  ;;  %p4962_p8 = por %p4961_p7, %p4960_p4 }
  0xcb   : > { %p4956_p3 = pneg %p4955_p2 }
  0xcd   : > { %p4963_p11 = pnand %p4962_p8, %p4956_p3 }
  0xcf   : > { %4966 = shalt.err (!%p4963_p11)
}
  0xd0   : > { %s5093_s28 = smov 512   ;;  %s5094_s20 = smov 32  }
  0xd1   : > { %4413 = dma.hbm_to_vmem [thread:$0]  (!%p5222_p12), %s5919_s7, 8192, %s5373_s24, [#allocation12], %s5093_s28, %s5093_s28, %s5094_s20  }
  0xd2   : > { %s5095_s12 = smov [#allocation16]   ;;  %s4967_s2 = scalar_lea.hbm %s5921_s9, 4096 }
  0xd3   : > { %s410_s15 = sshll.u32 %s5095_s12, 4  ;;  %p4968_p5 = scmp.ne.s32.totalorder %s5921_s9, %s4967_s2  ;;  %s411_s15 = int_to_ptr.vmem [resolvable:$true] %s410_s15 }
  0xd4   : > { %p4974_p10 = scmp.lt.u32.totalorder %s4967_s2, %s5921_s9 }
  0xd5   : > { %p4970_p6 = pnand %p4968_p5, %p5236_p0 }
  0xd7   : > { %p4971_p9 = pneg %p4970_p6 }
  0xd9   : > { %p4976_p13 = pnand %p4974_p10, %p4971_p9 }
  0xdb   : > { %4979 = shalt.err (!%p4976_p13)
}
  0xdc   : > { %s4980_s24 = scalar_lea.vmem %s411_s15, 4096  ;;  %p4988_p4 = scmp.lt.s32.totalorder %s411_s15, %s411_s15 }
  0xdd   : > { %p4981_p1 = scmp.ne.s32.totalorder %s411_s15, %s4980_s24  ;;  %p4989_p7 = scmp.lt.s32.totalorder %s4980_s24, %s4980_s24 }
  0xdf   : > { %p4983_p2 = pnand %p4981_p1, %p5236_p0  ;;  %p4990_p8 = por %p4989_p7, %p4988_p4 }
  0xe1   : > { %p4984_p3 = pneg %p4983_p2 }
  0xe3   : > { %p4991_p11 = pnand %p4990_p8, %p4984_p3 }
  0xe5   : > { %4994 = shalt.err (!%p4991_p11)
}
  0xe6   : > { %s5952_s28 = smov 4   ;;  %s5953_s20 = smov 64  }
  0xe7   : > { %4419 = dma.hbm_to_vmem [thread:$0]  (!%p5222_p12), %s5921_s9, 4096, %s411_s15, [#allocation15], %s5953_s20, %s5953_s20, %s5952_s28  }
  0xe8   : > { %p5954_p5 = scmp.ne.s32.totalorder %s5946_s29, 0 }
  0xe9   : > { %p5955_p0 = scmp.eq.s32.totalorder (!%p5954_p5), %s5186_s21, 0 }
  0xea   : > { %438 = sbr.rel (%p5954_p5) target bundleno = 5137 (0x1411), region = 64 }
  0xf1   : > { %5040 = dma.done.wait (%p5955_p0), [#allocation3], 512   ;;  %p5956_p6 = pmov %p5955_p0 }
  0xf2   : > { %p5957_p9 = pmov %p5955_p0 }
  0xf3   : > { %5042 = vsyncadd (%p5956_p6), [#allocation3], 4294966784 }
  0xf4   : > { %5044 = dma.done.wait (%p5957_p9), [#allocation6], 3584   ;;  %p5958_p10 = pmov %p5955_p0 }
  0xf5   : > { %p5959_p13 = pmov %p5955_p0 }
  0xf6   : > { %5046 = vsyncadd (%p5958_p10), [#allocation6], 4294963712 }
  0xf7   : > { %5048 = dma.done.wait (%p5959_p13), [#allocation9], 4096   ;;  %p5960_p12 = pmov %p5955_p0 }
  0xf8   : > { %p5961_p1 = pmov %p5955_p0 }
  0xf9   : > { %5050 = vsyncadd (%p5960_p12), [#allocation9], 4294963200 }
  0xfa   : > { %5052 = dma.done.wait (%p5961_p1), [#allocation12], 9216   ;;  %p5962_p2 = pmov %p5955_p0 }
  0xfb   : > { %p5963_p3 = pmov %p5955_p0 }
  0xfc   : > { %5054 = vsyncadd (%p5962_p2), [#allocation12], 4294958080 }
  0xfd   : > { %5056 = dma.done.wait (%p5963_p3), [#allocation15], 4224   ;;  %p5964_p4 = pmov %p5955_p0 }
  0xfe   : > { %s3806_s29 = sshll.u32 %s5186_s21, 1  ;;  %v5096_v0 = vmov 0   ;;  %v534_v3 = vld [vmem:[#allocation2] sm:$0xff]  ;;  %v535_v4 = vld [vmem:[#allocation2 + $0x8] sm:$0xff]  ;;  %v536_v5 = vld [vmem:[#allocation2 + $0x10] sm:$0xff]  ;;  %v5097_v9 = vmov 0.0   ;;  %v520_v10 = vlaneseq }
  0xff   : > { %5058 = vsyncadd (%p5964_p4), [#allocation15], 4294963072  ;;  %4500 = vset.pattern.permute.xlu0 %v5096_v0  ;;  %p511_p7 = scmp.lt.s32.totalorder %s3806_s29, 3  ;;  %869 = vmatprep.mubr.bf16.mxu1 %v5096_v0  ;;  %v537_v6 = vld [vmem:[#allocation2 + $0x18] sm:$0xff]  ;;  %v4346_v7 = vpack.c.bf16 %v535_v4, %v534_v3  ;;  %vm540_vm0 = vcmask 261120   ;;  %v538_v16 = vld [vmem:[#allocation5] sm:$0xff] }
 0x100   : > { %v4350_v8 = vpack.c.bf16 %v537_v6, %v536_v5  ;;  %v521_v11 = vand.u32 127, %v520_v10  ;;  %v539_v20 = vld [vmem:[#allocation5 + $0x8] sm:$0xff]  ;;  %v4531_v22 = vld [vmem:[#allocation7 + $0x4] ss:$12 sps:$4 sm:$0xff]   ;;  %v4539_v36 = vld [vmem:[#allocation7 + $0x34] ss:$12 sps:$4 sm:$0xff]  }
 0x101   : > { %s5976_s29 = smov (!%p511_p7, %s3806_s29), 3  ;;  %4347 = vmatprep.subr.bf16.mxu0 %v4346_v7  ;;  %v4533_v23 = vld [vmem:[#allocation7] ss:$12 sps:$4 sm:$0xff]   ;;  %v4534_v24 = vld [vmem:[#allocation7 + $0x8] ss:$12 sps:$4 sm:$0xff]   ;;  %837 = vmatprep.subr.bf16.mxu1 %v4531_v22  ;;  %vm5098_vm3 = vmmov 0  }
 0x102   : > { %s3807_s13 = sshll.u32 %s5976_s29, 3  ;;  %4349 = vmatpush3.bf16.msra.mxu0 %v4346_v7  ;;  %v4535_v25 = vld [vmem:[#allocation7 + $0x1c] ss:$12 sps:$4 sm:$0xff]   ;;  %838 = vmatpush1.bf16.msra.mxu1 %v4533_v23  ;;  %v4537_v34 = vld [vmem:[#allocation7 + $0x18] ss:$12 sps:$4 sm:$0xff]   ;;  %s5099_s23 = smov 32  }
 0x103   : > { %s514_s15 = scalar_lea.vmem %s5912_s0, %s3807_s13  ;;  %4351 = vmatprep.subr.bf16.mxu0 %v4350_v8  ;;  %839 = vmatprep.subr.bf16.mxu1 %v4535_v25  ;;  %v4538_v35 = vld [vmem:[#allocation7 + $0x20] ss:$12 sps:$4 sm:$0xff]   ;;  %v4541_v37 = vld [vmem:[#allocation7 + $0x30] ss:$12 sps:$4 sm:$0xff]   ;;  %v4542_v38 = vld [vmem:[#allocation7 + $0x38] ss:$12 sps:$4 sm:$0xff]  }
 0x104   : > { %v518_v1 = vld [vmem:[%s514_s15] sm:$0xff]  ;;  %v519_v2 = vld [vmem:[%s514_s15 + $0x8] sm:$0xff]  ;;  %v4546_v41 = vld [vmem:[#allocation7 + $0x50] ss:$12 sps:$4 sm:$0xff]   ;;  %s5100_s14 = smov 96   ;;  %s5101_s2 = smov 64  }
 0x105   : > { %523 = vperm.xlu0 %4500, %v518_v1   ;;  %v4543_v39 = vld [vmem:[#allocation7 + $0x4c] ss:$12 sps:$4 sm:$0xff]   ;;  %v4545_v40 = vld [vmem:[#allocation7 + $0x48] ss:$12 sps:$4 sm:$0xff]   ;;  %v4547_v42 = vld [vmem:[#allocation7 + $0x64] ss:$12 sps:$4 sm:$0xff]  }
 0x106   : > { %4353 = vmatpush3.bf16.msra.mxu0 %v4350_v8  ;;  %840 = vmatpush1.bf16.msra.mxu1 %v4537_v34  ;;  %v4549_v43 = vld [vmem:[#allocation7 + $0x60] ss:$12 sps:$4 sm:$0xff]   ;;  %v4550_v44 = vld [vmem:[#allocation7 + $0x68] ss:$12 sps:$4 sm:$0xff]   ;;  %v4553_v46 = vld [vmem:[#allocation7 + $0x78] ss:$12 sps:$4 sm:$0xff]  }
 0x107   : > { %4150 = vmatprep.subr.bf16.mxu0 %v5097_v9  ;;  %841 = vmatprep.subr.bf16.mxu1 %v4539_v36  ;;  %v4551_v45 = vld [vmem:[#allocation7 + $0x7c] ss:$12 sps:$4 sm:$0xff]   ;;  %v4554_v47 = vld [vmem:[#allocation7 + $0x80] ss:$12 sps:$4 sm:$0xff]   ;;  %v4558_v50 = vld [vmem:[#allocation7 + $0x98] ss:$12 sps:$4 sm:$0xff]  }
 0x108   : > { %v4555_v48 = vld [vmem:[#allocation7 + $0x94] ss:$12 sps:$4 sm:$0xff]   ;;  %v4557_v49 = vld [vmem:[#allocation7 + $0x90] ss:$12 sps:$4 sm:$0xff]   ;;  %v4559_v51 = vld [vmem:[#allocation7 + $0xac] ss:$12 sps:$4 sm:$0xff]  }
 0x109   : > { %526 = vperm.xlu0 %4500, %v519_v2   ;;  %v4561_v52 = vld [vmem:[#allocation7 + $0xa8] ss:$12 sps:$4 sm:$0xff]   ;;  %v4562_v53 = vld [vmem:[#allocation7 + $0xb0] ss:$12 sps:$4 sm:$0xff]   ;;  %vm971_vm4 = vcmask 130048   ;;  %vm1431_vm5 = vcmask 523264  }
 0x10a   : > { %842 = vmatpush1.bf16.msra.mxu1 %v4541_v37  ;;  %v3812_v62 = vld [vmem:[#allocation5 + $0x10] ss:$0 sm:$0xff]  ;;  %v3813_v3 = vld [vmem:[#allocation5 + $0x11] ss:$0 sm:$0xff]  ;;  %vm1434_vm6 = vcmask 785408   ;;  %s4011_s26 = sshll.u32 %s5186_s21, 8 }
 0x10b   : > { %843 = vmatprep.subr.bf16.mxu1 %v4543_v39  ;;  %s5869_s20 = scalar_lea.hbm %s5923_s11, %s4011_s26  ;;  %p5965_p11 = scmp.ne.s32.totalorder %s5943_s27, 0 }
 0x10c   : > { %s5102_s17 = smov [#allocation17]  }
 0x10d   : > { %s4999_s29 = sshll.u32 %s5102_s17, 4  ;;  %s5000_s29 = int_to_ptr.vmem [resolvable:$false] %s4999_s29 }
 0x10e   : > { %844 = vmatpush1.bf16.msra.mxu1 %v4545_v40  ;;  %s5001_s13 = scalar_lea.vmem %s5000_s29, 512 }
 0x10f   : > { %845 = vmatprep.subr.bf16.mxu1 %v4547_v42 }
 0x112   : > { %846 = vmatpush1.bf16.msra.mxu1 %v4549_v43 }
 0x113   : > { %847 = vmatprep.subr.bf16.mxu1 %v4551_v45 }
 0x116   : > { %848 = vmatpush1.bf16.msra.mxu1 %v4553_v46 }
 0x117   : > { %849 = vmatprep.subr.bf16.mxu1 %v4555_v48 }
 0x11a   : > { %850 = vmatpush1.bf16.msra.mxu1 %v4557_v49 }
 0x11b   : > { %851 = vmatprep.subr.bf16.mxu1 %v4559_v51 }
 0x11e   : > { %852 = vmatpush1.bf16.msra.mxu1 %v4561_v52 }
 0x11f   : > { %4170 = vmatprep.subr.bf16.mxu1 %v5097_v9 }
 0x184   : > { %v524_v12 = vpop.permute.xlu0 %523 }
 0x185   : > { %vm528_vm1 = vcmp.eq.s32.totalorder %v521_v11, %v524_v12 }
 0x186   : > { %v3808_v13 = vsel %vm528_vm1, 1.0, %v5097_v9 }
 0x187   : > { %4147 = vmatprep.mubr.msk.f32.mxu0 %vm540_vm0, %v3808_v13 }
 0x188   : > { %v527_v14 = vpop.permute.xlu0 %526 }
 0x189   : > { %vm529_vm2 = vcmp.eq.s32.totalorder %v521_v11, %v527_v14 }
 0x18a   : > { %v3809_v15 = vsel %vm529_vm2, 1.0, %v5097_v9 }
 0x18b   : > { %4148 = vmatmul.mubr.msk.f32.vlgmr.msra.gmra.mrb[0].mxu0 %vm540_vm0, %v3809_v15 }
 0x18c   : > { %4151 = vmatpush3.bf16.msra.mxu0 %v4534_v24  ;;  %4166 = vmatprep.mubr.msk.bf16.mxu0 %vm5098_vm3, %v5097_v9 }
 0x18d   : > { %4152 = vmatprep.subr.bf16.mxu0 %v5097_v9 }
 0x190   : > { %4153 = vmatpush3.bf16.msra.mxu0 %v4538_v35 }
 0x191   : > { %4154 = vmatprep.subr.bf16.mxu0 %v5097_v9 }
 0x194   : > { %4155 = vmatpush3.bf16.msra.mxu0 %v4542_v38 }
 0x195   : > { %4156 = vmatprep.subr.bf16.mxu0 %v5097_v9 }
 0x198   : > { %4157 = vmatpush3.bf16.msra.mxu0 %v4546_v41 }
 0x199   : > { %4158 = vmatprep.subr.bf16.mxu0 %v5097_v9 }
 0x19c   : > { %4159 = vmatpush3.bf16.msra.mxu0 %v4550_v44 }
 0x19d   : > { %4160 = vmatprep.subr.bf16.mxu0 %v5097_v9 }
 0x1a0   : > { %4161 = vmatpush3.bf16.msra.mxu0 %v4554_v47 }
 0x1a1   : > { %4162 = vmatprep.subr.bf16.mxu0 %v5097_v9 }
 0x1a4   : > { %4163 = vmatpush3.bf16.msra.mxu0 %v4558_v50 }
 0x1a5   : > { %4164 = vmatprep.subr.bf16.mxu0 %v5097_v9 }
 0x1a8   : > { %4165 = vmatpush3.bf16.msra.mxu0 %v4562_v53 }
 0x1a9   : > { %4176 = vmatprep.subr.bf16.mxu0 %v5097_v9 }
 0x25e   : > { %v4149_v17 = vpop.f32.mrb[0].mxu0 }
 0x25f   : > { %v613_v18 = vpop.f32.mrb[1].mxu0  ;;  %v5474_v21 = vadd.f32 %v4149_v17, %v539_v20 }
 0x260   : > { %v5471_v19 = vadd.f32 %v613_v18, %v538_v16 }
 0x262   : > { %625 = vadd.xlane.f32.xlu1 %v5471_v19 }
 0x266   : > { %627 = vadd.xlane.f32.xlu1 %v5474_v21 }
 0x2ef   : > { %v626_v26 = vpop.xlane.xlu1 %625 }
 0x2f0   : > { %v630_v27 = vmul.f32 0.0078125, %v626_v26 }
 0x2f2   : > { %v5479_v28 = vsub.f32 %v5471_v19, %v630_v27 }
 0x2f3   : > { %v628_v29 = vpop.xlane.xlu1 %627 }
 0x2f4   : > { %v631_v30 = vmul.f32 0.0078125, %v628_v29  ;;  %v634_v31 = vmul.f32 %v5479_v28, %v5479_v28 }
 0x2f6   : > { %v5484_v32 = vsub.f32 %v5474_v21, %v631_v30  ;;  %636 = vadd.xlane.f32.xlu0 %v634_v31 }
 0x2f8   : > { %v635_v33 = vmul.f32 %v5484_v32, %v5484_v32 }
 0x2fa   : > { %638 = vadd.xlane.f32.xlu1 %v635_v33 }
 0x383   : > { %v637_v54 = vpop.xlane.xlu0 %636 }
 0x384   : > { %v640_v55 = vmul.f32 0.0078125, %v637_v54 }
 0x386   : > { %v642_v56 = vadd.f32 1e-05, %v640_v55 }
 0x387   : > { %v639_v57 = vpop.xlane.xlu1 %638 }
 0x388   : > { %4651 = vrsqrt.f32 %v642_v56  ;;  %v641_v58 = vmul.f32 0.0078125, %v639_v57 }
 0x38a   : > { %v643_v59 = vadd.f32 1e-05, %v641_v58 }
 0x38c   : > { %4653 = vrsqrt.f32 %v643_v59 }
 0x392   : > { %v4652_v60 = vpop.eup %4651 }
 0x393   : > { %v646_v61 = vmul.f32 %v4652_v60, %v5479_v28 }
 0x395   : > { %v652_v2 = vmul.f32 %v3812_v62, %v646_v61 }
 0x396   : > { %v4654_v63 = vpop.eup %4653 }
 0x397   : > { %v647_v1 = vmul.f32 %v4654_v63, %v5484_v32  ;;  %v658_v5 = vadd.f32 %v3813_v3, %v652_v2 }
 0x399   : > { %v653_v4 = vmul.f32 %v3812_v62, %v647_v1 }
 0x39b   : > { %v659_v6 = vadd.f32 %v3813_v3, %v653_v4 }
 0x39d   : > { %v708_v7 = vpack.c.bf16 %v659_v6, %v658_v5 }
 0x39f   : > { %870 = vmatmul.mubr.bf16.vlgmr.msra.gmra.mrb[0].mxu1 %v708_v7  ;;  %4167 = vmatmul.mubr.bf16.vlgmr.msra.gmra.mrb[4].mxu0 %v708_v7 }
 0x3a0   : > { %4172 = vmatprep.mubr.msk.bf16.mxu1 %vm5098_vm3, %v5097_v9  ;;  %4178 = vmatprep.mubr.msk.bf16.mxu0 %vm5098_vm3, %v5097_v9 }
 0x472   : > { %v871_v8 = vpop.f32.mrb[0].mxu1  ;;  %v914_v11 = vpop.f32.mrb[4].mxu0 }
 0x473   : > { %v873_v12 = vpop.f32.mrb[1].mxu1  ;;  %v4168_v13 = vpop.f32.mrb[5].mxu0 }
 0x474   : > { %v875_v14 = vpop.f32.mrb[2].mxu1  ;;  %v917_v15 = vpop.f32.mrb[6].mxu0 }
 0x475   : > { %v921_v16 = vpack.c.bf16 %v875_v14, %v871_v8  ;;  %v5504_v17 = vpack.c.bf16 %v917_v15, %v914_v11  ;;  %v877_v18 = vpop.f32.mrb[3].mxu1  ;;  %v4169_v20 = vpop.f32.mrb[7].mxu0 }
 0x476   : > { %v922_v22 = vpack.c.bf16 %v877_v18, %v873_v12 }
 0x477   : > { %4177 = vmatpush3.bf16.msra.mxu0 %v5504_v17 }
 0x478   : > { %1286 = vrot.lane.b32.xlu0 %v922_v22, %s5099_s23  ;;  %1043 = vrot.lane.b32.xlu1 %v922_v22, %s5100_s14  ;;  %v928_v23 = vsel %vm540_vm0, %v922_v22, 0 }
 0x479   : > { %4171 = vmatpush3.bf16.xpose.msra.mxu1 %v928_v23  ;;  %4188 = vmatprep.subr.bf16.mxu0 %v5097_v9 }
 0x47a   : > { %4182 = vmatprep.subr.bf16.mxu1 %v5097_v9 }
 0x47c   : > { %1040 = vrot.lane.b32.xlu1 %v921_v16, %s5100_s14 }
 0x480   : > { %1165 = vrot.lane.b32.xlu1 %v922_v22, %s5101_s2  ;;  %4173 = vmatmul.mubr.msk.bf16.vlgmr.msra.gmra.mrb[4].mxu1 %vm540_vm0, %v921_v16 }
 0x481   : > { %4184 = vmatprep.mubr.msk.bf16.mxu1 %vm5098_vm3, %v5097_v9 }
 0x484   : > { %1163 = vrot.lane.b32.xlu1 %v921_v16, %s5101_s2 }
 0x488   : > { %1284 = vrot.lane.b32.xlu1 %v921_v16, %s5099_s23 }
 0x4ea   : > { %v1044_v24 = vpop.permute.xlu1 %1043  ;;  %v1287_v29 = vpop.permute.xlu0 %1286 }
 0x4eb   : > { %v1049_v25 = vsel %vm540_vm0, %v1044_v24, 0  ;;  %v1292_v31 = vsel %vm540_vm0, %v1287_v29, 0 }
 0x4ec   : > { %4183 = vmatpush3.bf16.xpose.msra.mxu1 %v1049_v25 }
 0x4ed   : > { %4194 = vmatprep.subr.bf16.mxu1 %v5097_v9 }
 0x4ee   : > { %v1041_v26 = vpop.permute.xlu1 %1040 }
 0x4f2   : > { %v1166_v27 = vpop.permute.xlu1 %1165 }
 0x4f3   : > { %v1171_v28 = vsel %vm540_vm0, %v1166_v27, 0  ;;  %4185 = vmatmul.mubr.msk.bf16.vlgmr.msra.gmra.mrb[8].mxu1 %vm540_vm0, %v1041_v26 }
 0x4f4   : > { %4195 = vmatpush3.bf16.xpose.msra.mxu1 %v1171_v28  ;;  %4196 = vmatprep.mubr.msk.bf16.mxu1 %vm5098_vm3, %v5097_v9 }
 0x4f5   : > { %4206 = vmatprep.subr.bf16.mxu1 %v5097_v9 }
 0x4f6   : > { %v1164_v30 = vpop.permute.xlu1 %1163 }
 0x4fa   : > { %v1285_v32 = vpop.permute.xlu1 %1284 }
 0x4fb   : > { %4197 = vmatmul.mubr.msk.bf16.vlgmr.msra.gmra.mrb[12].mxu1 %vm540_vm0, %v1164_v30 }
 0x4fc   : > { %4207 = vmatpush3.bf16.xpose.msra.mxu1 %v1292_v31  ;;  %4208 = vmatprep.mubr.msk.bf16.mxu1 %vm5098_vm3, %v5097_v9 }
 0x4fd   : > { %4218 = vmatprep.subr.bf16.mxu1 %v5097_v9 }
 0x503   : > { %4209 = vmatmul.mubr.msk.bf16.vlgmr.msra.gmra.mrb[16].mxu1 %vm540_vm0, %v1285_v32 }
 0x504   : > { %4234 = vmatprep.mubr.msk.bf16.mxu1 %vm5098_vm3, %v5097_v9 }
 0x553   : > { %v964_v33 = vpop.f32.mrb[4].mxu1 }
 0x554   : > { %v4174_v34 = vpop.f32.mrb[5].mxu1  ;;  %v972_v35 = vsel %vm971_vm4, %v964_v33, -inf }
 0x555   : > { %973 = vmax.xlane.f32.xlu1 %v972_v35  ;;  %v967_v36 = vpop.f32.mrb[6].mxu1 }
 0x556   : > { %v4175_v37 = vpop.f32.mrb[7].mxu1  ;;  %v975_v38 = vsel %vm971_vm4, %v967_v36, -inf }
 0x557   : > { %976 = vmax.xlane.f32.xlu0 %v975_v38 }
 0x566   : > { %1112 = vrot.lane.b32.xlu1 %v5504_v17, %s5100_s14 }
 0x5c6   : > { %v1085_v39 = vpop.f32.mrb[8].mxu1 }
 0x5c7   : > { %v4186_v40 = vpop.f32.mrb[9].mxu1  ;;  %v1092_v41 = vsel %vm971_vm4, %v1085_v39, -inf }
 0x5c8   : > { %1093 = vmax.xlane.f32.xlu1 %v1092_v41  ;;  %v1088_v42 = vpop.f32.mrb[10].mxu1 }
 0x5c9   : > { %v4187_v43 = vpop.f32.mrb[11].mxu1  ;;  %v1095_v44 = vsel %vm971_vm4, %v1088_v42, -inf }
 0x5cc   : > { %1096 = vmax.xlane.f32.xlu1 %v1095_v44 }
 0x5ce   : > { %v1207_v45 = vpop.f32.mrb[12].mxu1 }
 0x5cf   : > { %v4198_v46 = vpop.f32.mrb[13].mxu1  ;;  %v1214_v47 = vsel %vm971_vm4, %v1207_v45, -inf }
 0x5d0   : > { %1215 = vmax.xlane.f32.xlu1 %v1214_v47  ;;  %v1210_v48 = vpop.f32.mrb[14].mxu1 }
 0x5d1   : > { %v4199_v49 = vpop.f32.mrb[15].mxu1  ;;  %v1217_v50 = vsel %vm971_vm4, %v1210_v48, -inf }
 0x5d2   : > { %1218 = vmax.xlane.f32.xlu0 %v1217_v50  ;;  %v4563_v49 = vld [vmem:[#allocation8] sm:$0xff]   ;;  %v4564_v50 = vld [vmem:[#allocation8 + $0x8] sm:$0xff]  }
 0x5d3   : > { %4219 = vmatpush3.bf16.msra.mxu1 %v4563_v49 }
 0x5d4   : > { %4220 = vmatprep.subr.bf16.mxu1 %v5097_v9 }
 0x5d6   : > { %v1328_v51 = vpop.f32.mrb[16].mxu1 }
 0x5d7   : > { %v4210_v52 = vpop.f32.mrb[17].mxu1  ;;  %v1335_v53 = vsel %vm971_vm4, %v1328_v51, -inf  ;;  %4221 = vmatpush3.bf16.msra.mxu1 %v4564_v50 }
 0x5d8   : > { %1336 = vmax.xlane.f32.xlu1 %v1335_v53  ;;  %v1331_v54 = vpop.f32.mrb[18].mxu1  ;;  %4222 = vmatprep.subr.bf16.mxu1 %v5097_v9 }
 0x5d9   : > { %v4211_v55 = vpop.f32.mrb[19].mxu1  ;;  %v1338_v56 = vsel %vm971_vm4, %v1331_v54, -inf }
 0x5da   : > { %1339 = vmax.xlane.f32.xlu0 %v1338_v56 }
 0x5e2   : > { %v974_v57 = vpop.xlane.xlu1 %973 }
 0x5e3   : > { %v978_v58 = vsub.f32 %v964_v33, %v974_v57  ;;  %v4567_v57 = vld [vmem:[#allocation8 + $0x20] sm:$0xff]  }
 0x5e4   : > { %v977_v59 = vpop.xlane.xlu0 %976 }
 0x5e5   : > { %v980_v60 = vmul.f32 1.442695, %v978_v58  ;;  %v979_v61 = vsub.f32 %v967_v36, %v977_v59 }
 0x5e6   : > { %v1113_v3 = vpop.permute.xlu1 %1112 }
 0x5e7   : > { %v982_v62 = vmul.f32 1.442695, %v979_v61  ;;  %4655 = vpow2.f32 %v980_v60 }
 0x5e9   : > { %4657 = vpow2.f32 %v982_v62  ;;  %1354 = vrot.lane.b32.xlu1 %v5504_v17, %s5099_s23 }
 0x5f0   : > { %1233 = vrot.lane.b32.xlu0 %v5504_v17, %s5101_s2 }
 0x5f1   : > { %v4656_v63 = vpop.eup %4655 }
 0x5f2   : > { %v984_v43 = vsel %vm971_vm4, %v4656_v63, 0.0 }
 0x5f3   : > { %v5548_v1 = vpop.eup %4657 }
 0x5f4   : > { %v990_v2 = vpack.c.bf16 %v5548_v1, %v4656_v63  ;;  %v987_v44 = vsel %vm971_vm4, %v5548_v1, 0.0 }
 0x5f6   : > { %4179 = vmatmul.mubr.msk.bf16.vlgmr.msra.gmra.mrb[8].mxu0 %vm971_vm4, %v990_v2 }
 0x5f7   : > { %4189 = vmatpush3.bf16.msra.mxu0 %v1113_v3  ;;  %4190 = vmatprep.mubr.msk.bf16.mxu0 %vm5098_vm3, %v5097_v9  ;;  %v4568_v3 = vld [vmem:[#allocation8 + $0x28] sm:$0xff]  }
 0x5f8   : > { %4200 = vmatprep.subr.bf16.mxu0 %v5097_v9 }
 0x655   : > { %v1094_v4 = vpop.xlane.xlu1 %1093 }
 0x656   : > { %v1098_v5 = vsub.f32 %v1085_v39, %v1094_v4 }
 0x658   : > { %v1100_v6 = vmul.f32 1.442695, %v1098_v5 }
 0x659   : > { %v1097_v7 = vpop.xlane.xlu1 %1096 }
 0x65a   : > { %4659 = vpow2.f32 %v1100_v6  ;;  %v1099_v8 = vsub.f32 %v1088_v42, %v1097_v7  ;;  %v4569_v7 = vld [vmem:[#allocation8 + $0x30] sm:$0xff]  }
 0x65c   : > { %v1102_v11 = vmul.f32 1.442695, %v1099_v8 }
 0x65d   : > { %v1216_v12 = vpop.xlane.xlu1 %1215 }
 0x65e   : > { %4661 = vpow2.f32 %v1102_v11  ;;  %v1220_v13 = vsub.f32 %v1207_v45, %v1216_v12 }
 0x65f   : > { %v1219_v14 = vpop.xlane.xlu0 %1218 }
 0x660   : > { %v1222_v15 = vmul.f32 1.442695, %v1220_v13  ;;  %v1221_v16 = vsub.f32 %v1210_v48, %v1219_v14 }
 0x662   : > { %4663 = vpow2.f32 %v1222_v15  ;;  %v1224_v17 = vmul.f32 1.442695, %v1221_v16 }
 0x664   : > { %v4660_v18 = vpop.eup %4659  ;;  %4665 = vpow2.f32 %v1224_v17 }
 0x665   : > { %v1337_v20 = vpop.xlane.xlu1 %1336  ;;  %v1104_v22 = vsel %vm971_vm4, %v4660_v18, 0.0 }
 0x666   : > { %v1341_v23 = vsub.f32 %v1328_v51, %v1337_v20  ;;  %1105 = vadd.xlane.f32.xlu1 %v1104_v22  ;;  %v4565_v51 = vld [vmem:[#allocation8 + $0x10] sm:$0xff]  }
 0x667   : > { %v1340_v24 = vpop.xlane.xlu0 %1339  ;;  %4223 = vmatpush3.bf16.msra.mxu1 %v4565_v51 }
 0x668   : > { %v4662_v25 = vpop.eup %4661  ;;  %v1343_v26 = vmul.f32 1.442695, %v1341_v23  ;;  %v1342_v27 = vsub.f32 %v1331_v54, %v1340_v24  ;;  %4224 = vmatprep.subr.bf16.mxu1 %v5097_v9  ;;  %v4566_v54 = vld [vmem:[#allocation8 + $0x18] sm:$0xff]  }
 0x669   : > { %v1107_v28 = vsel %vm971_vm4, %v4662_v25, 0.0  ;;  %v1110_v29 = vpack.c.bf16 %v4662_v25, %v4660_v18  ;;  %v1355_v37 = vpop.permute.xlu1 %1354  ;;  %v4570_v18 = vld [vmem:[#allocation8 + $0x38] sm:$0xff]  }
 0x66a   : > { %4667 = vpow2.f32 %v1343_v26  ;;  %v1345_v30 = vmul.f32 1.442695, %v1342_v27  ;;  %1108 = vadd.xlane.f32.xlu0 %v1107_v28 }
 0x66b   : > { %4191 = vmatmul.mubr.msk.bf16.vlgmr.msra.gmra.mrb[12].mxu0 %vm971_vm4, %v1110_v29  ;;  %v1234_v31 = vpop.permute.xlu0 %1233  ;;  %4225 = vmatpush3.bf16.msra.mxu1 %v4566_v54 }
 0x66c   : > { %v4664_v32 = vpop.eup %4663  ;;  %4669 = vpow2.f32 %v1345_v30  ;;  %4201 = vmatpush3.bf16.msra.mxu0 %v1234_v31  ;;  %4202 = vmatprep.mubr.msk.bf16.mxu0 %vm5098_vm3, %v5097_v9 }
 0x66d   : > { %v1226_v33 = vsel %vm971_vm4, %v4664_v32, 0.0  ;;  %4212 = vmatprep.subr.bf16.mxu0 %v5097_v9  ;;  %4226 = vmatprep.subr.bf16.mxu1 %v5097_v9 }
 0x66e   : > { %v4666_v34 = vpop.eup %4665  ;;  %1227 = vadd.xlane.f32.xlu0 %v1226_v33 }
 0x66f   : > { %v1229_v35 = vsel %vm971_vm4, %v4666_v34, 0.0  ;;  %v1232_v36 = vpack.c.bf16 %v4666_v34, %v4664_v32  ;;  %4227 = vmatpush3.bf16.msra.mxu1 %v4567_v57 }
 0x670   : > { %1230 = vadd.xlane.f32.xlu1 %v1229_v35  ;;  %4228 = vmatprep.subr.bf16.mxu1 %v5097_v9 }
 0x673   : > { %4203 = vmatmul.mubr.msk.bf16.vlgmr.msra.gmra.mrb[16].mxu0 %vm971_vm4, %v1232_v36  ;;  %4229 = vmatpush3.bf16.msra.mxu1 %v4568_v3  ;;  %v4575_v3 = vld [vmem:[#allocation10 + $0x18] ss:$12 sps:$4 sm:$0xff]  }
 0x674   : > { %v4668_v38 = vpop.eup %4667  ;;  %4213 = vmatpush3.bf16.msra.mxu0 %v1355_v37  ;;  %4214 = vmatprep.mubr.msk.bf16.mxu0 %vm5098_vm3, %v5097_v9 }
 0x675   : > { %v1347_v39 = vsel %vm971_vm4, %v4668_v38, 0.0  ;;  %4230 = vmatprep.subr.bf16.mxu1 %v5097_v9 }
 0x676   : > { %v4670_v40 = vpop.eup %4669  ;;  %1348 = vadd.xlane.f32.xlu0 %v1347_v39 }
 0x677   : > { %v1350_v41 = vsel %vm971_vm4, %v4670_v40, 0.0  ;;  %v1353_v42 = vpack.c.bf16 %v4670_v40, %v4668_v38  ;;  %4231 = vmatpush3.bf16.msra.mxu1 %v4569_v7 }
 0x678   : > { %1351 = vadd.xlane.f32.xlu1 %v1350_v41  ;;  %4232 = vmatprep.subr.bf16.mxu1 %v5097_v9 }
 0x67a   : > { %985 = vadd.xlane.f32.xlu0 %v984_v43 }
 0x67b   : > { %4215 = vmatmul.mubr.msk.bf16.vlgmr.msra.gmra.mrb[20].mxu0 %vm971_vm4, %v1353_v42  ;;  %4233 = vmatpush3.bf16.msra.mxu1 %v4570_v18  ;;  %v4585_v18 = vld [vmem:[#allocation10 + $0x4c] ss:$12 sps:$4 sm:$0xff]  }
 0x67c   : > { %988 = vadd.xlane.f32.xlu1 %v987_v44  ;;  %1779 = vmatprep.mubr.bf16.mxu0 %v5096_v0 }
 0x67d   : > { %4238 = vmatprep.subr.bf16.mxu1 %v5097_v9 }
 0x6c9   : > { %v5573_v45 = vpop.f32.mrb[8].mxu0 }
 0x6ca   : > { %v4180_v46 = vpop.f32.mrb[9].mxu0 }
 0x6cb   : > { %v5575_v47 = vpop.f32.mrb[10].mxu0 }
 0x6cc   : > { %v4181_v48 = vpop.f32.mrb[11].mxu0 }
 0x6f3   : > { %v1106_v52 = vpop.xlane.xlu1 %1105 }
 0x6f4   : > { %4671 = vrcp.f32 %v1106_v52 }
 0x6f7   : > { %v1109_v53 = vpop.xlane.xlu0 %1108 }
 0x6f8   : > { %4673 = vrcp.f32 %v1109_v53 }
 0x6fb   : > { %v1228_v55 = vpop.xlane.xlu0 %1227 }
 0x6fc   : > { %4675 = vrcp.f32 %v1228_v55 }
 0x6fd   : > { %v1231_v56 = vpop.xlane.xlu1 %1230 }
 0x6fe   : > { %4677 = vrcp.f32 %v1231_v56  ;;  %v4672_v59 = vpop.eup %4671 }
 0x702   : > { %v4674_v61 = vpop.eup %4673 }
 0x703   : > { %v1349_v4 = vpop.xlane.xlu0 %1348 }
 0x704   : > { %4679 = vrcp.f32 %v1349_v4 }
 0x705   : > { %v1352_v5 = vpop.xlane.xlu1 %1351 }
 0x706   : > { %4681 = vrcp.f32 %v1352_v5  ;;  %v4676_v11 = vpop.eup %4675 }
 0x707   : > { %v986_v31 = vpop.xlane.xlu0 %985 }
 0x708   : > { %v4678_v13 = vpop.eup %4677  ;;  %4683 = vrcp.f32 %v986_v31  ;;  %v4598_v31 = vld [vmem:[#allocation10 + $0x98] ss:$12 sps:$4 sm:$0xff]  }
 0x709   : > { %v989_v32 = vpop.xlane.xlu1 %988 }
 0x70a   : > { %4685 = vrcp.f32 %v989_v32  ;;  %v4601_v32 = vld [vmem:[#allocation10 + $0xac] ss:$12 sps:$4 sm:$0xff]  }
 0x70e   : > { %v4680_v23 = vpop.eup %4679 }
 0x710   : > { %v4682_v25 = vpop.eup %4681 }
 0x712   : > { %v4684_v34 = vpop.eup %4683 }
 0x713   : > { %v1037_v41 = vmul.f32 %v4684_v34, %v5573_v45  ;;  %v4602_v34 = vld [vmem:[#allocation10 + $0xb0] ss:$12 sps:$4 sm:$0xff]  }
 0x714   : > { %v4686_v36 = vpop.eup %4685 }
 0x715   : > { %v1038_v42 = vmul.f32 %v4686_v36, %v5575_v47  ;;  %v3846_v47 = vld [vmem:[#allocation5 + $0x12] ss:$0 sm:$0xff] }
 0x73e   : > { %v1152_v58 = vpop.f32.mrb[12].mxu0 }
 0x73f   : > { %v4192_v60 = vpop.f32.mrb[13].mxu0  ;;  %v1161_v63 = vmul.f32 %v4672_v59, %v1152_v58 }
 0x740   : > { %v1155_v62 = vpop.f32.mrb[14].mxu0 }
 0x741   : > { %v1162_v1 = vmul.f32 %v4674_v61, %v1155_v62  ;;  %v4193_v2 = vpop.f32.mrb[15].mxu0  ;;  %v4571_v62 = vld [vmem:[#allocation10] ss:$12 sps:$4 sm:$0xff]  }
 0x742   : > { %v4577_v2 = vld [vmem:[#allocation10 + $0x1c] ss:$12 sps:$4 sm:$0xff]  }
 0x743   : > { %v4501_v6 = vpack.i.bf16 %v1162_v1, %v1161_v63  ;;  %v4573_v63 = vld [vmem:[#allocation10 + $0x4] ss:$12 sps:$4 sm:$0xff]   ;;  %v4574_v1 = vld [vmem:[#allocation10 + $0x8] ss:$12 sps:$4 sm:$0xff]  }
 0x744   : > { %1747 = vmatprep.subr.bf16.mxu0 %v4573_v63 }
 0x745   : > { %4502 = vrot.lane.b32.xlu0 %v4501_v6, %s5099_s23  ;;  %1748 = vmatpush1.bf16.msra.mxu0 %v4571_v62 }
 0x746   : > { %v1273_v8 = vpop.f32.mrb[16].mxu0  ;;  %1749 = vmatprep.subr.bf16.mxu0 %v4577_v2 }
 0x747   : > { %v4204_v12 = vpop.f32.mrb[17].mxu0  ;;  %v1282_v15 = vmul.f32 %v4676_v11, %v1273_v8 }
 0x748   : > { %v1276_v14 = vpop.f32.mrb[18].mxu0 }
 0x749   : > { %v1283_v16 = vmul.f32 %v4678_v13, %v1276_v14  ;;  %v4205_v17 = vpop.f32.mrb[19].mxu0  ;;  %1750 = vmatpush1.bf16.msra.mxu0 %v4575_v3  ;;  %v4578_v14 = vld [vmem:[#allocation10 + $0x20] ss:$12 sps:$4 sm:$0xff]  }
 0x74a   : > { %v4582_v17 = vld [vmem:[#allocation10 + $0x38] ss:$12 sps:$4 sm:$0xff]  }
 0x74b   : > { %v4506_v20 = vpack.i.bf16 %v1283_v16, %v1282_v15  ;;  %v4581_v15 = vld [vmem:[#allocation10 + $0x34] ss:$12 sps:$4 sm:$0xff]   ;;  %v4579_v16 = vld [vmem:[#allocation10 + $0x30] ss:$12 sps:$4 sm:$0xff]  }
 0x74c   : > { %1751 = vmatprep.subr.bf16.mxu0 %v4581_v15 }
 0x74d   : > { %4507 = vrot.lane.b32.xlu1 %v4506_v20, %s5101_s2  ;;  %1752 = vmatpush1.bf16.msra.mxu0 %v4579_v16  ;;  %v4583_v20 = vld [vmem:[#allocation10 + $0x48] ss:$12 sps:$4 sm:$0xff]  }
 0x74e   : > { %v1394_v22 = vpop.f32.mrb[20].mxu0  ;;  %1753 = vmatprep.subr.bf16.mxu0 %v4585_v18 }
 0x74f   : > { %v4216_v24 = vpop.f32.mrb[21].mxu0  ;;  %v1403_v27 = vmul.f32 %v4680_v23, %v1394_v22  ;;  %v4586_v22 = vld [vmem:[#allocation10 + $0x50] ss:$12 sps:$4 sm:$0xff]  }
 0x750   : > { %v1397_v26 = vpop.f32.mrb[22].mxu0  ;;  %v4589_v23 = vld [vmem:[#allocation10 + $0x64] ss:$12 sps:$4 sm:$0xff]   ;;  %v4587_v24 = vld [vmem:[#allocation10 + $0x60] ss:$12 sps:$4 sm:$0xff]  }
 0x751   : > { %v1404_v28 = vmul.f32 %v4682_v25, %v1397_v26  ;;  %v4217_v29 = vpop.f32.mrb[23].mxu0  ;;  %1754 = vmatpush1.bf16.msra.mxu0 %v4583_v20  ;;  %v4590_v25 = vld [vmem:[#allocation10 + $0x68] ss:$12 sps:$4 sm:$0xff]  }
 0x752   : > { %1755 = vmatprep.subr.bf16.mxu0 %v4589_v23  ;;  %v4593_v26 = vld [vmem:[#allocation10 + $0x7c] ss:$12 sps:$4 sm:$0xff]   ;;  %v4597_v29 = vld [vmem:[#allocation10 + $0x94] ss:$12 sps:$4 sm:$0xff]  }
 0x753   : > { %v4511_v30 = vpack.i.bf16 %v1404_v28, %v1403_v27  ;;  %v4591_v27 = vld [vmem:[#allocation10 + $0x78] ss:$12 sps:$4 sm:$0xff]   ;;  %v4594_v28 = vld [vmem:[#allocation10 + $0x80] ss:$12 sps:$4 sm:$0xff]  }
 0x755   : > { %4512 = vrot.lane.b32.xlu1 %v4511_v30, %s5100_s14  ;;  %1756 = vmatpush1.bf16.msra.mxu0 %v4587_v24  ;;  %v4595_v30 = vld [vmem:[#allocation10 + $0x90] ss:$12 sps:$4 sm:$0xff]  }
 0x756   : > { %1757 = vmatprep.subr.bf16.mxu0 %v4593_v26 }
 0x759   : > { %1758 = vmatpush1.bf16.msra.mxu0 %v4591_v27 }
 0x75a   : > { %1759 = vmatprep.subr.bf16.mxu0 %v4597_v29 }
 0x75d   : > { %1760 = vmatpush1.bf16.msra.mxu0 %v4595_v30 }
 0x75e   : > { %1761 = vmatprep.subr.bf16.mxu0 %v4601_v32 }
 0x7b7   : > { %v4503_v33 = vpop.permute.xlu0 %4502 }
 0x7b8   : > { %v4505_v37 = vunpack.i.h.bf16 %v4503_v33  ;;  %v4504_v38 = vunpack.i.l.bf16 %v4503_v33  ;;  %v4599_v33 = vld [vmem:[#allocation10 + $0xa8] ss:$12 sps:$4 sm:$0xff]  }
 0x7b9   : > { %1762 = vmatpush1.bf16.msra.mxu0 %v4599_v33 }
 0x7ba   : > { %v1430_v44 = vsel %vm540_vm0, %v1038_v42, %v4505_v37  ;;  %v1429_v46 = vsel %vm540_vm0, %v1037_v41, %v4504_v38  ;;  %4258 = vmatprep.subr.bf16.mxu0 %v5097_v9 }
 0x7bf   : > { %v4508_v35 = vpop.permute.xlu1 %4507 }
 0x7c0   : > { %v4510_v39 = vunpack.i.h.bf16 %v4508_v35  ;;  %v4509_v40 = vunpack.i.l.bf16 %v4508_v35 }
 0x7c2   : > { %v1432_v50 = vsel %vm1431_vm5, %v1429_v46, %v4509_v40  ;;  %v1433_v51 = vsel %vm1431_vm5, %v1430_v44, %v4510_v39 }
 0x7c7   : > { %v4513_v43 = vpop.permute.xlu1 %4512 }
 0x7c8   : > { %v4515_v48 = vunpack.i.h.bf16 %v4513_v43  ;;  %v4514_v49 = vunpack.i.l.bf16 %v4513_v43  ;;  %v3855_v43 = vld [vmem:[#allocation5 + $0x13] ss:$0 sm:$0xff] }
 0x7ca   : > { %v1435_v52 = vsel %vm1434_vm6, %v1432_v50, %v4514_v49  ;;  %v1436_v53 = vsel %vm1434_vm6, %v1433_v51, %v4515_v48  ;;  %v3856_v49 = vld [vmem:[#allocation5 + $0x14] ss:$0 sm:$0xff] }
 0x7cb   : > { %v1437_v45 = vpack.c.bf16 %v1436_v53, %v1435_v52 }
 0x7cd   : > { %4235 = vmatmul.mubr.bf16.vlgmr.msra.gmra.mrb[20].mxu1 %v1437_v45 }
 0x7ce   : > { %4254 = vmatprep.mubr.msk.bf16.mxu1 %vm5098_vm3, %v5097_v9  ;;  %4239 = vmatpush3.bf16.msra.mxu1 %v4574_v1 }
 0x7cf   : > { %4240 = vmatprep.subr.bf16.mxu1 %v5097_v9 }
 0x7d2   : > { %4241 = vmatpush3.bf16.msra.mxu1 %v4578_v14 }
 0x7d3   : > { %4242 = vmatprep.subr.bf16.mxu1 %v5097_v9 }
 0x7d6   : > { %4243 = vmatpush3.bf16.msra.mxu1 %v4582_v17 }
 0x7d7   : > { %4244 = vmatprep.subr.bf16.mxu1 %v5097_v9 }
 0x7da   : > { %4245 = vmatpush3.bf16.msra.mxu1 %v4586_v22 }
 0x7db   : > { %4246 = vmatprep.subr.bf16.mxu1 %v5097_v9 }
 0x7de   : > { %4247 = vmatpush3.bf16.msra.mxu1 %v4590_v25 }
 0x7df   : > { %4248 = vmatprep.subr.bf16.mxu1 %v5097_v9 }
 0x7e2   : > { %4249 = vmatpush3.bf16.msra.mxu1 %v4594_v28 }
 0x7e3   : > { %4250 = vmatprep.subr.bf16.mxu1 %v5097_v9 }
 0x7e6   : > { %4251 = vmatpush3.bf16.msra.mxu1 %v4598_v31 }
 0x7e7   : > { %4252 = vmatprep.subr.bf16.mxu1 %v5097_v9 }
 0x7ea   : > { %4253 = vmatpush3.bf16.msra.mxu1 %v4602_v34 }
 0x7eb   : > { %4282 = vmatprep.subr.bf16.mxu1 %v5097_v9 }
 0x8a0   : > { %v1524_v54 = vpop.f32.mrb[20].mxu1 }
 0x8a1   : > { %v1525_v55 = vadd.f32 %v3846_v47, %v1524_v54  ;;  %v4236_v56 = vpop.f32.mrb[21].mxu1 }
 0x8a2   : > { %v1527_v57 = vpop.f32.mrb[22].mxu1 }
 0x8a3   : > { %v5599_v58 = vadd.f32 %v1525_v55, %v5471_v19  ;;  %v1528_v59 = vadd.f32 %v3846_v47, %v1527_v57  ;;  %v4237_v60 = vpop.f32.mrb[23].mxu1 }
 0x8a5   : > { %v5602_v61 = vadd.f32 %v1528_v59, %v5474_v21  ;;  %1536 = vadd.xlane.f32.xlu0 %v5599_v58 }
 0x8a7   : > { %1538 = vadd.xlane.f32.xlu1 %v5602_v61 }
 0x932   : > { %v1537_v4 = vpop.xlane.xlu0 %1536 }
 0x933   : > { %v1540_v5 = vmul.f32 0.0078125, %v1537_v4 }
 0x934   : > { %v1539_v6 = vpop.xlane.xlu1 %1538 }
 0x935   : > { %v1542_v7 = vsub.f32 %v5599_v58, %v1540_v5  ;;  %v1541_v8 = vmul.f32 0.0078125, %v1539_v6 }
 0x937   : > { %v5609_v11 = vsub.f32 %v5602_v61, %v1541_v8  ;;  %v1544_v12 = vmul.f32 %v1542_v7, %v1542_v7 }
 0x939   : > { %1546 = vadd.xlane.f32.xlu0 %v1544_v12  ;;  %v1545_v13 = vmul.f32 %v5609_v11, %v5609_v11 }
 0x93d   : > { %1548 = vadd.xlane.f32.xlu0 %v1545_v13 }
 0x9c6   : > { %v1547_v35 = vpop.xlane.xlu0 %1546 }
 0x9c7   : > { %v1550_v36 = vmul.f32 0.0078125, %v1547_v35 }
 0x9c9   : > { %v1552_v37 = vadd.f32 1e-05, %v1550_v36 }
 0x9ca   : > { %v1549_v38 = vpop.xlane.xlu0 %1548 }
 0x9cb   : > { %4687 = vrsqrt.f32 %v1552_v37  ;;  %v1551_v39 = vmul.f32 0.0078125, %v1549_v38 }
 0x9cd   : > { %v1553_v40 = vadd.f32 1e-05, %v1551_v39 }
 0x9cf   : > { %4689 = vrsqrt.f32 %v1553_v40 }
 0x9d5   : > { %v4688_v41 = vpop.eup %4687 }
 0x9d6   : > { %v1556_v42 = vmul.f32 %v4688_v41, %v1542_v7 }
 0x9d8   : > { %v1562_v48 = vmul.f32 %v3855_v43, %v1556_v42 }
 0x9d9   : > { %v4690_v44 = vpop.eup %4689 }
 0x9da   : > { %v1557_v46 = vmul.f32 %v4690_v44, %v5609_v11  ;;  %v1568_v51 = vadd.f32 %v3856_v49, %v1562_v48 }
 0x9dc   : > { %v1563_v50 = vmul.f32 %v3855_v43, %v1557_v46 }
 0x9de   : > { %v1569_v52 = vadd.f32 %v3856_v49, %v1563_v50 }
 0x9e0   : > { %v1618_v53 = vpack.c.bf16 %v1569_v52, %v1568_v51 }
 0x9e2   : > { %1780 = vmatmul.mubr.bf16.vlgmr.msra.gmra.mrb[24].mxu0 %v1618_v53  ;;  %4255 = vmatmul.mubr.bf16.vlgmr.msra.gmra.mrb[24].mxu1 %v1618_v53 }
 0x9e3   : > { %4260 = vmatprep.mubr.msk.bf16.mxu0 %vm5098_vm3, %v5097_v9  ;;  %4284 = vmatprep.mubr.msk.bf16.mxu1 %vm5098_vm3, %v5097_v9 }
 0xab5   : > { %v1781_v45 = vpop.f32.mrb[24].mxu0  ;;  %v1824_v47 = vpop.f32.mrb[24].mxu1 }
 0xab6   : > { %v1783_v54 = vpop.f32.mrb[25].mxu0  ;;  %v4256_v55 = vpop.f32.mrb[25].mxu1 }
 0xab7   : > { %v1785_v56 = vpop.f32.mrb[26].mxu0  ;;  %v1827_v57 = vpop.f32.mrb[26].mxu1 }
 0xab8   : > { %v1831_v59 = vpack.c.bf16 %v1785_v56, %v1781_v45  ;;  %v5626_v60 = vpack.c.bf16 %v1827_v57, %v1824_v47  ;;  %v1787_v62 = vpop.f32.mrb[27].mxu0  ;;  %v4257_v63 = vpop.f32.mrb[27].mxu1 }
 0xab9   : > { %v1832_v1 = vpack.c.bf16 %v1787_v62, %v1783_v54 }
 0xabb   : > { %v1838_v2 = vsel %vm540_vm0, %v1832_v1, 0 }
 0xabc   : > { %4259 = vmatpush3.bf16.xpose.msra.mxu0 %v1838_v2 }
 0xabd   : > { %4264 = vmatprep.subr.bf16.mxu0 %v5097_v9 }
 0xac3   : > { %4261 = vmatmul.mubr.msk.bf16.vlgmr.msra.gmra.mrb[28].mxu0 %vm540_vm0, %v1831_v59 }
 0xac4   : > { %4265 = vmatpush3.bf16.msra.mxu0 %v5626_v60  ;;  %4266 = vmatprep.mubr.msk.bf16.mxu0 %vm5098_vm3, %v5097_v9 }
 0xac5   : > { %4270 = vmatprep.subr.bf16.mxu0 %v5097_v9 }
 0xb96   : > { %v1874_v3 = vpop.f32.mrb[28].mxu0 }
 0xb97   : > { %v4262_v4 = vpop.f32.mrb[29].mxu0  ;;  %v1881_v5 = vsel %vm971_vm4, %v1874_v3, -inf }
 0xb98   : > { %1882 = vmax.xlane.f32.xlu1 %v1881_v5  ;;  %v1877_v6 = vpop.f32.mrb[30].mxu0 }
 0xb99   : > { %v4263_v7 = vpop.f32.mrb[31].mxu0  ;;  %v1884_v8 = vsel %vm971_vm4, %v1877_v6, -inf }
 0xb9a   : > { %1885 = vmax.xlane.f32.xlu0 %v1884_v8 }
 0xba9   : > { %1952 = vrot.lane.b32.xlu1 %v1832_v1, %s5100_s14 }
 0xbad   : > { %2074 = vrot.lane.b32.xlu1 %v1832_v1, %s5101_s2 }
 0xbb0   : > { %1949 = vrot.lane.b32.xlu0 %v1831_v59, %s5100_s14 }
 0xbb1   : > { %2072 = vrot.lane.b32.xlu1 %v1831_v59, %s5101_s2 }
 0xbb4   : > { %2195 = vrot.lane.b32.xlu0 %v1832_v1, %s5099_s23 }
 0xbb5   : > { %2193 = vrot.lane.b32.xlu1 %v1831_v59, %s5099_s23 }
 0xc25   : > { %v1883_v11 = vpop.xlane.xlu1 %1882 }
 0xc26   : > { %v1887_v12 = vsub.f32 %v1874_v3, %v1883_v11 }
 0xc27   : > { %v1886_v13 = vpop.xlane.xlu0 %1885 }
 0xc28   : > { %v1889_v14 = vmul.f32 1.442695, %v1887_v12  ;;  %v1888_v15 = vsub.f32 %v1877_v6, %v1886_v13 }
 0xc29   : > { %v1953_v16 = vpop.permute.xlu1 %1952 }
 0xc2a   : > { %v1891_v17 = vmul.f32 1.442695, %v1888_v15  ;;  %4691 = vpow2.f32 %v1889_v14  ;;  %v1958_v29 = vsel %vm540_vm0, %v1953_v16, 0 }
 0xc2b   : > { %v1950_v18 = vpop.permute.xlu0 %1949 }
 0xc2c   : > { %4693 = vpow2.f32 %v1891_v17 }
 0xc2d   : > { %v2075_v20 = vpop.permute.xlu1 %2074 }
 0xc2e   : > { %v2080_v22 = vsel %vm540_vm0, %v2075_v20, 0 }
 0xc2f   : > { %4283 = vmatpush3.bf16.xpose.msra.mxu1 %v2080_v22  ;;  %v2196_v23 = vpop.permute.xlu0 %2195 }
 0xc30   : > { %4294 = vmatprep.subr.bf16.mxu1 %v5097_v9  ;;  %v2201_v27 = vsel %vm540_vm0, %v2196_v23, 0 }
 0xc31   : > { %v2073_v25 = vpop.permute.xlu1 %2072 }
 0xc34   : > { %v5645_v24 = vpop.eup %4691 }
 0xc35   : > { %v2194_v30 = vpop.permute.xlu1 %2193 }
 0xc36   : > { %v5647_v26 = vpop.eup %4693  ;;  %4285 = vmatmul.mubr.msk.bf16.vlgmr.msra.gmra.mrb[28].mxu1 %vm540_vm0, %v2073_v25 }
 0xc37   : > { %4295 = vmatpush3.bf16.xpose.msra.mxu1 %v2201_v27  ;;  %v1899_v28 = vpack.c.bf16 %v5647_v26, %v5645_v24  ;;  %4296 = vmatprep.mubr.msk.bf16.mxu1 %vm5098_vm3, %v5097_v9 }
 0xc38   : > { %4306 = vmatprep.subr.bf16.mxu1 %v5097_v9 }
 0xc39   : > { %4267 = vmatmul.mubr.msk.bf16.vlgmr.msra.gmra.mrb[32].mxu0 %vm971_vm4, %v1899_v28 }
 0xc3a   : > { %4271 = vmatpush3.bf16.xpose.msra.mxu0 %v1958_v29  ;;  %4272 = vmatprep.mubr.msk.bf16.mxu0 %vm5098_vm3, %v5097_v9 }
 0xc3b   : > { %4276 = vmatprep.subr.bf16.mxu0 %v5097_v9 }
 0xc3e   : > { %4297 = vmatmul.mubr.msk.bf16.vlgmr.msra.gmra.mrb[32].mxu1 %vm540_vm0, %v2194_v30 }
 0xc3f   : > { %4322 = vmatprep.mubr.msk.bf16.mxu1 %vm5098_vm3, %v5097_v9 }
 0xc41   : > { %4273 = vmatmul.mubr.msk.bf16.vlgmr.msra.gmra.mrb[36].mxu0 %vm540_vm0, %v1950_v18 }
 0xc42   : > { %4278 = vmatprep.mubr.msk.bf16.mxu0 %vm5098_vm3, %v5097_v9 }
 0xd09   : > { %v2116_v31 = vpop.f32.mrb[28].mxu1 }
 0xd0a   : > { %v4286_v32 = vpop.f32.mrb[29].mxu1  ;;  %v2123_v33 = vsel %vm971_vm4, %v2116_v31, -inf }
 0xd0b   : > { %2124 = vmax.xlane.f32.xlu0 %v2123_v33  ;;  %v2119_v34 = vpop.f32.mrb[30].mxu1  ;;  %v1893_v32 = vsel %vm971_vm4, %v5645_v24, 0.0  ;;  %v4603_v24 = vld [vmem:[#allocation11] sm:$0xff]  }
 0xd0c   : > { %v5668_v35 = vpop.f32.mrb[32].mxu0  ;;  %v4287_v36 = vpop.f32.mrb[31].mxu1  ;;  %v2126_v53 = vsel %vm971_vm4, %v2119_v34, -inf  ;;  %4307 = vmatpush3.bf16.msra.mxu1 %v4603_v24 }
 0xd0d   : > { %v4268_v37 = vpop.f32.mrb[33].mxu0  ;;  %v1896_v36 = vsel %vm971_vm4, %v5647_v26, 0.0  ;;  %4308 = vmatprep.subr.bf16.mxu1 %v5097_v9 }
 0xd0e   : > { %v5670_v38 = vpop.f32.mrb[34].mxu0  ;;  %v4604_v37 = vld [vmem:[#allocation11 + $0x8] sm:$0xff]  }
 0xd0f   : > { %v4269_v39 = vpop.f32.mrb[35].mxu0 }
 0xd10   : > { %4309 = vmatpush3.bf16.msra.mxu1 %v4604_v37  ;;  %v4605_v39 = vld [vmem:[#allocation11 + $0x10] sm:$0xff]  }
 0xd11   : > { %v2237_v40 = vpop.f32.mrb[32].mxu1  ;;  %4310 = vmatprep.subr.bf16.mxu1 %v5097_v9 }
 0xd12   : > { %v4298_v41 = vpop.f32.mrb[33].mxu1  ;;  %v2244_v42 = vsel %vm971_vm4, %v2237_v40, -inf }
 0xd13   : > { %2245 = vmax.xlane.f32.xlu1 %v2244_v42  ;;  %v2240_v43 = vpop.f32.mrb[34].mxu1 }
 0xd14   : > { %v1994_v44 = vpop.f32.mrb[36].mxu0  ;;  %v4299_v46 = vpop.f32.mrb[35].mxu1  ;;  %v2247_v45 = vsel %vm971_vm4, %v2240_v43, -inf  ;;  %4311 = vmatpush3.bf16.msra.mxu1 %v4605_v39 }
 0xd15   : > { %v4274_v48 = vpop.f32.mrb[37].mxu0  ;;  %v2001_v49 = vsel %vm971_vm4, %v1994_v44, -inf  ;;  %4312 = vmatprep.subr.bf16.mxu1 %v5097_v9 }
 0xd16   : > { %v1997_v50 = vpop.f32.mrb[38].mxu0  ;;  %2002 = vmax.xlane.f32.xlu0 %v2001_v49 }
 0xd17   : > { %v4275_v51 = vpop.f32.mrb[39].mxu0  ;;  %v2004_v52 = vsel %vm971_vm4, %v1997_v50, -inf }
 0xd18   : > { %2005 = vmax.xlane.f32.xlu1 %v2004_v52 }
 0xd1a   : > { %2127 = vmax.xlane.f32.xlu0 %v2126_v53 }
 0xd1e   : > { %2248 = vmax.xlane.f32.xlu0 %v2247_v45 }
 0xd29   : > { %2021 = vrot.lane.b32.xlu1 %v5626_v60, %s5100_s14 }
 0xd2d   : > { %2263 = vrot.lane.b32.xlu1 %v5626_v60, %s5099_s23 }
 0xd34   : > { %2142 = vrot.lane.b32.xlu0 %v5626_v60, %s5101_s2 }
 0xd98   : > { %v2125_v47 = vpop.xlane.xlu0 %2124 }
 0xd99   : > { %v2129_v54 = vsub.f32 %v2116_v31, %v2125_v47  ;;  %v4608_v47 = vld [vmem:[#allocation11 + $0x28] sm:$0xff]  }
 0xd9b   : > { %v2131_v55 = vmul.f32 1.442695, %v2129_v54 }
 0xd9d   : > { %4695 = vpow2.f32 %v2131_v55 }
 0xda0   : > { %v2246_v56 = vpop.xlane.xlu1 %2245 }
 0xda1   : > { %v2250_v57 = vsub.f32 %v2237_v40, %v2246_v56 }
 0xda3   : > { %v2003_v59 = vpop.xlane.xlu0 %2002  ;;  %v2252_v4 = vmul.f32 1.442695, %v2250_v57  ;;  %v4609_v57 = vld [vmem:[#allocation11 + $0x30] sm:$0xff]  }
 0xda4   : > { %v2007_v62 = vsub.f32 %v1994_v44, %v2003_v59  ;;  %v4607_v44 = vld [vmem:[#allocation11 + $0x20] sm:$0xff]  }
 0xda5   : > { %v2006_v63 = vpop.xlane.xlu1 %2005 }
 0xda6   : > { %v2009_v1 = vmul.f32 1.442695, %v2007_v62  ;;  %v2008_v2 = vsub.f32 %v1997_v50, %v2006_v63 }
 0xda7   : > { %v4696_v3 = vpop.eup %4695  ;;  %v2128_v5 = vpop.xlane.xlu0 %2127 }
 0xda8   : > { %v2011_v6 = vmul.f32 1.442695, %v2008_v2  ;;  %v2130_v7 = vsub.f32 %v2119_v34, %v2128_v5  ;;  %v2135_v8 = vsel %vm971_vm4, %v4696_v3, 0.0  ;;  %4697 = vpow2.f32 %v2009_v1 }
 0xda9   : > { %v2022_v60 = vpop.permute.xlu1 %2021  ;;  %2136 = vadd.xlane.f32.xlu0 %v2135_v8 }
 0xdaa   : > { %4699 = vpow2.f32 %v2011_v6  ;;  %v2133_v11 = vmul.f32 1.442695, %v2130_v7  ;;  %4277 = vmatpush3.bf16.msra.mxu0 %v2022_v60  ;;  %v4610_v6 = vld [vmem:[#allocation11 + $0x38] sm:$0xff]  }
 0xdab   : > { %4701 = vpow2.f32 %v2252_v4  ;;  %v2249_v12 = vpop.xlane.xlu0 %2248  ;;  %4288 = vmatprep.subr.bf16.mxu0 %v5097_v9 }
 0xdac   : > { %4703 = vpow2.f32 %v2133_v11  ;;  %v2251_v13 = vsub.f32 %v2240_v43, %v2249_v12  ;;  %v4606_v43 = vld [vmem:[#allocation11 + $0x18] sm:$0xff]  }
 0xdad   : > { %v2264_v33 = vpop.permute.xlu1 %2263  ;;  %4313 = vmatpush3.bf16.msra.mxu1 %v4606_v43 }
 0xdae   : > { %v2254_v14 = vmul.f32 1.442695, %v2251_v13  ;;  %4314 = vmatprep.subr.bf16.mxu1 %v5097_v9 }
 0xdaf   : > { %v2143_v23 = vpop.permute.xlu0 %2142 }
 0xdb0   : > { %4705 = vpow2.f32 %v2254_v14 }
 0xdb1   : > { %4315 = vmatpush3.bf16.msra.mxu1 %v4607_v44 }
 0xdb2   : > { %v4698_v15 = vpop.eup %4697  ;;  %4316 = vmatprep.subr.bf16.mxu1 %v5097_v9 }
 0xdb3   : > { %v2013_v30 = vsel %vm971_vm4, %v4698_v15, 0.0 }
 0xdb4   : > { %v4700_v16 = vpop.eup %4699 }
 0xdb5   : > { %v4702_v17 = vpop.eup %4701  ;;  %v2016_v18 = vsel %vm971_vm4, %v4700_v16, 0.0  ;;  %v2019_v20 = vpack.c.bf16 %v4700_v16, %v4698_v15  ;;  %4317 = vmatpush3.bf16.msra.mxu1 %v4608_v47  ;;  %v2478_v47 = vld [vmem:[#allocation13 + $0x8] sm:$0xff] }
 0xdb6   : > { %v4704_v22 = vpop.eup %4703  ;;  %2017 = vadd.xlane.f32.xlu0 %v2016_v18  ;;  %v2256_v28 = vsel %vm971_vm4, %v4702_v17, 0.0  ;;  %4318 = vmatprep.subr.bf16.mxu1 %v5097_v9 }
 0xdb7   : > { %4279 = vmatmul.mubr.msk.bf16.vlgmr.msra.gmra.mrb[40].mxu0 %vm971_vm4, %v2019_v20  ;;  %v2138_v25 = vsel %vm971_vm4, %v4704_v22, 0.0  ;;  %v2141_v27 = vpack.c.bf16 %v4704_v22, %v4696_v3 }
 0xdb8   : > { %4289 = vmatpush3.bf16.msra.mxu0 %v2143_v23  ;;  %2139 = vadd.xlane.f32.xlu1 %v2138_v25 }
 0xdb9   : > { %4290 = vmatprep.mubr.msk.bf16.mxu0 %vm5098_vm3, %v5097_v9  ;;  %4300 = vmatprep.subr.bf16.mxu0 %v5097_v9 }
 0xdba   : > { %v4706_v29 = vpop.eup %4705  ;;  %2257 = vadd.xlane.f32.xlu0 %v2256_v28  ;;  %4319 = vmatpush3.bf16.msra.mxu1 %v4609_v57  ;;  %v2485_v57 = vld [vmem:[#allocation13 + $0x40] sm:$0xff] }
 0xdbb   : > { %v2262_v31 = vpack.c.bf16 %v4706_v29, %v4702_v17  ;;  %v2259_v34 = vsel %vm971_vm4, %v4706_v29, 0.0  ;;  %4320 = vmatprep.subr.bf16.mxu1 %v5097_v9 }
 0xdbc   : > { %2014 = vadd.xlane.f32.xlu1 %v2013_v30 }
 0xdbe   : > { %1894 = vadd.xlane.f32.xlu0 %v1893_v32  ;;  %4321 = vmatpush3.bf16.msra.mxu1 %v4610_v6 }
 0xdbf   : > { %4291 = vmatmul.mubr.msk.bf16.vlgmr.msra.gmra.mrb[44].mxu0 %vm971_vm4, %v2141_v27 }
 0xdc0   : > { %4301 = vmatpush3.bf16.msra.mxu0 %v2264_v33  ;;  %2260 = vadd.xlane.f32.xlu1 %v2259_v34 }
 0xdc1   : > { %4302 = vmatprep.mubr.msk.bf16.mxu0 %vm5098_vm3, %v5097_v9 }
 0xdc4   : > { %1897 = vadd.xlane.f32.xlu1 %v1896_v36 }
 0xdc7   : > { %4303 = vmatmul.mubr.msk.bf16.vlgmr.msra.gmra.mrb[48].mxu0 %vm971_vm4, %v2262_v31 }
 0xdc8   : > { %2935 = vmatprep.mubr.bf16.mxu0 %v5096_v0 }
 0xe36   : > { %v2137_v41 = vpop.xlane.xlu0 %2136 }
 0xe43   : > { %v2018_v26 = vpop.xlane.xlu0 %2017 }
 0xe44   : > { %4707 = vrcp.f32 %v2018_v26 }
 0xe45   : > { %v2140_v40 = vpop.xlane.xlu1 %2139 }
 0xe47   : > { %v2258_v54 = vpop.xlane.xlu0 %2257 }
 0xe49   : > { %v2015_v42 = vpop.xlane.xlu1 %2014 }
 0xe4a   : > { %4709 = vrcp.f32 %v2015_v42 }
 0xe4b   : > { %4711 = vrcp.f32 %v2137_v41  ;;  %v1895_v18 = vpop.xlane.xlu0 %1894 }
 0xe4c   : > { %4713 = vrcp.f32 %v2140_v40 }
 0xe4d   : > { %v2261_v55 = vpop.xlane.xlu1 %2260  ;;  %4715 = vrcp.f32 %v2258_v54 }
 0xe4e   : > { %v4708_v48 = vpop.eup %4707  ;;  %4717 = vrcp.f32 %v2261_v55 }
 0xe4f   : > { %4719 = vrcp.f32 %v1895_v18  ;;  %v2498_v18 = vld [vmem:[#allocation13 + $0xa8] sm:$0xff] }
 0xe51   : > { %v1898_v20 = vpop.xlane.xlu1 %1897 }
 0xe52   : > { %4721 = vrcp.f32 %v1898_v20 }
 0xe54   : > { %v4710_v50 = vpop.eup %4709 }
 0xe55   : > { %v4712_v62 = vpop.eup %4711 }
 0xe56   : > { %v4714_v1 = vpop.eup %4713 }
 0xe57   : > { %v4716_v60 = vpop.eup %4715 }
 0xe58   : > { %v4718_v12 = vpop.eup %4717 }
 0xe59   : > { %v4720_v23 = vpop.eup %4719 }
 0xe5a   : > { %v1946_v32 = vmul.f32 %v4720_v23, %v5668_v35  ;;  %v3889_v35 = vld [vmem:[#allocation5 + $0x15] ss:$0 sm:$0xff] }
 0xe5c   : > { %v4722_v27 = vpop.eup %4721 }
 0xe5d   : > { %v1947_v33 = vmul.f32 %v4722_v27, %v5670_v38  ;;  %v2505_v27 = vld [vmem:[#allocation13 + $0xe0] sm:$0xff] }
 0xe8a   : > { %v2061_v46 = vpop.f32.mrb[40].mxu0 }
 0xe8b   : > { %v4280_v49 = vpop.f32.mrb[41].mxu0  ;;  %v2070_v52 = vmul.f32 %v4710_v50, %v2061_v46 }
 0xe8c   : > { %v2064_v51 = vpop.f32.mrb[42].mxu0 }
 0xe8d   : > { %v2071_v53 = vmul.f32 %v4708_v48, %v2064_v51  ;;  %v4281_v45 = vpop.f32.mrb[43].mxu0 }
 0xe8e   : > { %v2481_v45 = vld [vmem:[#allocation13 + $0x20] sm:$0xff] }
 0xe8f   : > { %v4516_v56 = vpack.i.bf16 %v2071_v53, %v2070_v52  ;;  %v2477_v53 = vld [vmem:[#allocation13] sm:$0xff] }
 0xe90   : > { %v3900_v54 = vcombine.low %v2477_v53, %v2481_v45  ;;  %v3901_v55 = vcombine.high %v2477_v53, %v2481_v45  ;;  %v2529_v53 = vld [vmem:[#allocation13 + $0x1a0] sm:$0xff]  ;;  %v2526_v45 = vld [vmem:[#allocation13 + $0x188] sm:$0xff] }
 0xe91   : > { %4517 = vrot.lane.b32.xlu0 %v4516_v56, %s5099_s23  ;;  %v2482_v56 = vld [vmem:[#allocation13 + $0x28] sm:$0xff] }
 0xe92   : > { %v2182_v59 = vpop.f32.mrb[44].mxu0  ;;  %2903 = vmatprep.subr.bf16.mxu0 %v3901_v55 }
 0xe93   : > { %v4292_v63 = vpop.f32.mrb[45].mxu0  ;;  %v2191_v3 = vmul.f32 %v4712_v62, %v2182_v59  ;;  %v2489_v59 = vld [vmem:[#allocation13 + $0x60] sm:$0xff]  ;;  %v3902_v62 = vcombine.low %v2478_v47, %v2482_v56  ;;  %2904 = vmatpush1.bf16.msra.mxu0 %v3900_v54  ;;  %v2530_v54 = vld [vmem:[#allocation13 + $0x1a8] sm:$0xff] }
 0xe94   : > { %v2185_v2 = vpop.f32.mrb[46].mxu0  ;;  %v3909_v63 = vcombine.high %v2485_v57, %v2489_v59 }
 0xe95   : > { %v2192_v4 = vmul.f32 %v4714_v1, %v2185_v2  ;;  %v4293_v5 = vpop.f32.mrb[47].mxu0  ;;  %v2486_v1 = vld [vmem:[#allocation13 + $0x48] sm:$0xff] }
 0xe96   : > { %v2490_v2 = vld [vmem:[#allocation13 + $0x68] sm:$0xff]  ;;  %2905 = vmatprep.subr.bf16.mxu0 %v3909_v63 }
 0xe97   : > { %v4521_v7 = vpack.i.bf16 %v2192_v4, %v2191_v3  ;;  %v3908_v3 = vcombine.low %v2485_v57, %v2489_v59  ;;  %v3910_v4 = vcombine.low %v2486_v1, %v2490_v2  ;;  %v3951_v57 = vcombine.high %v2526_v45, %v2530_v54  ;;  %v2533_v59 = vld [vmem:[#allocation13 + $0x1c0] sm:$0xff] }
 0xe99   : > { %4522 = vrot.lane.b32.xlu1 %v4521_v7, %s5101_s2  ;;  %2906 = vmatpush1.bf16.msra.mxu0 %v3908_v3  ;;  %v2483_v3 = vld [vmem:[#allocation13 + $0x30] sm:$0xff]  ;;  %s507_s2 = sand.u32 1, %s5069_s18  }
 0xe9a   : > { %v2303_v8 = vpop.f32.mrb[48].mxu0  ;;  %s3805_s22 = sshll.u32 %s507_s2, 4  ;;  %s5871_s16 = scalar_lea.sflag [#allocation4], %s507_s2 }
 0xe9b   : > { %v4304_v11 = vpop.f32.mrb[49].mxu0  ;;  %v2312_v14 = vmul.f32 %v4716_v60, %v2303_v8  ;;  %s509_s19 = scalar_lea.vmem [#allocation17], %s3805_s22 }
 0xe9c   : > { %v2306_v13 = vpop.f32.mrb[50].mxu0  ;;  %s3633_s25 = sshll.u32 %s509_s19, 4  ;;  %s5863_s25 = int_to_ptr.vmem [resolvable:$true] %s3633_s25 }
 0xe9d   : > { %v2313_v15 = vmul.f32 %v4718_v12, %v2306_v13  ;;  %v4305_v16 = vpop.f32.mrb[51].mxu0  ;;  %s4995_s21 = scalar_lea.vmem %s5863_s25, 256  ;;  %p5002_p6 = scmp.lt.s32.totalorder %s5863_s25, %s5000_s29 }
 0xe9e   : > { %v2494_v16 = vld [vmem:[#allocation13 + $0x88] sm:$0xff]  ;;  %p4996_p8 = scmp.ne.s32.totalorder %s5863_s25, %s4995_s21  ;;  %p5003_p9 = scmp.lt.s32.totalorder %s5001_s13, %s4995_s21 }
 0xe9f   : > { %v4526_v17 = vpack.i.bf16 %v2313_v15, %v2312_v14  ;;  %v2493_v14 = vld [vmem:[#allocation13 + $0x80] sm:$0xff]  ;;  %v3919_v23 = vcombine.high %v2494_v16, %v2498_v18 }
 0xea0   : > { %v2497_v15 = vld [vmem:[#allocation13 + $0xa0] sm:$0xff]  ;;  %p4997_p5 = pnand %p4996_p8, %p5965_p11  ;;  %p5004_p10 = por %p5003_p9, %p5002_p6 }
 0xea1   : > { %4527 = vrot.lane.b32.xlu1 %v4526_v17, %s5100_s14  ;;  %v3917_v17 = vcombine.high %v2493_v14, %v2497_v15  ;;  %v3916_v20 = vcombine.low %v2493_v14, %v2497_v15 }
 0xea2   : > { %p4998_p0 = pneg %p4997_p5 }
 0xea3   : > { %2907 = vmatprep.subr.bf16.mxu0 %v3917_v17 }
 0xea4   : > { %2908 = vmatpush1.bf16.msra.mxu0 %v3916_v20  ;;  %p5005_p13 = pnand %p5004_p10, %p4998_p0 }
 0xf03   : > { %v4518_v22 = vpop.permute.xlu0 %4517 }
 0xf04   : > { %v4520_v28 = vunpack.i.h.bf16 %v4518_v22  ;;  %v4519_v29 = vunpack.i.l.bf16 %v4518_v22  ;;  %v3918_v22 = vcombine.low %v2494_v16, %v2498_v18 }
 0xf06   : > { %v2339_v36 = vsel %vm540_vm0, %v1947_v33, %v4520_v28  ;;  %v2338_v24 = vsel %vm540_vm0, %v1946_v32, %v4519_v29  ;;  %v2502_v28 = vld [vmem:[#allocation13 + $0xc8] sm:$0xff] }
 0xf0b   : > { %v4523_v25 = vpop.permute.xlu1 %4522 }
 0xf0c   : > { %v4525_v30 = vunpack.i.h.bf16 %v4523_v25  ;;  %v4524_v31 = vunpack.i.l.bf16 %v4523_v25  ;;  %v2501_v25 = vld [vmem:[#allocation13 + $0xc0] sm:$0xff] }
 0xf0d   : > { %v3925_v29 = vcombine.high %v2501_v25, %v2505_v27 }
 0xf0e   : > { %v2340_v40 = vsel %vm1431_vm5, %v2338_v24, %v4524_v31  ;;  %v2341_v41 = vsel %vm1431_vm5, %v2339_v36, %v4525_v30  ;;  %v2506_v30 = vld [vmem:[#allocation13 + $0xe8] sm:$0xff]  ;;  %v3924_v31 = vcombine.low %v2501_v25, %v2505_v27  ;;  %v2513_v36 = vld [vmem:[#allocation13 + $0x120] sm:$0xff]  ;;  %v3898_v27 = vld [vmem:[#allocation5 + $0x16] ss:$0 sm:$0xff] }
 0xf0f   : > { %v3926_v32 = vcombine.low %v2502_v28, %v2506_v30  ;;  %v3927_v33 = vcombine.high %v2502_v28, %v2506_v30  ;;  %2909 = vmatprep.subr.bf16.mxu0 %v3925_v29  ;;  %v2510_v24 = vld [vmem:[#allocation13 + $0x108] sm:$0xff] }
 0xf10   : > { %2910 = vmatpush1.bf16.msra.mxu0 %v3924_v31  ;;  %v3899_v31 = vld [vmem:[#allocation5 + $0x17] ss:$0 sm:$0xff] }
 0xf13   : > { %v4528_v34 = vpop.permute.xlu1 %4527 }
 0xf14   : > { %v4530_v37 = vunpack.i.h.bf16 %v4528_v34  ;;  %v4529_v39 = vunpack.i.l.bf16 %v4528_v34  ;;  %v2509_v34 = vld [vmem:[#allocation13 + $0x100] sm:$0xff] }
 0xf16   : > { %v2342_v26 = vsel %vm1434_vm6, %v2340_v40, %v4529_v39  ;;  %v2343_v42 = vsel %vm1434_vm6, %v2341_v41, %v4530_v37  ;;  %v3933_v37 = vcombine.high %v2509_v34, %v2513_v36  ;;  %v2514_v39 = vld [vmem:[#allocation13 + $0x128] sm:$0xff]  ;;  %v3932_v40 = vcombine.low %v2509_v34, %v2513_v36  ;;  %v2491_v34 = vld [vmem:[#allocation13 + $0x70] sm:$0xff]  ;;  %v2488_v36 = vld [vmem:[#allocation13 + $0x58] sm:$0xff] }
 0xf17   : > { %v2344_v43 = vpack.c.bf16 %v2343_v42, %v2342_v26  ;;  %v3934_v41 = vcombine.low %v2510_v24, %v2514_v39  ;;  %v3935_v26 = vcombine.high %v2510_v24, %v2514_v39  ;;  %v2517_v42 = vld [vmem:[#allocation13 + $0x140] sm:$0xff]  ;;  %v2492_v24 = vld [vmem:[#allocation13 + $0x78] sm:$0xff] }
 0xf18   : > { %2911 = vmatprep.subr.bf16.mxu0 %v3933_v37 }
 0xf19   : > { %4323 = vmatmul.mubr.bf16.vlgmr.msra.gmra.mrb[36].mxu1 %v2344_v43  ;;  %2912 = vmatpush1.bf16.msra.mxu0 %v3932_v40  ;;  %v2521_v43 = vld [vmem:[#allocation13 + $0x160] sm:$0xff] }
 0xf1a   : > { %2978 = vmatprep.mubr.bf16.mxu1 %v5096_v0 }
 0xfec   : > { %v2431_v38 = vpop.f32.mrb[36].mxu1 }
 0xfed   : > { %v2432_v44 = vadd.f32 %v3889_v35, %v2431_v38  ;;  %v4324_v46 = vpop.f32.mrb[37].mxu1  ;;  %v3941_v38 = vcombine.high %v2517_v42, %v2521_v43 }
 0xfee   : > { %v2434_v48 = vpop.f32.mrb[38].mxu1  ;;  %v3940_v46 = vcombine.low %v2517_v42, %v2521_v43  ;;  %v2495_v42 = vld [vmem:[#allocation13 + $0x90] sm:$0xff] }
 0xfef   : > { %v5723_v49 = vadd.f32 %v2432_v44, %v5599_v58  ;;  %v2435_v50 = vadd.f32 %v3889_v35, %v2434_v48  ;;  %v4325_v51 = vpop.f32.mrb[39].mxu1  ;;  %v3903_v58 = vcombine.high %v2478_v47, %v2482_v56  ;;  %v2518_v35 = vld [vmem:[#allocation13 + $0x148] sm:$0xff]  ;;  %2913 = vmatprep.subr.bf16.mxu0 %v3941_v38  ;;  %v3950_v56 = vcombine.low %v2526_v45, %v2530_v54  ;;  %v2499_v43 = vld [vmem:[#allocation13 + $0xb0] sm:$0xff] }
 0xff0   : > { %v2522_v44 = vld [vmem:[#allocation13 + $0x168] sm:$0xff]  ;;  %2914 = vmatpush1.bf16.msra.mxu0 %v3940_v46  ;;  %v2525_v51 = vld [vmem:[#allocation13 + $0x180] sm:$0xff]  ;;  %v3914_v38 = vcombine.low %v2488_v36, %v2492_v24  ;;  %v3920_v45 = vcombine.low %v2495_v42, %v2499_v43 }
 0xff1   : > { %v5726_v52 = vadd.f32 %v2435_v50, %v5602_v61  ;;  %2442 = vadd.xlane.f32.xlu0 %v5723_v49  ;;  %v3911_v61 = vcombine.high %v2486_v1, %v2490_v2  ;;  %2946 = vmatprep.subr.bf16.mxu1 %v3903_v58  ;;  %v3942_v48 = vcombine.low %v2518_v35, %v2522_v44  ;;  %v2534_v58 = vld [vmem:[#allocation13 + $0x1c8] sm:$0xff] }
 0xff2   : > { %2947 = vmatpush1.bf16.msra.mxu1 %v3902_v62  ;;  %v3943_v50 = vcombine.high %v2518_v35, %v2522_v44  ;;  %v3949_v47 = vcombine.high %v2525_v51, %v2529_v53  ;;  %v3948_v55 = vcombine.low %v2525_v51, %v2529_v53  ;;  %v2537_v62 = vld [vmem:[#allocation13 + $0x1e0] sm:$0xff]  ;;  %v2538_v2 = vld [vmem:[#allocation13 + $0x1e8] sm:$0xff]  ;;  %v2500_v35 = vld [vmem:[#allocation13 + $0xb8] sm:$0xff]  ;;  %v3921_v44 = vcombine.high %v2495_v42, %v2499_v43 }
 0xff3   : > { %2444 = vadd.xlane.f32.xlu1 %v5726_v52  ;;  %2948 = vmatprep.subr.bf16.mxu1 %v3911_v61  ;;  %v3956_v63 = vcombine.low %v2533_v59, %v2537_v62  ;;  %v3957_v1 = vcombine.high %v2533_v59, %v2537_v62  ;;  %v2479_v61 = vld [vmem:[#allocation13 + $0x10] sm:$0xff]  ;;  %v2504_v51 = vld [vmem:[#allocation13 + $0xd8] sm:$0xff] }
 0xff4   : > { %2915 = vmatprep.subr.bf16.mxu0 %v3949_v47  ;;  %v2508_v53 = vld [vmem:[#allocation13 + $0xf8] sm:$0xff]  ;;  %v4618_v42 = vld [vmem:[#allocation16 + $0x88] sm:$0xff]  }
 0xff5   : > { %2916 = vmatpush1.bf16.msra.mxu0 %v3948_v55  ;;  %v3931_v55 = vcombine.high %v2504_v51, %v2508_v53  ;;  %v2512_v59 = vld [vmem:[#allocation13 + $0x118] sm:$0xff] }
 0xff6   : > { %2949 = vmatpush1.bf16.msra.mxu1 %v3910_v4  ;;  %v3958_v4 = vcombine.low %v2534_v58, %v2538_v2  ;;  %2917 = vmatprep.subr.bf16.mxu0 %v3957_v1  ;;  %v2516_v62 = vld [vmem:[#allocation13 + $0x138] sm:$0xff] }
 0xff7   : > { %2950 = vmatprep.subr.bf16.mxu1 %v3919_v23  ;;  %v4619_v43 = vld [vmem:[#allocation16 + $0x50] sm:$0xff]  }
 0xff9   : > { %2918 = vmatpush1.bf16.msra.mxu0 %v3956_v63  ;;  %v3930_v63 = vcombine.low %v2504_v51, %v2508_v53  ;;  %v4629_v51 = vld [vmem:[#allocation16 + $0x20] sm:$0xff]  }
 0xffa   : > { %2951 = vmatpush1.bf16.msra.mxu1 %v3918_v22  ;;  %v4630_v53 = vld [vmem:[#allocation16 + $0xa0] sm:$0xff]  }
 0xffb   : > { %2952 = vmatprep.subr.bf16.mxu1 %v3927_v33  ;;  %v2487_v33 = vld [vmem:[#allocation13 + $0x50] sm:$0xff] }
 0xffe   : > { %2953 = vmatpush1.bf16.msra.mxu1 %v3926_v32 }
 0xfff   : > { %2954 = vmatprep.subr.bf16.mxu1 %v3935_v26  ;;  %v3915_v26 = vcombine.high %v2488_v36, %v2492_v24  ;;  %v4612_v36 = vld [vmem:[#allocation16 + $0xc0] sm:$0xff]  }
0x1000   : > { %v4613_v24 = vld [vmem:[#allocation16] sm:$0xff]  }
0x1002   : > { %2955 = vmatpush1.bf16.msra.mxu1 %v3934_v41  ;;  %v3913_v41 = vcombine.high %v2487_v33, %v2491_v34 }
0x1003   : > { %2956 = vmatprep.subr.bf16.mxu1 %v3943_v50  ;;  %v2507_v50 = vld [vmem:[#allocation13 + $0xf0] sm:$0xff] }
0x1006   : > { %2957 = vmatpush1.bf16.msra.mxu1 %v3942_v48  ;;  %v2503_v48 = vld [vmem:[#allocation13 + $0xd0] sm:$0xff] }
0x1007   : > { %2958 = vmatprep.subr.bf16.mxu1 %v3951_v57  ;;  %v3929_v54 = vcombine.high %v2503_v48, %v2507_v50  ;;  %v2515_v57 = vld [vmem:[#allocation13 + $0x130] sm:$0xff] }
0x100a   : > { %2959 = vmatpush1.bf16.msra.mxu1 %v3950_v56  ;;  %v2511_v56 = vld [vmem:[#allocation13 + $0x110] sm:$0xff] }
0x100b   : > { %v3937_v1 = vcombine.high %v2511_v56, %v2515_v57 }
0x107e   : > { %v2443_v5 = vpop.xlane.xlu0 %2442 }
0x107f   : > { %v2446_v6 = vmul.f32 0.0078125, %v2443_v5  ;;  %v3959_v5 = vcombine.high %v2534_v58, %v2538_v2  ;;  %v3928_v58 = vcombine.low %v2503_v48, %v2507_v50  ;;  %v2519_v2 = vld [vmem:[#allocation13 + $0x150] sm:$0xff]  ;;  %v4627_v48 = vld [vmem:[#allocation16 + $0x60] sm:$0xff]  }
0x1080   : > { %v2445_v7 = vpop.xlane.xlu1 %2444  ;;  %v4628_v50 = vld [vmem:[#allocation16 + $0xe0] sm:$0xff]  }
0x1081   : > { %v5731_v8 = vsub.f32 %v5723_v49, %v2446_v6  ;;  %v2447_v60 = vmul.f32 0.0078125, %v2445_v7  ;;  %v3904_v6 = vcombine.low %v2479_v61, %v2483_v3  ;;  %v3905_v7 = vcombine.high %v2479_v61, %v2483_v3  ;;  %2960 = vmatprep.subr.bf16.mxu1 %v3959_v5  ;;  %v2523_v61 = vld [vmem:[#allocation13 + $0x170] sm:$0xff]  ;;  %v2520_v3 = vld [vmem:[#allocation13 + $0x158] sm:$0xff] }
0x1082   : > { %2961 = vmatpush1.bf16.msra.mxu1 %v3958_v4  ;;  %v2524_v4 = vld [vmem:[#allocation13 + $0x178] sm:$0xff]  ;;  %v3936_v5 = vcombine.low %v2511_v56, %v2515_v57 }
0x1083   : > { %v5734_v11 = vsub.f32 %v5726_v52, %v2447_v60  ;;  %v2450_v12 = vmul.f32 %v5731_v8, %v5731_v8  ;;  %v2480_v60 = vld [vmem:[#allocation13 + $0x18] sm:$0xff]  ;;  %2989 = vmatprep.subr.bf16.mxu0 %v3905_v7  ;;  %v3945_v7 = vcombine.high %v2519_v2, %v2523_v61 }
0x1084   : > { %v4635_v56 = vld [vmem:[#allocation16 + $0x70] sm:$0xff]  }
0x1085   : > { %2452 = vadd.xlane.f32.xlu0 %v2450_v12  ;;  %v2451_v13 = vmul.f32 %v5734_v11, %v5734_v11  ;;  %v2484_v12 = vld [vmem:[#allocation13 + $0x38] sm:$0xff] }
0x1086   : > { %v3907_v14 = vcombine.high %v2480_v60, %v2484_v12  ;;  %v4636_v57 = vld [vmem:[#allocation16 + $0xf0] sm:$0xff]  }
0x1088   : > { %3032 = vmatprep.subr.bf16.mxu1 %v3907_v14  ;;  %v2528_v14 = vld [vmem:[#allocation13 + $0x198] sm:$0xff] }
0x1089   : > { %2454 = vadd.xlane.f32.xlu0 %v2451_v13  ;;  %v3906_v13 = vcombine.low %v2480_v60, %v2484_v12  ;;  %v3947_v60 = vcombine.high %v2520_v3, %v2524_v4  ;;  %v2527_v12 = vld [vmem:[#allocation13 + $0x190] sm:$0xff] }
0x1112   : > { %v2453_v15 = vpop.xlane.xlu0 %2452 }
0x1113   : > { %v2456_v16 = vmul.f32 0.0078125, %v2453_v15  ;;  %v2532_v15 = vld [vmem:[#allocation13 + $0x1b8] sm:$0xff] }
0x1115   : > { %v2458_v17 = vadd.f32 1e-05, %v2456_v16  ;;  %v3944_v16 = vcombine.low %v2519_v2, %v2523_v61  ;;  %v2544_v2 = vshrl.u32 %v520_v10, 7 }
0x1116   : > { %v2455_v18 = vpop.xlane.xlu0 %2454 }
0x1117   : > { %4723 = vrsqrt.f32 %v2458_v17  ;;  %v2457_v20 = vmul.f32 0.0078125, %v2455_v18  ;;  %v3946_v17 = vcombine.low %v2520_v3, %v2524_v4  ;;  %v2545_v61 = vsub.s32 0, %v2544_v2  ;;  %v2541_v4 = vld [vmem:[#allocation14] sm:$0xff] }
0x1118   : > { %v2553_v3 = vsub.s32 2, %v2544_v2 }
0x1119   : > { %v2459_v22 = vadd.f32 1e-05, %v2457_v20  ;;  %v3955_v20 = vcombine.high %v2528_v14, %v2532_v15 }
0x111b   : > { %4725 = vrsqrt.f32 %v2459_v22  ;;  %v2535_v22 = vld [vmem:[#allocation13 + $0x1d0] sm:$0xff] }
0x1121   : > { %v4724_v23 = vpop.eup %4723 }
0x1122   : > { %v2462_v25 = vmul.f32 %v4724_v23, %v5731_v8  ;;  %v2496_v8 = vld [vmem:[#allocation13 + $0x98] sm:$0xff]  ;;  %v2539_v23 = vld [vmem:[#allocation13 + $0x1f0] sm:$0xff] }
0x1123   : > { %v3923_v46 = vcombine.high %v2496_v8, %v2500_v35  ;;  %v3922_v47 = vcombine.low %v2496_v8, %v2500_v35  ;;  %v4620_v8 = vld [vmem:[#allocation16 + $0xd0] sm:$0xff]  }
0x1124   : > { %v2468_v30 = vmul.f32 %v3898_v27, %v2462_v25  ;;  %v2536_v25 = vld [vmem:[#allocation13 + $0x1d8] sm:$0xff] }
0x1125   : > { %v4726_v28 = vpop.eup %4725  ;;  %v4621_v35 = vld [vmem:[#allocation16 + $0x10] sm:$0xff]  }
0x1126   : > { %v2463_v29 = vmul.f32 %v4726_v28, %v5734_v11  ;;  %v2474_v37 = vadd.f32 %v3899_v31, %v2468_v30  ;;  %v3912_v11 = vcombine.low %v2487_v33, %v2491_v34  ;;  %v3961_v30 = vcombine.high %v2535_v22, %v2539_v23  ;;  %v4611_v34 = vld [vmem:[#allocation16 + $0x40] sm:$0xff]  }
0x1128   : > { %v2469_v32 = vmul.f32 %v3898_v27, %v2463_v29  ;;  %v2540_v27 = vld [vmem:[#allocation13 + $0x1f8] sm:$0xff]  ;;  %v3954_v29 = vcombine.low %v2528_v14, %v2532_v15 }
0x1129   : > { %v3962_v33 = vcombine.low %v2536_v25, %v2540_v27 }
0x112a   : > { %v2475_v39 = vadd.f32 %v3899_v31, %v2469_v32  ;;  %v3963_v31 = vcombine.high %v2536_v25, %v2540_v27  ;;  %v3960_v32 = vcombine.low %v2535_v22, %v2539_v23 }
0x112c   : > { %v5742_v40 = vpack.c.bf16 %v2475_v39, %v2474_v37  ;;  %v4614_v37 = vld [vmem:[#allocation16 + $0x80] sm:$0xff]   ;;  %v4615_v39 = vld [vmem:[#allocation16 + $0x48] sm:$0xff]  }
0x112e   : > { %2936 = vmatmul.mubr.bf16.vlgmr.msra.gmra.mrb[52].mxu0 %v5742_v40  ;;  %2979 = vmatmul.mubr.bf16.vlgmr.msra.gmra.mrb[40].mxu1 %v5742_v40 }
0x112f   : > { %2990 = vmatpush1.bf16.msra.mxu0 %v3904_v6  ;;  %3033 = vmatpush1.bf16.msra.mxu1 %v3906_v13  ;;  %v3938_v6 = vcombine.low %v2512_v59, %v2516_v62  ;;  %v2531_v13 = vld [vmem:[#allocation13 + $0x1b0] sm:$0xff] }
0x1130   : > { %2991 = vmatprep.subr.bf16.mxu0 %v3913_v41  ;;  %3034 = vmatprep.subr.bf16.mxu1 %v3915_v26  ;;  %v3953_v18 = vcombine.high %v2527_v12, %v2531_v13  ;;  %v3952_v28 = vcombine.low %v2527_v12, %v2531_v13  ;;  %v4616_v41 = vld [vmem:[#allocation16 + $0xc8] sm:$0xff]  }
0x1131   : > { %3021 = vmatprep.mubr.bf16.mxu0 %v5096_v0  ;;  %3064 = vmatprep.mubr.bf16.mxu1 %v5096_v0  ;;  %v3939_v0 = vcombine.high %v2512_v59, %v2516_v62  ;;  %v4617_v26 = vld [vmem:[#allocation16 + $0x8] sm:$0xff]   ;;  %v4637_v59 = vld [vmem:[#allocation16 + $0x30] sm:$0xff]  }
0x1132   : > { %v4638_v62 = vld [vmem:[#allocation16 + $0xb0] sm:$0xff]  }
0x1133   : > { %2992 = vmatpush1.bf16.msra.mxu0 %v3912_v11  ;;  %3035 = vmatpush1.bf16.msra.mxu1 %v3914_v38  ;;  %v4623_v11 = vld [vmem:[#allocation16 + $0x58] sm:$0xff]  }
0x1134   : > { %2993 = vmatprep.subr.bf16.mxu0 %v3921_v44  ;;  %3036 = vmatprep.subr.bf16.mxu1 %v3923_v46  ;;  %v4624_v38 = vld [vmem:[#allocation16 + $0xd8] sm:$0xff]  }
0x1135   : > { %v4625_v44 = vld [vmem:[#allocation16 + $0x18] sm:$0xff]  }
0x1136   : > { %v4626_v46 = vld [vmem:[#allocation16 + $0x98] sm:$0xff]  }
0x1137   : > { %2994 = vmatpush1.bf16.msra.mxu0 %v3920_v45  ;;  %3037 = vmatpush1.bf16.msra.mxu1 %v3922_v47  ;;  %v4631_v45 = vld [vmem:[#allocation16 + $0x68] sm:$0xff]  }
0x1138   : > { %2995 = vmatprep.subr.bf16.mxu0 %v3929_v54  ;;  %3038 = vmatprep.subr.bf16.mxu1 %v3931_v55  ;;  %v4632_v47 = vld [vmem:[#allocation16 + $0xe8] sm:$0xff]  }
0x1139   : > { %v4633_v54 = vld [vmem:[#allocation16 + $0x28] sm:$0xff]  }
0x113a   : > { %v4634_v55 = vld [vmem:[#allocation16 + $0xa8] sm:$0xff]  }
0x113b   : > { %2996 = vmatpush1.bf16.msra.mxu0 %v3928_v58  ;;  %3039 = vmatpush1.bf16.msra.mxu1 %v3930_v63  ;;  %v4639_v58 = vld [vmem:[#allocation16 + $0x78] sm:$0xff]  }
0x113c   : > { %2997 = vmatprep.subr.bf16.mxu0 %v3937_v1  ;;  %3040 = vmatprep.subr.bf16.mxu1 %v3939_v0  ;;  %v4640_v63 = vld [vmem:[#allocation16 + $0xf8] sm:$0xff]  }
0x113d   : > { %v4641_v1 = vld [vmem:[#allocation16 + $0x38] sm:$0xff]  }
0x113e   : > { %v4642_v0 = vld [vmem:[#allocation16 + $0xb8] sm:$0xff]  }
0x113f   : > { %2998 = vmatpush1.bf16.msra.mxu0 %v3936_v5  ;;  %3041 = vmatpush1.bf16.msra.mxu1 %v3938_v6  ;;  %v2549_v5 = vsub.s32 1, %v2544_v2  ;;  %v2557_v6 = vsub.s32 3, %v2544_v2 }
0x1140   : > { %2999 = vmatprep.subr.bf16.mxu0 %v3945_v7  ;;  %3042 = vmatprep.subr.bf16.mxu1 %v3947_v60  ;;  %v2546_v7 = vrot.slane %v2541_v4, %v2545_v61  ;;  %v2554_v60 = vrot.slane %v2541_v4, %v2553_v3 }
0x1141   : > { %v2550_v12 = vrot.slane %v2541_v4, %v2549_v5  ;;  %v2558_v13 = vrot.slane %v2541_v4, %v2557_v6 }
0x1143   : > { %3000 = vmatpush1.bf16.msra.mxu0 %v3944_v16  ;;  %3043 = vmatpush1.bf16.msra.mxu1 %v3946_v17 }
0x1144   : > { %3001 = vmatprep.subr.bf16.mxu0 %v3953_v18  ;;  %3044 = vmatprep.subr.bf16.mxu1 %v3955_v20 }
0x1147   : > { %3002 = vmatpush1.bf16.msra.mxu0 %v3952_v28  ;;  %3045 = vmatpush1.bf16.msra.mxu1 %v3954_v29 }
0x1148   : > { %3003 = vmatprep.subr.bf16.mxu0 %v3961_v30  ;;  %3046 = vmatprep.subr.bf16.mxu1 %v3963_v31 }
0x114b   : > { %3004 = vmatpush1.bf16.msra.mxu0 %v3960_v32  ;;  %3047 = vmatpush1.bf16.msra.mxu1 %v3962_v33  ;;  %v2561_v33 = vsub.s32 4, %v2544_v2 }
0x114c   : > { %4086 = vmatprep.subr.bf16.mxu0 %v4611_v34  ;;  %4108 = vmatprep.subr.bf16.mxu1 %v4612_v36  ;;  %v2569_v34 = vsub.s32 6, %v2544_v2  ;;  %v2565_v36 = vsub.s32 5, %v2544_v2 }
0x114e   : > { %3022 = vmatmul.mubr.bf16.vlgmr.msra.gmra.mrb[56].mxu0 %v5742_v40  ;;  %3065 = vmatmul.mubr.bf16.vlgmr.msra.gmra.mrb[44].mxu1 %v5742_v40  ;;  %v4622_v40 = vld [vmem:[#allocation16 + $0x90] sm:$0xff]  }
0x114f   : > { %4087 = vmatpush3.bf16.msra.mxu0 %v4613_v24  ;;  %4109 = vmatpush3.bf16.msra.mxu1 %v4614_v37  ;;  %v2573_v24 = vsub.s32 7, %v2544_v2  ;;  %v2562_v37 = vrot.slane %v2541_v4, %v2561_v33 }
0x1150   : > { %4088 = vmatprep.subr.bf16.mxu0 %v4615_v39  ;;  %4110 = vmatprep.subr.bf16.mxu1 %v4616_v41  ;;  %v2570_v39 = vrot.slane %v2541_v4, %v2569_v34  ;;  %v2566_v41 = vrot.slane %v2541_v4, %v2565_v36 }
0x1153   : > { %4089 = vmatpush3.bf16.msra.mxu0 %v4617_v26  ;;  %4111 = vmatpush3.bf16.msra.mxu1 %v4618_v42  ;;  %v2574_v26 = vrot.slane %v2541_v4, %v2573_v24 }
0x1154   : > { %4090 = vmatprep.subr.bf16.mxu0 %v4619_v43  ;;  %4112 = vmatprep.subr.bf16.mxu1 %v4620_v8 }
0x1157   : > { %4091 = vmatpush3.bf16.msra.mxu0 %v4621_v35  ;;  %4113 = vmatpush3.bf16.msra.mxu1 %v4622_v40 }
0x1158   : > { %4092 = vmatprep.subr.bf16.mxu0 %v4623_v11  ;;  %4114 = vmatprep.subr.bf16.mxu1 %v4624_v38 }
0x115b   : > { %4093 = vmatpush3.bf16.msra.mxu0 %v4625_v44  ;;  %4115 = vmatpush3.bf16.msra.mxu1 %v4626_v46 }
0x115c   : > { %4094 = vmatprep.subr.bf16.mxu0 %v4627_v48  ;;  %4116 = vmatprep.subr.bf16.mxu1 %v4628_v50 }
0x115f   : > { %4095 = vmatpush3.bf16.msra.mxu0 %v4629_v51  ;;  %4117 = vmatpush3.bf16.msra.mxu1 %v4630_v53 }
0x1160   : > { %4096 = vmatprep.subr.bf16.mxu0 %v4631_v45  ;;  %4118 = vmatprep.subr.bf16.mxu1 %v4632_v47 }
0x1163   : > { %4097 = vmatpush3.bf16.msra.mxu0 %v4633_v54  ;;  %4119 = vmatpush3.bf16.msra.mxu1 %v4634_v55 }
0x1164   : > { %4098 = vmatprep.subr.bf16.mxu0 %v4635_v56  ;;  %4120 = vmatprep.subr.bf16.mxu1 %v4636_v57 }
0x1167   : > { %4099 = vmatpush3.bf16.msra.mxu0 %v4637_v59  ;;  %4121 = vmatpush3.bf16.msra.mxu1 %v4638_v62 }
0x1168   : > { %4100 = vmatprep.subr.bf16.mxu0 %v4639_v58  ;;  %4122 = vmatprep.subr.bf16.mxu1 %v4640_v63 }
0x116b   : > { %4101 = vmatpush3.bf16.msra.mxu0 %v4641_v1  ;;  %4123 = vmatpush3.bf16.msra.mxu1 %v4642_v0 }
0x116c   : > { %4326 = vmatprep.subr.bf16.mxu0 %v5097_v9 }
0x1201   : > { %v2937_v14 = vpop.f32.mrb[52].mxu0  ;;  %v2980_v15 = vpop.f32.mrb[40].mxu1 }
0x1202   : > { %v5752_v16 = vadd.f32 %v2937_v14, %v2546_v7  ;;  %v5754_v17 = vadd.f32 %v2980_v15, %v2554_v60  ;;  %v2939_v18 = vpop.f32.mrb[53].mxu0  ;;  %v2982_v20 = vpop.f32.mrb[41].mxu1 }
0x1203   : > { %v5756_v22 = vadd.f32 %v2939_v18, %v2550_v12  ;;  %v5758_v10 = vadd.f32 %v2982_v20, %v2558_v13  ;;  %v2941_v23 = vpop.f32.mrb[54].mxu0  ;;  %v2984_v25 = vpop.f32.mrb[42].mxu1 }
0x1204   : > { %v5760_v27 = vadd.f32 %v2941_v23, %v2546_v7  ;;  %v5762_v28 = vadd.f32 %v2984_v25, %v2554_v60  ;;  %v2943_v29 = vpop.f32.mrb[55].mxu0  ;;  %v2986_v30 = vpop.f32.mrb[43].mxu1 }
0x1205   : > { %v5764_v31 = vadd.f32 %v2943_v29, %v2550_v12  ;;  %v5766_v32 = vadd.f32 %v2986_v30, %v2558_v13 }
0x1221   : > { %v3023_v42 = vpop.f32.mrb[56].mxu0  ;;  %v3066_v43 = vpop.f32.mrb[44].mxu1 }
0x1222   : > { %v5768_v8 = vadd.f32 %v3023_v42, %v2562_v37  ;;  %v5770_v35 = vadd.f32 %v3066_v43, %v2570_v39  ;;  %v3025_v40 = vpop.f32.mrb[57].mxu0  ;;  %v3068_v11 = vpop.f32.mrb[45].mxu1 }
0x1223   : > { %v5772_v38 = vadd.f32 %v3025_v40, %v2566_v41  ;;  %v5774_v44 = vadd.f32 %v3068_v11, %v2574_v26  ;;  %v3027_v46 = vpop.f32.mrb[58].mxu0  ;;  %v3070_v48 = vpop.f32.mrb[46].mxu1 }
0x1224   : > { %v3083_v50 = vmul.f32 0.044715, %v5768_v8  ;;  %v3085_v51 = vmul.f32 0.044715, %v5770_v35  ;;  %v3028_v47 = vadd.f32 %v3027_v46, %v2562_v37  ;;  %v5780_v54 = vadd.f32 %v3070_v48, %v2570_v39  ;;  %v3029_v55 = vpop.f32.mrb[59].mxu0  ;;  %v3072_v56 = vpop.f32.mrb[47].mxu1 }
0x1225   : > { %v3084_v53 = vmul.f32 0.044715, %v5772_v38  ;;  %v3086_v45 = vmul.f32 0.044715, %v5774_v44  ;;  %v5784_v62 = vadd.f32 %v3029_v55, %v2566_v41  ;;  %v5786_v58 = vadd.f32 %v3072_v56, %v2574_v26 }
0x1226   : > { %v3091_v57 = vmul.f32 %v3083_v50, %v5768_v8  ;;  %v3093_v59 = vmul.f32 %v3085_v51, %v5770_v35  ;;  %v3087_v0 = vmul.f32 0.044715, %v3028_v47  ;;  %v3089_v3 = vmul.f32 0.044715, %v5780_v54 }
0x1227   : > { %v3092_v63 = vmul.f32 %v3084_v53, %v5772_v38  ;;  %v3094_v1 = vmul.f32 %v3086_v45, %v5774_v44  ;;  %v3088_v7 = vmul.f32 0.044715, %v5784_v62  ;;  %v3090_v14 = vmul.f32 0.044715, %v5786_v58 }
0x1228   : > { %v3099_v2 = vmul.f32 %v3091_v57, %v5768_v8  ;;  %v3101_v61 = vmul.f32 %v3093_v59, %v5770_v35  ;;  %v3095_v6 = vmul.f32 %v3087_v0, %v3028_v47  ;;  %v3097_v13 = vmul.f32 %v3089_v3, %v5780_v54 }
0x1229   : > { %v3100_v4 = vmul.f32 %v3092_v63, %v5772_v38  ;;  %v3102_v5 = vmul.f32 %v3094_v1, %v5774_v44  ;;  %v3096_v20 = vmul.f32 %v3088_v7, %v5784_v62  ;;  %v3098_v30 = vmul.f32 %v3090_v14, %v5786_v58 }
0x122a   : > { %v3107_v60 = vadd.f32 %v3099_v2, %v5768_v8  ;;  %v3109_v12 = vadd.f32 %v3101_v61, %v5770_v35  ;;  %v3103_v18 = vmul.f32 %v3095_v6, %v3028_v47  ;;  %v3105_v29 = vmul.f32 %v3097_v13, %v5780_v54 }
0x122b   : > { %v3108_v15 = vadd.f32 %v3100_v4, %v5772_v38  ;;  %v3110_v33 = vadd.f32 %v3102_v5, %v5774_v44  ;;  %v3104_v36 = vmul.f32 %v3096_v20, %v5784_v62  ;;  %v3106_v37 = vmul.f32 %v3098_v30, %v5786_v58 }
0x122c   : > { %v3115_v23 = vmul.f32 0.7978846, %v3107_v60  ;;  %v3117_v25 = vmul.f32 0.7978846, %v3109_v12  ;;  %v3111_v34 = vadd.f32 %v3103_v18, %v3028_v47  ;;  %v3113_v24 = vadd.f32 %v3105_v29, %v5780_v54 }
0x122d   : > { %v3116_v39 = vmul.f32 0.7978846, %v3108_v15  ;;  %v3112_v26 = vadd.f32 %v3104_v36, %v5784_v62  ;;  %v3114_v43 = vadd.f32 %v3106_v37, %v5786_v58  ;;  %v3118_v11 = vmul.f32 0.7978846, %v3110_v33  ;;  %v4649_v37 = vld [vmem:[%s5922_s10 + $0x30] sm:$0xff]  }
0x122e   : > { %4727 = vtanh.f32 %v3115_v23  ;;  %v3119_v41 = vmul.f32 0.7978846, %v3111_v34  ;;  %v3121_v42 = vmul.f32 0.7978846, %v3113_v24  ;;  %v3075_v51 = vmul.f32 0.5, %v5768_v8 }
0x122f   : > { %4729 = vtanh.f32 %v3117_v25  ;;  %v3120_v40 = vmul.f32 0.7978846, %v3112_v26  ;;  %v3122_v46 = vmul.f32 0.7978846, %v3114_v43  ;;  %v3077_v55 = vmul.f32 0.5, %v5770_v35 }
0x1230   : > { %4731 = vtanh.f32 %v3116_v39  ;;  %v3076_v59 = vmul.f32 0.5, %v5772_v38  ;;  %v3079_v2 = vmul.f32 0.5, %v3028_v47  ;;  %v3081_v5 = vmul.f32 0.5, %v5780_v54  ;;  %v4650_v39 = vld [vmem:[%s5922_s10 + $0x38] sm:$0xff]  }
0x1231   : > { %4733 = vtanh.f32 %v3119_v41  ;;  %v3080_v35 = vmul.f32 0.5, %v5784_v62  ;;  %v3078_v47 = vmul.f32 0.5, %v5774_v44  ;;  %v3082_v54 = vmul.f32 0.5, %v5786_v58  ;;  %v4643_v58 = vld [vmem:[%s5922_s10] sm:$0xff]   ;;  %v3964_v26 = vld [vmem:[#allocation5 + $0x18] ss:$0 sm:$0xff] }
0x1232   : > { %4735 = vtanh.f32 %v3121_v42 }
0x1233   : > { %4737 = vtanh.f32 %v3120_v40 }
0x1234   : > { %4739 = vtanh.f32 %v3118_v11 }
0x1235   : > { %4741 = vtanh.f32 %v3122_v46 }
0x1238   : > { %v4728_v48 = vpop.eup %4727 }
0x1239   : > { %v4730_v50 = vpop.eup %4729  ;;  %v3131_v53 = vadd.f32 1.0, %v4728_v48 }
0x123a   : > { %v4732_v45 = vpop.eup %4731  ;;  %v3133_v56 = vadd.f32 1.0, %v4730_v50 }
0x123b   : > { %v4734_v57 = vpop.eup %4733  ;;  %v3132_v63 = vadd.f32 1.0, %v4732_v45  ;;  %v3139_v1 = vmul.f32 %v3131_v53, %v3075_v51 }
0x123c   : > { %v4736_v0 = vpop.eup %4735  ;;  %v3135_v61 = vadd.f32 1.0, %v4734_v57  ;;  %v3141_v3 = vmul.f32 %v3133_v56, %v3077_v55 }
0x123d   : > { %v4738_v4 = vpop.eup %4737  ;;  %v3140_v6 = vmul.f32 %v3132_v63, %v3076_v59  ;;  %v3147_v8 = vmul.f32 %v3139_v1, %v5752_v16  ;;  %v3137_v7 = vadd.f32 1.0, %v4736_v0 }
0x123e   : > { %v4740_v60 = vpop.eup %4739  ;;  %v3136_v12 = vadd.f32 1.0, %v4738_v4  ;;  %v3143_v13 = vmul.f32 %v3135_v61, %v3079_v2  ;;  %v3149_v38 = vmul.f32 %v3141_v3, %v5754_v17  ;;  %v3997_v2 = vld [vmem:[#allocation5 + $0x19] ss:$0 sm:$0xff] }
0x123f   : > { %v4742_v14 = vpop.eup %4741  ;;  %v3148_v15 = vmul.f32 %v3140_v6, %v5756_v22  ;;  %v3134_v18 = vadd.f32 1.0, %v4740_v60  ;;  %v3145_v20 = vmul.f32 %v3137_v7, %v3081_v5 }
0x1240   : > { %v3144_v23 = vmul.f32 %v3136_v12, %v3080_v35  ;;  %v3138_v25 = vadd.f32 1.0, %v4742_v14  ;;  %v3151_v16 = vmul.f32 %v3143_v13, %v5760_v27  ;;  %v4644_v27 = vld [vmem:[%s5922_s10 + $0x8] sm:$0xff]  }
0x1241   : > { %v3142_v29 = vmul.f32 %v3134_v18, %v3078_v47  ;;  %v3153_v62 = vmul.f32 %v3145_v20, %v5762_v28  ;;  %v4646_v28 = vld [vmem:[%s5922_s10 + $0x18] sm:$0xff]  }
0x1242   : > { %v3152_v30 = vmul.f32 %v3144_v23, %v5764_v31  ;;  %v3146_v33 = vmul.f32 %v3138_v25, %v3082_v54  ;;  %v3155_v17 = vpack.c.bf16 %v3151_v16, %v3147_v8  ;;  %v4647_v31 = vld [vmem:[%s5922_s10 + $0x20] sm:$0xff]  }
0x1243   : > { %v3150_v34 = vmul.f32 %v3142_v29, %v5758_v10  ;;  %v3157_v22 = vpack.c.bf16 %v3153_v62, %v3149_v38  ;;  %v4645_v10 = vld [vmem:[%s5922_s10 + $0x10] sm:$0xff]  }
0x1244   : > { %v3156_v36 = vpack.c.bf16 %v3152_v30, %v3148_v15  ;;  %v3154_v44 = vmul.f32 %v3146_v33, %v5766_v32  ;;  %v4648_v32 = vld [vmem:[%s5922_s10 + $0x28] sm:$0xff]  }
0x1246   : > { %3452 = vmatprep.mubr.bf16.mxu0 %v3156_v36  ;;  %v3158_v24 = vpack.c.bf16 %v3154_v44, %v3150_v34 }
0x1247   : > { %3453 = vmatmul.mubr.bf16.vlgmr.msra.gmra.mrb[60].mxu0 %v3155_v17 }
0x1248   : > { %3493 = vmatprep.mubr.bf16.mxu1 %v3158_v24  ;;  %4327 = vmatpush3.bf16.msra.mxu0 %v4643_v58 }
0x1249   : > { %3494 = vmatmul.mubr.bf16.vlgmr.msra.gmra.mrb[48].mxu1 %v3157_v22  ;;  %4328 = vmatprep.subr.bf16.mxu0 %v5097_v9 }
0x124a   : > { %4342 = vmatprep.mubr.msk.bf16.mxu0 %vm5098_vm3, %v5097_v9 }
0x124c   : > { %4329 = vmatpush3.bf16.msra.mxu0 %v4644_v27 }
0x124d   : > { %4330 = vmatprep.subr.bf16.mxu0 %v5097_v9 }
0x1250   : > { %4331 = vmatpush3.bf16.msra.mxu0 %v4645_v10 }
0x1251   : > { %4332 = vmatprep.subr.bf16.mxu0 %v5097_v9 }
0x1254   : > { %4333 = vmatpush3.bf16.msra.mxu0 %v4646_v28 }
0x1255   : > { %4334 = vmatprep.subr.bf16.mxu0 %v5097_v9 }
0x1258   : > { %4335 = vmatpush3.bf16.msra.mxu0 %v4647_v31 }
0x1259   : > { %4336 = vmatprep.subr.bf16.mxu0 %v5097_v9 }
0x125c   : > { %4337 = vmatpush3.bf16.msra.mxu0 %v4648_v32 }
0x125d   : > { %4338 = vmatprep.subr.bf16.mxu0 %v5097_v9 }
0x1260   : > { %4339 = vmatpush3.bf16.msra.mxu0 %v4649_v37 }
0x1261   : > { %4340 = vmatprep.subr.bf16.mxu0 %v5097_v9 }
0x1264   : > { %4341 = vmatpush3.bf16.msra.mxu0 %v4650_v39 }
0x131a   : > { %v4102_v41 = vpop.f32.mrb[60].mxu0 }
0x131b   : > { %v4103_v42 = vpop.f32.mrb[61].mxu0 }
0x131c   : > { %v4124_v43 = vpop.f32.mrb[48].mxu1  ;;  %v4104_v40 = vadd.f32 %v4103_v42, %v4102_v41  ;;  %v4105_v11 = vpop.f32.mrb[62].mxu0 }
0x131d   : > { %v4125_v46 = vpop.f32.mrb[49].mxu1  ;;  %v4106_v48 = vpop.f32.mrb[63].mxu0 }
0x131e   : > { %v3455_v50 = vadd.f32 %v4104_v40, %v3964_v26  ;;  %v4126_v51 = vadd.f32 %v4125_v46, %v4124_v43  ;;  %v4127_v53 = vpop.f32.mrb[50].mxu1  ;;  %v4107_v45 = vadd.f32 %v4106_v48, %v4105_v11 }
0x131f   : > { %v4128_v55 = vpop.f32.mrb[51].mxu1 }
0x1320   : > { %v3496_v56 = vadd.f32 %v4126_v51, %v3455_v50  ;;  %v3458_v57 = vadd.f32 %v4107_v45, %v3964_v26  ;;  %v4129_v59 = vadd.f32 %v4128_v55, %v4127_v53 }
0x1322   : > { %v3499_v9 = vadd.f32 %v4129_v59, %v3458_v57  ;;  %v3502_v63 = vadd.f32 %v3496_v56, %v5723_v49 }
0x1324   : > { %v3503_v1 = vadd.f32 %v3499_v9, %v5726_v52 }
0x1326   : > { %v3504_v0 = vpack.c.bf16 %v3503_v1, %v3502_v63 }
0x1328   : > { %4343 = vmatmul.mubr.bf16.vlgmr.msra.gmra.mrb[64].mxu0 %v3504_v0 }
0x13fb   : > { %v3608_v61 = vpop.f32.mrb[64].mxu0 }
0x13fc   : > { %v3609_v3 = vadd.f32 %v3997_v2, %v3608_v61  ;;  %v4344_v4 = vpop.f32.mrb[65].mxu0 }
0x13fd   : > { %v3611_v5 = vpop.f32.mrb[66].mxu0 }
0x13fe   : > { %v3615_v6 = vadd.f32 %v3609_v3, %v5471_v19  ;;  %v3612_v8 = vadd.f32 %v3997_v2, %v3611_v5  ;;  %v4345_v7 = vpop.f32.mrb[67].mxu0 }
0x1400   : > { %3617 = vst [vmem:[%s509_s19] sm:$0xff] %v3615_v6  ;;  %v3616_v49 = vadd.f32 %v3612_v8, %v5474_v21 }
0x1402   : > { %3618 = vst [vmem:[%s509_s19 + $0x8] sm:$0xff] %v3616_v49 }
0x1403   : > { %5008 = shalt.err (!%p5005_p13)
}
0x1404   : > { %s5009_s30 = scalar_lea.hbm %s5869_s20, 256  ;;  %s5013_s23 = scalar_lea.hbm %s5923_s11, 512 }
0x1405   : > { %p5010_p12 = scmp.ne.s32.totalorder %s5869_s20, %s5009_s30  ;;  %p5014_p3 = scmp.lt.u32.totalorder %s5869_s20, %s5923_s11 }
0x1406   : > { %p5015_p4 = scmp.lt.u32.totalorder %s5013_s23, %s5009_s30  ;;  %p5017_p8 = scmp.lt.u32.totalorder %s5009_s30, %s5869_s20 }
0x1407   : > { %p5011_p1 = pnand %p5010_p12, %p5965_p11 }
0x1408   : > { %p5016_p7 = por %p5015_p4, %p5014_p3 }
0x1409   : > { %p5012_p2 = pneg %p5011_p1 }
0x140a   : > { %p5018_p5 = por %p5017_p8, %p5016_p7 }
0x140c   : > { %p5019_p0 = pnand %p5018_p5, %p5012_p2 }
0x140e   : > { %5022 = shalt.err (!%p5019_p0)
}
0x140f   : > { %s5103_s22 = smov 128   ;;  %s5104_s19 = smov 8  }
0x1410   : > { %4390 = dma.vmem_to_hbm [thread:$0]  (%p5965_p11), %s5863_s25, 256, %s5869_s20, %s5871_s16, %s5103_s22, %s5103_s22, %s5104_s19  }
0x1411 PF: > { %s5966_s26 = sld [smem:[#allocation26_spill]]  ;;  %s5967_s24 = sld [smem:[#allocation24_spill]] }
0x1412   : > { %s5968_s28 = sld [smem:[#allocation29_spill]] }
0x1417   : > { %p4442_p6 = scmp.ge.s32.totalorder %s5966_s26, 2  ;;  %s3648_s21 = sand.u32 1, %s5967_s24  }
0x1418   : > { %p5969_p9 = scmp.ne.s32.totalorder %s5968_s28, 0  ;;  %s3649_s17 = scalar_lea.sflag [#allocation4], %s3648_s21 }
0x141a   : > { %p4421_p10 = pnand %p4442_p6, %p5969_p9 }
0x141c   : > { %5060 = dma.done.wait (!%p4421_p10), %s3649_s17, 256  }
0x141d   : > { %5062 = vsyncadd (!%p4421_p10), %s3649_s17, 4294967040  ;;  %s5970_s20 = sld [smem:[#allocation27_spill]]  ;;  %s5971_s29 = sld [smem:[#allocation25_spill]] }
0x141e   : > { %s5972_s19 = sld [smem:[#allocation28_spill]]  ;;  %s5973_s17 = smov %s5069_s18 }
0x1423   : > { %p26_p13 = scmp.ge.s32.totalorder %s5970_s20, 4   ;;  %s5974_s18 = smov %s5971_s29 }
0x1425   :  { %28 = sbr.rel (!%p26_p13) target bundleno = 10 (0xa), region = 136 }
0x142c   :  { %3654 = vsyncpa [#allocation3], 1 }
0x142d   :  { %3656 = vsyncpa [#allocation3 + $0x1], 1 }
0x142e   :  { %3657 = vsyncpa [#allocation6], 1 }
0x142f   :  { %3658 = vsyncpa [#allocation9], 1 }
0x1430   :  { %3659 = vsyncpa [#allocation12], 1 }
0x1431   :  { %3660 = vsyncpa [#allocation15], 1 }
0x1432   :  { %3661 = vsyncpa [#allocation4], 1 }
0x1433   :  { %3663 = vsyncpa [#allocation4 + $0x1], 1 }

</bundles_post_ra>
